<compile_context>
chip_gen: v7x
topology: tpu7x:2x2x1
jax: 0.10.0
libtpu: 0.0.40
codegen_flags: <defaults>
</compile_context>

<pallas_src>
import functools
import numpy as np
import jax
import jax.numpy as jnp
from jax import lax
from jax.experimental import pallas as pl
from jax.experimental.pallas import tpu as pltpu


# ------------------------------ in-kernel helpers ------------------------------

def _mm(a, b, *, ta=False, tb=False):
    """bf16 MXU matmul with f32 accumulation.
    ta: contract a's dim 0 (i.e. a.T @ b)   tb: contract b's dim 1 (i.e. a @ b.T)."""
    dn = (((0 if ta else 1,), (1 if tb else 0,)), ((), ()))
    return lax.dot_general(a.astype(jnp.bfloat16), b.astype(jnp.bfloat16), dn,
                           preferred_element_type=jnp.float32)


# ----------------------------------- kernel ------------------------------------

def _vbgae3_kernel(adj_ref, x1_ref, wb1_ref, wc1_ref, x2_ref, wb2_ref, wc2_ref,
                   n1_ref, n2_ref, n3_ref, sel_ref,
                   apred_ref, apred2_ref, z1_ref, z2_ref, z3_ref,
                   *, latent_dim, q):
    D = latent_dim
    adj = adj_ref[...]                                   # (N1, N2) bf16, {0,1}

    # ----- encoder 1 : base GCN uses adj.T, mean/logstd head uses adj -----
    xw1 = _mm(x1_ref[...], wb1_ref[...])                 # (N1, H1)
    hidden1 = jnp.maximum(_mm(adj, xw1, ta=True), 0.0)   # adj.T @ xw1 -> (N2, H1)
    t1 = _mm(adj, hidden1)                               # (N1, H1)
    head1 = _mm(t1, wc1_ref[...])                        # (N1, 2D) = [mean1 | logstd1]
    mean1, logstd1 = head1[:, :D], head1[:, D:]
    z1 = n1_ref[...] * jnp.exp(logstd1) + mean1          # reparameterize (f32)
    z1_ref[...] = z1

    # ----- encode3 : one sampled row per species (one-hot selection, fresh noise) -----
    sel = sel_ref[...]                                    # (S, N1) bf16 one-hot
    mean3 = _mm(sel, mean1)                               # (S, D)
    logstd3 = _mm(sel, logstd1)                           # (S, D)
    z3 = n3_ref[...] * jnp.exp(logstd3) + mean3
    z3_ref[...] = z3

    # ----- encoder 2 : base GCN uses adj, mean/logstd head uses adj.T -----
    xw2 = _mm(x2_ref[...], wb2_ref[...])                  # (N2, H2)
    hidden2 = jnp.maximum(_mm(adj, xw2), 0.0)             # (N1, H2)
    t2 = _mm(adj, hidden2, ta=True)                       # adj.T @ hidden2 -> (N2, H2)
    head2 = _mm(t2, wc2_ref[...])                         # (N2, 2D)
    mean2, logstd2 = head2[:, :D], head2[:, D:]
    z2 = n2_ref[...] * jnp.exp(logstd2) + mean2
    z2_ref[...] = z2

    # ----- GRDPG decode : sigmoid(Z @ I_pq @ Z2.T), I_pq negates the LAST q columns -----
    z2s = z2
    if q > 0:
        col = lax.broadcasted_iota(jnp.int32, (1, D), 1)
        z2s = z2 * jnp.where(col >= D - q, -1.0, 1.0)
    # contract last dims of both operands -> no explicit transpose of Z2 needed
    apred_ref[...] = jax.nn.sigmoid(_mm(z1, z2s, tb=True))    # (N1, N2)
    apred2_ref[...] = jax.nn.sigmoid(_mm(z3, z2s, tb=True))   # (S, N2)


# -------------------------------- thin wrappers ---------------------------------

def _full_spec(shape):
    return pl.BlockSpec(shape, lambda i: (0,) * len(shape))


def _pad_axis_to(x, axis, mult):
    pad = (-x.shape[axis]) % mult
    if pad == 0:
        return x
    widths = [(0, 0)] * x.ndim
    widths[axis] = (0, pad)
    return jnp.pad(x, widths)


def _fused_forward(adj, x1, wb1, wc1, x2, wb2, wc2, n1, n2, n3, sel, *, q):
    N1, N2 = adj.shape
    D = wc1.shape[1] // 2
    assert wc2.shape[1] // 2 == D, "latent dims of both encoders must match for GRDPG"
    S = sel.shape[0]
    out_shapes = (
        jax.ShapeDtypeStruct((N1, N2), jnp.float32),   # A_pred
        jax.ShapeDtypeStruct((S, N2), jnp.float32),    # A_pred2
        jax.ShapeDtypeStruct((N1, D), jnp.float32),    # Z1
        jax.ShapeDtypeStruct((N2, D), jnp.float32),    # Z2
        jax.ShapeDtypeStruct((S, D), jnp.float32),     # Z3
    )
    args = (adj, x1, wb1, wc1, x2, wb2, wc2, n1, n2, n3, sel)
    return pl.pallas_call(
        functools.partial(_vbgae3_kernel, latent_dim=D, q=q),
        out_shape=out_shapes,
        grid=(1,),
        in_specs=[_full_spec(a.shape) for a in args],
        out_specs=tuple(_full_spec(s.shape) for s in out_shapes),
        compiler_params=pltpu.CompilerParams(dimension_semantics=("arbitrary",)),
    )(*args)


# --------------------------------- VBGAE3 model ----------------------------------

def glorot_init(key, in_dim, out_dim):
    r = float(np.sqrt(6.0 / (in_dim + out_dim)))
    return jax.random.uniform(key, (in_dim, out_dim), jnp.float32, minval=-r, maxval=r)


def init_params(key, in1, h11, h21, in2, h12, h22):
    ks = jax.random.split(key, 6)
    return {
        "w_base1":   glorot_init(ks[0], in1, h11),
        "w_mean1":   glorot_init(ks[1], h11, h21),
        "w_logstd1": glorot_init(ks[2], h11, h21),
        "w_base2":   glorot_init(ks[3], in2, h12),
        "w_mean2":   glorot_init(ks[4], h12, h22),
        "w_logstd2": glorot_init(ks[5], h12, h22),
    }


@functools.partial(jax.jit, static_argnames=("grdpg_q",))
def vbgae3_forward(params, adj, X1, X2, noise1, noise2, noise3,
                   species_pick_idx, grdpg_q):
    cdt = jnp.bfloat16  # MXU operand dtype (adj is {0,1} -> exact)

    # Concatenated mean/logstd head weights -> single fat head matmul in-kernel.
    w_head1 = jnp.concatenate([params["w_mean1"], params["w_logstd1"]], axis=1)
    w_head2 = jnp.concatenate([params["w_mean2"], params["w_logstd2"]], axis=1)

    # Zero-pad the K=input_dim contraction to a full 128 lanes (exact).
    X1p = _pad_axis_to(X1, 1, 128)
    X2p = _pad_axis_to(X2, 1, 128)
    Wb1p = _pad_axis_to(params["w_base1"], 0, 128)
    Wb2p = _pad_axis_to(params["w_base2"], 0, 128)

    # One-hot species-row selector: the Z3 gather becomes a tiny (S, N1) MXU matmul
    # inside the fused kernel (no full Z1' is ever computed or written back).
    sel = jax.nn.one_hot(species_pick_idx, adj.shape[0], dtype=jnp.float32)

    return _fused_forward(
        adj.astype(cdt), X1p.astype(cdt), Wb1p.astype(cdt), w_head1.astype(cdt),
        X2p.astype(cdt), Wb2p.astype(cdt), w_head2.astype(cdt),
        noise1, noise2, noise3, sel.astype(cdt), q=grdpg_q)


# ------------------------------------- main ---------------------------------------

if __name__ == "__main__":
    # Lane-dense demo shapes: last dims multiples of 128, row counts multiples of 8.
    N1, N2 = 256, 128                         # observations / plants
    input_dim1, input_dim2 = 32, 32
    hidden1_dim1, hidden1_dim2 = 256, 256     # base-GCN width (256 fills v6e/v7x MXU)
    hidden2_dim1, hidden2_dim2 = 128, 128     # latent dims (must match for the decoder)
    GRDPG_q = 1
    n_species = 8

    key = jax.random.PRNGKey(0)
    k_par, k_x1, k_x2, k_adj, k_n1, k_n2, k_n3 = jax.random.split(key, 7)

    params = init_params(k_par, input_dim1, hidden1_dim1, hidden2_dim1,
                         input_dim2, hidden1_dim2, hidden2_dim2)

    # Scaled features / moderate density: the module applies the raw 0/1 adjacency with
    # no degree normalization, so O(1) features overflow exp(logstd) (previous failure).
    X1 = 0.02 * jax.random.normal(k_x1, (N1, input_dim1), jnp.float32)
    X2 = 0.02 * jax.random.normal(k_x2, (N2, input_dim2), jnp.float32)
    adj = (jax.random.uniform(k_adj, (N1, N2)) < 0.2).astype(jnp.float32)

    noise1 = jax.random.normal(k_n1, (N1, hidden2_dim1), jnp.float32)
    noise2 = jax.random.normal(k_n2, (N2, hidden2_dim2), jnp.float32)
    noise3 = jax.random.normal(k_n3, (n_species, hidden2_dim1), jnp.float32)  # picked rows only

    # TODO(synk): pandas groupby(species).sample(1) has no Pallas equivalent; one member
    # per species is picked host-side, the row selection itself runs inside the kernel.
    species = np.arange(N1) % n_species
    rng = np.random.RandomState(0)
    species_pick_idx = jnp.asarray(
        [int(rng.choice(np.where(species == s)[0])) for s in range(n_species)],
        dtype=jnp.int32)

    A_pred, A_pred2, Z1, Z2, Z3 = vbgae3_forward(
        params, adj, X1, X2, noise1, noise2, noise3, species_pick_idx, GRDPG_q)
    jax.block_until_ready((A_pred, A_pred2, Z1, Z2, Z3))

    assert A_pred.shape == (N1, N2)
    assert A_pred2.shape == (n_species, N2)
    assert Z1.shape == (N1, hidden2_dim1)
    assert Z2.shape == (N2, hidden2_dim2)
    assert Z3.shape == (n_species, hidden2_dim1)
    assert bool(jnp.all(jnp.isfinite(A_pred))) and bool(jnp.all(jnp.isfinite(A_pred2)))
    assert bool(jnp.all(jnp.isfinite(Z1))) and bool(jnp.all(jnp.isfinite(Z2)))
    assert bool(jnp.all((A_pred >= 0.0) & (A_pred <= 1.0)))
    print("KERNEL_OK")
</pallas_src>

<mosaic_0001>
module attributes {stable_mosaic.version = 11 : i64} {
  func.func @_vbgae3_kernel(%arg0: i32, %arg1: memref<256x128xbf16, #tpu.memory_space<vmem>>, %arg2: memref<256x128xbf16, #tpu.memory_space<vmem>>, %arg3: memref<128x256xbf16, #tpu.memory_space<vmem>>, %arg4: memref<256x256xbf16, #tpu.memory_space<vmem>>, %arg5: memref<128x128xbf16, #tpu.memory_space<vmem>>, %arg6: memref<128x256xbf16, #tpu.memory_space<vmem>>, %arg7: memref<256x256xbf16, #tpu.memory_space<vmem>>, %arg8: memref<256x128xf32, #tpu.memory_space<vmem>>, %arg9: memref<128x128xf32, #tpu.memory_space<vmem>>, %arg10: memref<8x128xf32, #tpu.memory_space<vmem>>, %arg11: memref<8x256xbf16, #tpu.memory_space<vmem>>, %arg12: memref<256x128xf32, #tpu.memory_space<vmem>>, %arg13: memref<8x128xf32, #tpu.memory_space<vmem>>, %arg14: memref<256x128xf32, #tpu.memory_space<vmem>>, %arg15: memref<128x128xf32, #tpu.memory_space<vmem>>, %arg16: memref<8x128xf32, #tpu.memory_space<vmem>>) attributes {dimension_semantics = [#tpu.dimension_semantics<arbitrary>], iteration_bounds = array<i64: 1>, scalar_prefetch = 0 : i64, scratch_operands = 0 : i64, tpu.core_type = #tpu.core_type<tc>, window_params = [{pipeline_mode = #tpu.pipeline_mode<synchronous>, transform_indices = @transform_0, window_bounds = array<i64: 256, 128>}, {pipeline_mode = #tpu.pipeline_mode<synchronous>, transform_indices = @transform_1, window_bounds = array<i64: 256, 128>}, {pipeline_mode = #tpu.pipeline_mode<synchronous>, transform_indices = @transform_2, window_bounds = array<i64: 128, 256>}, {pipeline_mode = #tpu.pipeline_mode<synchronous>, transform_indices = @transform_3, window_bounds = array<i64: 256, 256>}, {pipeline_mode = #tpu.pipeline_mode<synchronous>, transform_indices = @transform_4, window_bounds = array<i64: 128, 128>}, {pipeline_mode = #tpu.pipeline_mode<synchronous>, transform_indices = @transform_5, window_bounds = array<i64: 128, 256>}, {pipeline_mode = #tpu.pipeline_mode<synchronous>, transform_indices = @transform_6, window_bounds = array<i64: 256, 256>}, {pipeline_mode = #tpu.pipeline_mode<synchronous>, transform_indices = @transform_7, window_bounds = array<i64: 256, 128>}, {pipeline_mode = #tpu.pipeline_mode<synchronous>, transform_indices = @transform_8, window_bounds = array<i64: 128, 128>}, {pipeline_mode = #tpu.pipeline_mode<synchronous>, transform_indices = @transform_9, window_bounds = array<i64: 8, 128>}, {pipeline_mode = #tpu.pipeline_mode<synchronous>, transform_indices = @transform_10, window_bounds = array<i64: 8, 256>}, {pipeline_mode = #tpu.pipeline_mode<synchronous>, transform_indices = @transform_11, window_bounds = array<i64: 256, 128>}, {pipeline_mode = #tpu.pipeline_mode<synchronous>, transform_indices = @transform_12, window_bounds = array<i64: 8, 128>}, {pipeline_mode = #tpu.pipeline_mode<synchronous>, transform_indices = @transform_13, window_bounds = array<i64: 256, 128>}, {pipeline_mode = #tpu.pipeline_mode<synchronous>, transform_indices = @transform_14, window_bounds = array<i64: 128, 128>}, {pipeline_mode = #tpu.pipeline_mode<synchronous>, transform_indices = @transform_15, window_bounds = array<i64: 8, 128>}]} {
    %c0 = arith.constant 0 : index
    %c0_0 = arith.constant 0 : index
    %0 = vector.load %arg1[%c0, %c0_0] : memref<256x128xbf16, #tpu.memory_space<vmem>>, vector<256x128xbf16>
    %c0_1 = arith.constant 0 : index
    %c0_2 = arith.constant 0 : index
    %1 = vector.load %arg2[%c0_1, %c0_2] : memref<256x128xbf16, #tpu.memory_space<vmem>>, vector<256x128xbf16>
    %c0_3 = arith.constant 0 : index
    %c0_4 = arith.constant 0 : index
    %2 = vector.load %arg3[%c0_3, %c0_4] : memref<128x256xbf16, #tpu.memory_space<vmem>>, vector<128x256xbf16>
    %cst = arith.constant dense<0.000000e+00> : vector<256x256xf32>
    %3 = tpu.matmul %1, %2, %cst {dimension_numbers = #tpu.dot_dimension_numbers<[1], [0], [0], [1], [0, 0, 1, 1], [], []>} : vector<256x128xbf16>, vector<128x256xbf16>, vector<256x256xf32> -> vector<256x256xf32>
    %4 = arith.truncf %3 : vector<256x256xf32> to vector<256x256xbf16>
    %cst_5 = arith.constant dense<0.000000e+00> : vector<128x256xf32>
    %5 = tpu.matmul %0, %4, %cst_5 {dimension_numbers = #tpu.dot_dimension_numbers<[0], [0], [1], [1], [0, 1, 1, 1], [], []>} : vector<256x128xbf16>, vector<256x256xbf16>, vector<128x256xf32> -> vector<128x256xf32>
    %cst_6 = arith.constant 0.000000e+00 : f32
    %6 = vector.broadcast %cst_6 : f32 to vector<128x256xf32>
    %7 = arith.maximumf %5, %6 : vector<128x256xf32>
    %8 = arith.truncf %7 : vector<128x256xf32> to vector<128x256xbf16>
    %cst_7 = arith.constant dense<0.000000e+00> : vector<256x256xf32>
    %9 = tpu.matmul %0, %8, %cst_7 {dimension_numbers = #tpu.dot_dimension_numbers<[1], [0], [0], [1], [0, 0, 1, 1], [], []>} : vector<256x128xbf16>, vector<128x256xbf16>, vector<256x256xf32> -> vector<256x256xf32>
    %c0_8 = arith.constant 0 : index
    %c0_9 = arith.constant 0 : index
    %10 = vector.load %arg4[%c0_8, %c0_9] : memref<256x256xbf16, #tpu.memory_space<vmem>>, vector<256x256xbf16>
    %11 = arith.truncf %9 : vector<256x256xf32> to vector<256x256xbf16>
    %cst_10 = arith.constant dense<0.000000e+00> : vector<256x256xf32>
    %12 = tpu.matmul %11, %10, %cst_10 {dimension_numbers = #tpu.dot_dimension_numbers<[1], [0], [0], [1], [0, 0, 1, 1], [], []>} : vector<256x256xbf16>, vector<256x256xbf16>, vector<256x256xf32> -> vector<256x256xf32>
    %13 = vector.extract_strided_slice %12 {offsets = [0, 0], sizes = [256, 128], strides = [1, 1]} : vector<256x256xf32> to vector<256x128xf32>
    %14 = vector.extract_strided_slice %12 {offsets = [0, 128], sizes = [256, 128], strides = [1, 1]} : vector<256x256xf32> to vector<256x128xf32>
    %c0_11 = arith.constant 0 : index
    %c0_12 = arith.constant 0 : index
    %15 = vector.load %arg8[%c0_11, %c0_12] : memref<256x128xf32, #tpu.memory_space<vmem>>, vector<256x128xf32>
    %16 = math.exp %14 : vector<256x128xf32>
    %17 = arith.mulf %15, %16 : vector<256x128xf32>
    %18 = arith.addf %17, %13 : vector<256x128xf32>
    %c0_13 = arith.constant 0 : index
    %c0_14 = arith.constant 0 : index
    %19 = vector.load %arg14[%c0_13, %c0_14] : memref<256x128xf32, #tpu.memory_space<vmem>>, vector<256x128xf32>
    tpu.vector_store %arg14[%c0_13, %c0_14], %18 {strides = array<i32>} : memref<256x128xf32, #tpu.memory_space<vmem>>, vector<256x128xf32>,
    %c0_15 = arith.constant 0 : index
    %c0_16 = arith.constant 0 : index
    %20 = vector.load %arg11[%c0_15, %c0_16] : memref<8x256xbf16, #tpu.memory_space<vmem>>, vector<8x256xbf16>
    %21 = arith.truncf %13 : vector<256x128xf32> to vector<256x128xbf16>
    %cst_17 = arith.constant dense<0.000000e+00> : vector<8x128xf32>
    %22 = tpu.matmul %20, %21, %cst_17 {dimension_numbers = #tpu.dot_dimension_numbers<[1], [0], [0], [1], [0, 0, 1, 1], [], []>} : vector<8x256xbf16>, vector<256x128xbf16>, vector<8x128xf32> -> vector<8x128xf32>
    %23 = arith.truncf %14 : vector<256x128xf32> to vector<256x128xbf16>
    %cst_18 = arith.constant dense<0.000000e+00> : vector<8x128xf32>
    %24 = tpu.matmul %20, %23, %cst_18 {dimension_numbers = #tpu.dot_dimension_numbers<[1], [0], [0], [1], [0, 0, 1, 1], [], []>} : vector<8x256xbf16>, vector<256x128xbf16>, vector<8x128xf32> -> vector<8x128xf32>
    %c0_19 = arith.constant 0 : index
    %c0_20 = arith.constant 0 : index
    %25 = vector.load %arg10[%c0_19, %c0_20] : memref<8x128xf32, #tpu.memory_space<vmem>>, vector<8x128xf32>
    %26 = math.exp %24 : vector<8x128xf32>
    %27 = arith.mulf %25, %26 : vector<8x128xf32>
    %28 = arith.addf %27, %22 : vector<8x128xf32>
    %c0_21 = arith.constant 0 : index
    %c0_22 = arith.constant 0 : index
    %29 = vector.load %arg16[%c0_21, %c0_22] : memref<8x128xf32, #tpu.memory_space<vmem>>, vector<8x128xf32>
    tpu.vector_store %arg16[%c0_21, %c0_22], %28 {strides = array<i32>} : memref<8x128xf32, #tpu.memory_space<vmem>>, vector<8x128xf32>,
    %c0_23 = arith.constant 0 : index
    %c0_24 = arith.constant 0 : index
    %30 = vector.load %arg5[%c0_23, %c0_24] : memref<128x128xbf16, #tpu.memory_space<vmem>>, vector<128x128xbf16>
    %c0_25 = arith.constant 0 : index
    %c0_26 = arith.constant 0 : index
    %31 = vector.load %arg6[%c0_25, %c0_26] : memref<128x256xbf16, #tpu.memory_space<vmem>>, vector<128x256xbf16>
    %cst_27 = arith.constant dense<0.000000e+00> : vector<128x256xf32>
    %32 = tpu.matmul %30, %31, %cst_27 {dimension_numbers = #tpu.dot_dimension_numbers<[1], [0], [0], [1], [0, 0, 1, 1], [], []>} : vector<128x128xbf16>, vector<128x256xbf16>, vector<128x256xf32> -> vector<128x256xf32>
    %33 = arith.truncf %32 : vector<128x256xf32> to vector<128x256xbf16>
    %cst_28 = arith.constant dense<0.000000e+00> : vector<256x256xf32>
    %34 = tpu.matmul %0, %33, %cst_28 {dimension_numbers = #tpu.dot_dimension_numbers<[1], [0], [0], [1], [0, 0, 1, 1], [], []>} : vector<256x128xbf16>, vector<128x256xbf16>, vector<256x256xf32> -> vector<256x256xf32>
    %cst_29 = arith.constant 0.000000e+00 : f32
    %35 = vector.broadcast %cst_29 : f32 to vector<256x256xf32>
    %36 = arith.maximumf %34, %35 : vector<256x256xf32>
    %37 = arith.truncf %36 : vector<256x256xf32> to vector<256x256xbf16>
    %cst_30 = arith.constant dense<0.000000e+00> : vector<128x256xf32>
    %38 = tpu.matmul %0, %37, %cst_30 {dimension_numbers = #tpu.dot_dimension_numbers<[0], [0], [1], [1], [0, 1, 1, 1], [], []>} : vector<256x128xbf16>, vector<256x256xbf16>, vector<128x256xf32> -> vector<128x256xf32>
    %c0_31 = arith.constant 0 : index
    %c0_32 = arith.constant 0 : index
    %39 = vector.load %arg7[%c0_31, %c0_32] : memref<256x256xbf16, #tpu.memory_space<vmem>>, vector<256x256xbf16>
    %40 = arith.truncf %38 : vector<128x256xf32> to vector<128x256xbf16>
    %cst_33 = arith.constant dense<0.000000e+00> : vector<128x256xf32>
    %41 = tpu.matmul %40, %39, %cst_33 {dimension_numbers = #tpu.dot_dimension_numbers<[1], [0], [0], [1], [0, 0, 1, 1], [], []>} : vector<128x256xbf16>, vector<256x256xbf16>, vector<128x256xf32> -> vector<128x256xf32>
    %42 = vector.extract_strided_slice %41 {offsets = [0, 0], sizes = [128, 128], strides = [1, 1]} : vector<128x256xf32> to vector<128x128xf32>
    %43 = vector.extract_strided_slice %41 {offsets = [0, 128], sizes = [128, 128], strides = [1, 1]} : vector<128x256xf32> to vector<128x128xf32>
    %c0_34 = arith.constant 0 : index
    %c0_35 = arith.constant 0 : index
    %44 = vector.load %arg9[%c0_34, %c0_35] : memref<128x128xf32, #tpu.memory_space<vmem>>, vector<128x128xf32>
    %45 = math.exp %43 : vector<128x128xf32>
    %46 = arith.mulf %44, %45 : vector<128x128xf32>
    %47 = arith.addf %46, %42 : vector<128x128xf32>
    %c0_36 = arith.constant 0 : index
    %c0_37 = arith.constant 0 : index
    %48 = vector.load %arg15[%c0_36, %c0_37] : memref<128x128xf32, #tpu.memory_space<vmem>>, vector<128x128xf32>
    tpu.vector_store %arg15[%c0_36, %c0_37], %47 {strides = array<i32>} : memref<128x128xf32, #tpu.memory_space<vmem>>, vector<128x128xf32>,
    %49 = tpu.iota {dimensions = array<i32: 1>} : vector<1x128xi32>
    %c127_i32 = arith.constant 127 : i32
    %50 = vector.broadcast %c127_i32 : i32 to vector<1x128xi32>
    %51 = arith.cmpi sge, %49, %50 : vector<1x128xi32>
    %cst_38 = arith.constant -1.000000e+00 : f32
    %cst_39 = arith.constant 1.000000e+00 : f32
    %52 = vector.broadcast %cst_38 : f32 to vector<1x128xf32>
    %53 = vector.broadcast %cst_39 : f32 to vector<1x128xf32>
    %54 = arith.select %51, %52, %53 : vector<1x128xi1>, vector<1x128xf32>
    %55 = vector.broadcast %54 : vector<1x128xf32> to vector<128x128xf32>
    %56 = arith.mulf %47, %55 : vector<128x128xf32>
    %57 = arith.truncf %18 : vector<256x128xf32> to vector<256x128xbf16>
    %58 = arith.truncf %56 : vector<128x128xf32> to vector<128x128xbf16>
    %cst_40 = arith.constant dense<0.000000e+00> : vector<256x128xf32>
    %59 = tpu.matmul %57, %58, %cst_40 {dimension_numbers = #tpu.dot_dimension_numbers<[1], [1], [0], [0], [0, 0, 1, 0], [], []>} : vector<256x128xbf16>, vector<128x128xbf16>, vector<256x128xf32> -> vector<256x128xf32>
    %60 = arith.negf %59 : vector<256x128xf32>
    %61 = math.exp %60 : vector<256x128xf32>
    %cst_41 = arith.constant 1.000000e+00 : f32
    %62 = vector.broadcast %cst_41 : f32 to vector<256x128xf32>
    %63 = arith.addf %62, %61 : vector<256x128xf32>
    %64 = arith.divf %62, %63 : vector<256x128xf32>
    %c0_42 = arith.constant 0 : index
    %c0_43 = arith.constant 0 : index
    %65 = vector.load %arg12[%c0_42, %c0_43] : memref<256x128xf32, #tpu.memory_space<vmem>>, vector<256x128xf32>
    tpu.vector_store %arg12[%c0_42, %c0_43], %64 {strides = array<i32>} : memref<256x128xf32, #tpu.memory_space<vmem>>, vector<256x128xf32>,
    %66 = arith.truncf %28 : vector<8x128xf32> to vector<8x128xbf16>
    %67 = arith.truncf %56 : vector<128x128xf32> to vector<128x128xbf16>
    %cst_44 = arith.constant dense<0.000000e+00> : vector<8x128xf32>
    %68 = tpu.matmul %66, %67, %cst_44 {dimension_numbers = #tpu.dot_dimension_numbers<[1], [1], [0], [0], [0, 0, 1, 0], [], []>} : vector<8x128xbf16>, vector<128x128xbf16>, vector<8x128xf32> -> vector<8x128xf32>
    %69 = arith.negf %68 : vector<8x128xf32>
    %70 = math.exp %69 : vector<8x128xf32>
    %cst_45 = arith.constant 1.000000e+00 : f32
    %71 = vector.broadcast %cst_45 : f32 to vector<8x128xf32>
    %72 = arith.addf %71, %70 : vector<8x128xf32>
    %73 = arith.divf %71, %72 : vector<8x128xf32>
    %c0_46 = arith.constant 0 : index
    %c0_47 = arith.constant 0 : index
    %74 = vector.load %arg13[%c0_46, %c0_47] : memref<8x128xf32, #tpu.memory_space<vmem>>, vector<8x128xf32>
    tpu.vector_store %arg13[%c0_46, %c0_47], %73 {strides = array<i32>} : memref<8x128xf32, #tpu.memory_space<vmem>>, vector<8x128xf32>,
    return
  }
  func.func @transform_0(%arg0: i32) -> (i32, i32) {
    %c0_i32 = arith.constant 0 : i32
    %c0_i32_0 = arith.constant 0 : i32
    %c0_i32_1 = arith.constant 0 : i32
    return %c0_i32, %c0_i32_0 : i32, i32
  }
  func.func @transform_1(%arg0: i32) -> (i32, i32) {
    %c0_i32 = arith.constant 0 : i32
    %c0_i32_0 = arith.constant 0 : i32
    %c0_i32_1 = arith.constant 0 : i32
    return %c0_i32, %c0_i32_0 : i32, i32
  }
  func.func @transform_2(%arg0: i32) -> (i32, i32) {
    %c0_i32 = arith.constant 0 : i32
    %c0_i32_0 = arith.constant 0 : i32
    %c0_i32_1 = arith.constant 0 : i32
    return %c0_i32, %c0_i32_0 : i32, i32
  }
  func.func @transform_3(%arg0: i32) -> (i32, i32) {
    %c0_i32 = arith.constant 0 : i32
    %c0_i32_0 = arith.constant 0 : i32
    %c0_i32_1 = arith.constant 0 : i32
    return %c0_i32, %c0_i32_0 : i32, i32
  }
  func.func @transform_4(%arg0: i32) -> (i32, i32) {
    %c0_i32 = arith.constant 0 : i32
    %c0_i32_0 = arith.constant 0 : i32
    %c0_i32_1 = arith.constant 0 : i32
    return %c0_i32, %c0_i32_0 : i32, i32
  }
  func.func @transform_5(%arg0: i32) -> (i32, i32) {
    %c0_i32 = arith.constant 0 : i32
    %c0_i32_0 = arith.constant 0 : i32
    %c0_i32_1 = arith.constant 0 : i32
    return %c0_i32, %c0_i32_0 : i32, i32
  }
  func.func @transform_6(%arg0: i32) -> (i32, i32) {
    %c0_i32 = arith.constant 0 : i32
    %c0_i32_0 = arith.constant 0 : i32
    %c0_i32_1 = arith.constant 0 : i32
    return %c0_i32, %c0_i32_0 : i32, i32
  }
  func.func @transform_7(%arg0: i32) -> (i32, i32) {
    %c0_i32 = arith.constant 0 : i32
    %c0_i32_0 = arith.constant 0 : i32
    %c0_i32_1 = arith.constant 0 : i32
    return %c0_i32, %c0_i32_0 : i32, i32
  }
  func.func @transform_8(%arg0: i32) -> (i32, i32) {
    %c0_i32 = arith.constant 0 : i32
    %c0_i32_0 = arith.constant 0 : i32
    %c0_i32_1 = arith.constant 0 : i32
    return %c0_i32, %c0_i32_0 : i32, i32
  }
  func.func @transform_9(%arg0: i32) -> (i32, i32) {
    %c0_i32 = arith.constant 0 : i32
    %c0_i32_0 = arith.constant 0 : i32
    %c0_i32_1 = arith.constant 0 : i32
    return %c0_i32, %c0_i32_0 : i32, i32
  }
  func.func @transform_10(%arg0: i32) -> (i32, i32) {
    %c0_i32 = arith.constant 0 : i32
    %c0_i32_0 = arith.constant 0 : i32
    %c0_i32_1 = arith.constant 0 : i32
    return %c0_i32, %c0_i32_0 : i32, i32
  }
  func.func @transform_11(%arg0: i32) -> (i32, i32) {
    %c0_i32 = arith.constant 0 : i32
    %c0_i32_0 = arith.constant 0 : i32
    %c0_i32_1 = arith.constant 0 : i32
    return %c0_i32, %c0_i32_0 : i32, i32
  }
  func.func @transform_12(%arg0: i32) -> (i32, i32) {
    %c0_i32 = arith.constant 0 : i32
    %c0_i32_0 = arith.constant 0 : i32
    %c0_i32_1 = arith.constant 0 : i32
    return %c0_i32, %c0_i32_0 : i32, i32
  }
  func.func @transform_13(%arg0: i32) -> (i32, i32) {
    %c0_i32 = arith.constant 0 : i32
    %c0_i32_0 = arith.constant 0 : i32
    %c0_i32_1 = arith.constant 0 : i32
    return %c0_i32, %c0_i32_0 : i32, i32
  }
  func.func @transform_14(%arg0: i32) -> (i32, i32) {
    %c0_i32 = arith.constant 0 : i32
    %c0_i32_0 = arith.constant 0 : i32
    %c0_i32_1 = arith.constant 0 : i32
    return %c0_i32, %c0_i32_0 : i32, i32
  }
  func.func @transform_15(%arg0: i32) -> (i32, i32) {
    %c0_i32 = arith.constant 0 : i32
    %c0_i32_0 = arith.constant 0 : i32
    %c0_i32_1 = arith.constant 0 : i32
    return %c0_i32, %c0_i32_0 : i32, i32
  }
}

</mosaic_0001>

<bundles_post_ra>
// kernel: vbgae3_forward.1
= control target key start
LH: loop header
LB: loop body
LE: loop exit
PB: predicated region body
PF: predicated region fallthrough
CT: control target
= control target key end

     0   :  { %21 = vsyncpa [#allocation3], 0  ;;  %s5629_s0 = inlined_call_operand.vmem [shape: bf16[256,128], index: 0, kind: input, shape index: {}]   ;;  %s5630_s1 = inlined_call_operand.vmem [shape: bf16[256,128], index: 1, kind: input, shape index: {}]   ;;  %s5631_s2 = inlined_call_operand.vmem [shape: bf16[128,256], index: 2, kind: input, shape index: {}]   ;;  %s5632_s3 = inlined_call_operand.vmem [shape: bf16[256,256], index: 3, kind: input, shape index: {}]   ;;  %s5633_s4 = inlined_call_operand.vmem [shape: bf16[128,128], index: 4, kind: input, shape index: {}]   ;;  %s5634_s5 = inlined_call_operand.vmem [shape: bf16[128,256], index: 5, kind: input, shape index: {}]   ;;  %s5635_s6 = inlined_call_operand.vmem [shape: bf16[256,256], index: 6, kind: input, shape index: {}]   ;;  %s5636_s7 = inlined_call_operand.vmem [shape: f32[256,128], index: 7, kind: input, shape index: {}]   ;;  %s5637_s8 = inlined_call_operand.vmem [shape: f32[128,128], index: 8, kind: input, shape index: {}]   ;;  %s5638_s9 = inlined_call_operand.vmem [shape: f32[8,128], index: 9, kind: input, shape index: {}]   ;;  %s5639_s10 = inlined_call_operand.vmem [shape: bf16[8,256], index: 10, kind: input, shape index: {}]   ;;  %s5640_s11 = inlined_call_operand.hbm [shape: f32[256,128], index: 11, kind: output, shape index: {0}]   ;;  %s5641_s12 = inlined_call_operand.hbm [shape: f32[8,128], index: 12, kind: output, shape index: {1}]   ;;  %s5642_s13 = inlined_call_operand.hbm [shape: f32[256,128], index: 13, kind: output, shape index: {2}]   ;;  %s5643_s14 = inlined_call_operand.hbm [shape: f32[128,128], index: 14, kind: output, shape index: {3}]   ;;  %s5644_s15 = inlined_call_operand.hbm [shape: f32[8,128], index: 15, kind: output, shape index: {4}]  }
   0x1   :  { %22 = vsyncpa [#allocation5], 0  ;;  %v3731_v0 = vld [vmem:[%s5631_s2 + $0x4] ss:$8 sps:$4 sm:$0xff]   ;;  %v3733_v1 = vld [vmem:[%s5631_s2] ss:$8 sps:$4 sm:$0xff]  }
   0x2   :  { %v5645_v2 = vmov 0   ;;  %303 = vmatprep.subr.bf16.mxu0 %v3731_v0  ;;  %v3734_v3 = vld [vmem:[%s5631_s2 + $0x14] ss:$8 sps:$4 sm:$0xff]   ;;  %v3736_v4 = vld [vmem:[%s5631_s2 + $0x10] ss:$8 sps:$4 sm:$0xff]   ;;  %v3755_v17 = vld [vmem:[%s5630_s1] sm:$0xff]  }
   0x3   :  { %335 = vmatprep.mubr.bf16.mxu0 %v5645_v2  ;;  %304 = vmatpush1.bf16.msra.mxu0 %v3733_v1  ;;  %v3737_v5 = vld [vmem:[%s5631_s2 + $0x24] ss:$8 sps:$4 sm:$0xff]   ;;  %v3739_v6 = vld [vmem:[%s5631_s2 + $0x20] ss:$8 sps:$4 sm:$0xff]   ;;  %v3740_v7 = vld [vmem:[%s5631_s2 + $0x34] ss:$8 sps:$4 sm:$0xff]  }
   0x4   :  { %305 = vmatprep.subr.bf16.mxu0 %v3734_v3  ;;  %v3742_v8 = vld [vmem:[%s5631_s2 + $0x30] ss:$8 sps:$4 sm:$0xff]   ;;  %v3743_v9 = vld [vmem:[%s5631_s2 + $0x44] ss:$8 sps:$4 sm:$0xff]   ;;  %v3745_v10 = vld [vmem:[%s5631_s2 + $0x40] ss:$8 sps:$4 sm:$0xff]  }
   0x5   :  { %v3746_v11 = vld [vmem:[%s5631_s2 + $0x54] ss:$8 sps:$4 sm:$0xff]   ;;  %v3748_v12 = vld [vmem:[%s5631_s2 + $0x50] ss:$8 sps:$4 sm:$0xff]   ;;  %v3749_v13 = vld [vmem:[%s5631_s2 + $0x64] ss:$8 sps:$4 sm:$0xff]  }
   0x6   :  { %v3751_v14 = vld [vmem:[%s5631_s2 + $0x60] ss:$8 sps:$4 sm:$0xff]   ;;  %v3752_v15 = vld [vmem:[%s5631_s2 + $0x74] ss:$8 sps:$4 sm:$0xff]   ;;  %v3754_v16 = vld [vmem:[%s5631_s2 + $0x70] ss:$8 sps:$4 sm:$0xff]  }
   0x7   :  { %306 = vmatpush1.bf16.msra.mxu0 %v3736_v4  ;;  %v3756_v18 = vld [vmem:[%s5630_s1 + $0x8] sm:$0xff]   ;;  %v3757_v19 = vld [vmem:[%s5630_s1 + $0x10] sm:$0xff]   ;;  %v3758_v20 = vld [vmem:[%s5630_s1 + $0x18] sm:$0xff]  }
   0x8   :  { %307 = vmatprep.subr.bf16.mxu0 %v3737_v5  ;;  %v3759_v21 = vld [vmem:[%s5630_s1 + $0x20] sm:$0xff]  }
   0xb   :  { %308 = vmatpush1.bf16.msra.mxu0 %v3739_v6 }
   0xc   :  { %309 = vmatprep.subr.bf16.mxu0 %v3740_v7 }
   0xf   :  { %310 = vmatpush1.bf16.msra.mxu0 %v3742_v8 }
  0x10   :  { %311 = vmatprep.subr.bf16.mxu0 %v3743_v9 }
  0x13   :  { %312 = vmatpush1.bf16.msra.mxu0 %v3745_v10 }
  0x14   :  { %313 = vmatprep.subr.bf16.mxu0 %v3746_v11 }
  0x17   :  { %314 = vmatpush1.bf16.msra.mxu0 %v3748_v12 }
  0x18   :  { %315 = vmatprep.subr.bf16.mxu0 %v3749_v13 }
  0x1b   :  { %316 = vmatpush1.bf16.msra.mxu0 %v3751_v14 }
  0x1c   :  { %317 = vmatprep.subr.bf16.mxu0 %v3752_v15 }
  0x1f   :  { %318 = vmatpush1.bf16.msra.mxu0 %v3754_v16 }
  0x22   :  { %336 = vmatmul.mubr.bf16.vlgmr.msra.gmra.mrb[0].mxu0 %v3755_v17 }
  0x23   :  { %345 = vmatprep.mubr.bf16.mxu0 %v5645_v2 }
  0x2a   :  { %346 = vmatmul.mubr.bf16.gmra.mrb[4].mxu0 %v3756_v18 }
  0x2b   :  { %355 = vmatprep.mubr.bf16.mxu0 %v5645_v2 }
  0x32   :  { %356 = vmatmul.mubr.bf16.gmra.mrb[8].mxu0 %v3757_v19 }
  0x33   :  { %365 = vmatprep.mubr.bf16.mxu0 %v5645_v2 }
  0x3a   :  { %366 = vmatmul.mubr.bf16.gmra.mrb[12].mxu0 %v3758_v20 }
  0x3b   :  { %375 = vmatprep.mubr.bf16.mxu0 %v5645_v2 }
  0x42   :  { %376 = vmatmul.mubr.bf16.gmra.mrb[16].mxu0 %v3759_v21 }
  0x43   :  { %385 = vmatprep.mubr.bf16.mxu0 %v5645_v2 }
  0x44   :  { %23 = vsyncpa [#allocation8], 0  ;;  %v3760_v22 = vld [vmem:[%s5630_s1 + $0x28] sm:$0xff]   ;;  %v3761_v23 = vld [vmem:[%s5630_s1 + $0x30] sm:$0xff]   ;;  %vm4282_vm0 = vmmov 0  }
  0x45   :  { %v3762_v24 = vld [vmem:[%s5630_s1 + $0x38] sm:$0xff]   ;;  %v3763_v25 = vld [vmem:[%s5630_s1 + $0x40] sm:$0xff]   ;;  %v3764_v26 = vld [vmem:[%s5630_s1 + $0x48] sm:$0xff]  }
  0x46   :  { %v3765_v27 = vld [vmem:[%s5630_s1 + $0x50] sm:$0xff]   ;;  %v3766_v28 = vld [vmem:[%s5630_s1 + $0x58] sm:$0xff]   ;;  %v3767_v29 = vld [vmem:[%s5630_s1 + $0x60] sm:$0xff]  }
  0x47   :  { %v3768_v30 = vld [vmem:[%s5630_s1 + $0x68] sm:$0xff]   ;;  %v4479_v31 = vld [vmem:[%s5629_s0 + $0x40] sm:$0xff]   ;;  %v3769_v32 = vld [vmem:[%s5630_s1 + $0x70] sm:$0xff]  }
  0x48   :  { %v4487_v33 = vld [vmem:[%s5629_s0] sm:$0xff]   ;;  %640 = vxpose.xlu0.c.b16.start [1/8] %v4479_v31, 128  ;;  %v4494_v34 = vld [vmem:[%s5629_s0 + $0x48] sm:$0xff]   ;;  %v4507_v36 = vld [vmem:[%s5629_s0 + $0x50] sm:$0xff]  }
  0x49   :  { %624 = vxpose.xlu1.c.b16.start [1/8] %v4487_v33, 128  ;;  %v4499_v35 = vld [vmem:[%s5629_s0 + $0x8] sm:$0xff]   ;;  %v3770_v37 = vld [vmem:[%s5630_s1 + $0x78] sm:$0xff]   ;;  %v4515_v38 = vld [vmem:[%s5629_s0 + $0x10] sm:$0xff]  }
  0x4a   :  { %386 = vmatmul.mubr.bf16.gmra.mrb[20].mxu0 %v3760_v22  ;;  %v4522_v39 = vld [vmem:[%s5629_s0 + $0x58] sm:$0xff]   ;;  %v4534_v41 = vld [vmem:[%s5629_s0 + $0x60] sm:$0xff]   ;;  %v4546_v43 = vld [vmem:[%s5629_s0 + $0x68] sm:$0xff]  }
  0x4b   :  { %395 = vmatprep.mubr.bf16.mxu0 %v5645_v2  ;;  %v4527_v40 = vld [vmem:[%s5629_s0 + $0x18] sm:$0xff]   ;;  %v4539_v42 = vld [vmem:[%s5629_s0 + $0x20] sm:$0xff]   ;;  %v4551_v44 = vld [vmem:[%s5629_s0 + $0x28] sm:$0xff]  }
  0x4c   :  { %641 = vxpose.xlu0.c.b16.cont [2/8] %v4494_v34, 128  ;;  %v4558_v45 = vld [vmem:[%s5629_s0 + $0x70] sm:$0xff]   ;;  %v4570_v47 = vld [vmem:[%s5629_s0 + $0x78] sm:$0xff]  }
  0x4d   :  { %625 = vxpose.xlu1.c.b16.cont [2/8] %v4499_v35, 128  ;;  %v4563_v46 = vld [vmem:[%s5629_s0 + $0x30] sm:$0xff]   ;;  %v4575_v48 = vld [vmem:[%s5629_s0 + $0x38] sm:$0xff]  }
  0x50   :  { %642 = vxpose.xlu0.c.b16.cont [3/8] %v4507_v36, 128 }
  0x51   :  { %626 = vxpose.xlu1.c.b16.cont [3/8] %v4515_v38, 128 }
  0x52   :  { %396 = vmatmul.mubr.bf16.gmra.mrb[24].mxu0 %v3761_v23 }
  0x53   :  { %405 = vmatprep.mubr.bf16.mxu0 %v5645_v2 }
  0x54   :  { %643 = vxpose.xlu0.c.b16.cont [4/8] %v4522_v39, 128 }
  0x55   :  { %627 = vxpose.xlu1.c.b16.cont [4/8] %v4527_v40, 128 }
  0x58   :  { %644 = vxpose.xlu0.c.b16.cont [5/8] %v4534_v41, 128 }
  0x59   :  { %628 = vxpose.xlu1.c.b16.cont [5/8] %v4539_v42, 128 }
  0x5a   :  { %406 = vmatmul.mubr.bf16.gmra.mrb[28].mxu0 %v3762_v24 }
  0x5b   :  { %415 = vmatprep.mubr.bf16.mxu0 %v5645_v2 }
  0x5c   :  { %645 = vxpose.xlu0.c.b16.cont [6/8] %v4546_v43, 128 }
  0x5d   :  { %629 = vxpose.xlu1.c.b16.cont [6/8] %v4551_v44, 128 }
  0x60   :  { %646 = vxpose.xlu0.c.b16.cont [7/8] %v4558_v45, 128 }
  0x61   :  { %630 = vxpose.xlu1.c.b16.cont [7/8] %v4563_v46, 128 }
  0x62   :  { %416 = vmatmul.mubr.bf16.gmra.mrb[32].mxu0 %v3763_v25 }
  0x63   :  { %425 = vmatprep.mubr.bf16.mxu0 %v5645_v2 }
  0x64   :  { %647 = vxpose.xlu0.c.b16.end [8/8] %v4570_v47, 128 }
  0x65   :  { %631 = vxpose.xlu1.c.b16.end [8/8] %v4575_v48, 128 }
  0x6a   :  { %426 = vmatmul.mubr.bf16.gmra.mrb[36].mxu0 %v3764_v26 }
  0x6b   :  { %435 = vmatprep.mubr.bf16.mxu0 %v5645_v2 }
  0x72   :  { %436 = vmatmul.mubr.bf16.gmra.mrb[40].mxu0 %v3765_v27 }
  0x73   :  { %445 = vmatprep.mubr.bf16.mxu0 %v5645_v2 }
  0x7a   :  { %446 = vmatmul.mubr.bf16.gmra.mrb[44].mxu0 %v3766_v28 }
  0x7b   :  { %455 = vmatprep.mubr.bf16.mxu0 %v5645_v2 }
  0x82   :  { %456 = vmatmul.mubr.bf16.gmra.mrb[48].mxu0 %v3767_v29 }
  0x83   :  { %465 = vmatprep.mubr.bf16.mxu0 %v5645_v2 }
  0x8a   :  { %466 = vmatmul.mubr.bf16.gmra.mrb[52].mxu0 %v3768_v30 }
  0x8b   :  { %475 = vmatprep.mubr.bf16.mxu0 %v5645_v2 }
  0x92   :  { %476 = vmatmul.mubr.bf16.gmra.mrb[56].mxu0 %v3769_v32 }
  0x93   :  { %485 = vmatprep.mubr.bf16.mxu0 %v5645_v2 }
  0x9a   :  { %486 = vmatmul.mubr.bf16.gmra.mrb[60].mxu0 %v3770_v37 }
  0xae   :  { %v4579_v50 = vpop.trf.xlu0 }
  0xaf   :  { %688 = vmatprep.mubr.bf16.mxu1 %v4579_v50 }
  0xf5   :  { %v337_v49 = vpop.f32.mrb[0].mxu0 }
  0xf6   :  { %v339_v51 = vpop.f32.mrb[1].mxu0 }
  0xf7   :  { %v341_v52 = vpop.f32.mrb[2].mxu0 }
  0xf8   :  { %v496_v53 = vpack.c.bf16 %v341_v52, %v337_v49  ;;  %v343_v54 = vpop.f32.mrb[3].mxu0 }
  0xf9   :  { %v497_v55 = vpack.c.bf16 %v343_v54, %v339_v51 }
  0xfb   :  { %656 = vmatprep.subr.bf16.mxu1 %v497_v55 }
  0xfc   :  { %657 = vmatpush1.bf16.msra.mxu1 %v496_v53 }
  0xfd   :  { %v347_v56 = vpop.f32.mrb[4].mxu0 }
  0xfe   :  { %v349_v57 = vpop.f32.mrb[5].mxu0 }
  0xff   :  { %v351_v58 = vpop.f32.mrb[6].mxu0 }
 0x100   :  { %v498_v59 = vpack.c.bf16 %v351_v58, %v347_v56  ;;  %v353_v60 = vpop.f32.mrb[7].mxu0 }
 0x101   :  { %v499_v61 = vpack.c.bf16 %v353_v60, %v349_v57 }
 0x103   :  { %658 = vmatprep.subr.bf16.mxu1 %v499_v61 }
 0x104   :  { %659 = vmatpush1.bf16.msra.mxu1 %v498_v59 }
 0x105   :  { %v357_v62 = vpop.f32.mrb[8].mxu0 }
 0x106   :  { %v359_v63 = vpop.f32.mrb[9].mxu0 }
 0x107   :  { %v361_v0 = vpop.f32.mrb[10].mxu0 }
 0x108   :  { %v500_v1 = vpack.c.bf16 %v361_v0, %v357_v62  ;;  %v363_v3 = vpop.f32.mrb[11].mxu0 }
 0x109   :  { %v501_v4 = vpack.c.bf16 %v363_v3, %v359_v63 }
 0x10b   :  { %660 = vmatprep.subr.bf16.mxu1 %v501_v4 }
 0x10c   :  { %661 = vmatpush1.bf16.msra.mxu1 %v500_v1 }
 0x10d   :  { %v367_v5 = vpop.f32.mrb[12].mxu0 }
 0x10e   :  { %v369_v6 = vpop.f32.mrb[13].mxu0 }
 0x10f   :  { %v371_v7 = vpop.f32.mrb[14].mxu0 }
 0x110   :  { %v502_v8 = vpack.c.bf16 %v371_v7, %v367_v5  ;;  %v373_v9 = vpop.f32.mrb[15].mxu0 }
 0x111   :  { %v503_v10 = vpack.c.bf16 %v373_v9, %v369_v6 }
 0x113   :  { %662 = vmatprep.subr.bf16.mxu1 %v503_v10 }
 0x114   :  { %663 = vmatpush1.bf16.msra.mxu1 %v502_v8 }
 0x115   :  { %v377_v11 = vpop.f32.mrb[16].mxu0 }
 0x116   :  { %v379_v12 = vpop.f32.mrb[17].mxu0 }
 0x117   :  { %v381_v13 = vpop.f32.mrb[18].mxu0 }
 0x118   :  { %v504_v14 = vpack.c.bf16 %v381_v13, %v377_v11  ;;  %v383_v15 = vpop.f32.mrb[19].mxu0 }
 0x119   :  { %v505_v16 = vpack.c.bf16 %v383_v15, %v379_v12 }
 0x11b   :  { %664 = vmatprep.subr.bf16.mxu1 %v505_v16 }
 0x11c   :  { %665 = vmatpush1.bf16.msra.mxu1 %v504_v14 }
 0x11d   :  { %v387_v17 = vpop.f32.mrb[20].mxu0 }
 0x11e   :  { %v389_v18 = vpop.f32.mrb[21].mxu0 }
 0x11f   :  { %v391_v19 = vpop.f32.mrb[22].mxu0 }
 0x120   :  { %v506_v20 = vpack.c.bf16 %v391_v19, %v387_v17  ;;  %v393_v21 = vpop.f32.mrb[23].mxu0 }
 0x121   :  { %v507_v22 = vpack.c.bf16 %v393_v21, %v389_v18 }
 0x123   :  { %666 = vmatprep.subr.bf16.mxu1 %v507_v22 }
 0x124   :  { %667 = vmatpush1.bf16.msra.mxu1 %v506_v20 }
 0x125   :  { %v397_v23 = vpop.f32.mrb[24].mxu0 }
 0x126   :  { %v399_v24 = vpop.f32.mrb[25].mxu0 }
 0x127   :  { %v401_v25 = vpop.f32.mrb[26].mxu0 }
 0x128   :  { %v508_v26 = vpack.c.bf16 %v401_v25, %v397_v23  ;;  %v403_v27 = vpop.f32.mrb[27].mxu0 }
 0x129   :  { %v509_v28 = vpack.c.bf16 %v403_v27, %v399_v24 }
 0x12b   :  { %668 = vmatprep.subr.bf16.mxu1 %v509_v28 }
 0x12c   :  { %669 = vmatpush1.bf16.msra.mxu1 %v508_v26 }
 0x12d   :  { %v407_v29 = vpop.f32.mrb[28].mxu0 }
 0x12e   :  { %v409_v30 = vpop.f32.mrb[29].mxu0 }
 0x12f   :  { %v411_v32 = vpop.f32.mrb[30].mxu0 }
 0x130   :  { %v510_v37 = vpack.c.bf16 %v411_v32, %v407_v29  ;;  %v413_v49 = vpop.f32.mrb[31].mxu0 }
 0x131   :  { %v511_v51 = vpack.c.bf16 %v413_v49, %v409_v30 }
 0x133   :  { %670 = vmatprep.subr.bf16.mxu1 %v511_v51 }
 0x134   :  { %671 = vmatpush1.bf16.msra.mxu1 %v510_v37 }
 0x135   :  { %v417_v52 = vpop.f32.mrb[32].mxu0 }
 0x136   :  { %v419_v53 = vpop.f32.mrb[33].mxu0 }
 0x137   :  { %v421_v54 = vpop.f32.mrb[34].mxu0 }
 0x138   :  { %v512_v55 = vpack.c.bf16 %v421_v54, %v417_v52  ;;  %v423_v56 = vpop.f32.mrb[35].mxu0  ;;  %v4582_v54 = vpop.trf.xlu1 }
 0x139   :  { %v513_v57 = vpack.c.bf16 %v423_v56, %v419_v53 }
 0x13b   :  { %672 = vmatprep.subr.bf16.mxu1 %v513_v57 }
 0x13c   :  { %673 = vmatpush1.bf16.msra.mxu1 %v512_v55  ;;  %v4584_v55 = vpop.trf.xlu0  ;;  %v4588_v56 = vpop.trf.xlu1 }
 0x13d   :  { %v427_v58 = vpop.f32.mrb[36].mxu0 }
 0x13e   :  { %v429_v59 = vpop.f32.mrb[37].mxu0 }
 0x13f   :  { %v431_v60 = vpop.f32.mrb[38].mxu0 }
 0x140   :  { %v514_v61 = vpack.c.bf16 %v431_v60, %v427_v58  ;;  %v433_v62 = vpop.f32.mrb[39].mxu0  ;;  %v4590_v57 = vpop.trf.xlu0 }
 0x141   :  { %v515_v63 = vpack.c.bf16 %v433_v62, %v429_v59  ;;  %v4594_v58 = vpop.trf.xlu1 }
 0x143   :  { %674 = vmatprep.subr.bf16.mxu1 %v515_v63 }
 0x144   :  { %675 = vmatpush1.bf16.msra.mxu1 %v514_v61  ;;  %v4596_v59 = vpop.trf.xlu0 }
 0x145   :  { %v437_v0 = vpop.f32.mrb[40].mxu0  ;;  %v4600_v60 = vpop.trf.xlu1 }
 0x146   :  { %v439_v1 = vpop.f32.mrb[41].mxu0 }
 0x147   :  { %v441_v3 = vpop.f32.mrb[42].mxu0 }
 0x148   :  { %v516_v4 = vpack.c.bf16 %v441_v3, %v437_v0  ;;  %v443_v5 = vpop.f32.mrb[43].mxu0  ;;  %v4602_v61 = vpop.trf.xlu0 }
 0x149   :  { %v517_v6 = vpack.c.bf16 %v443_v5, %v439_v1  ;;  %v4606_v62 = vpop.trf.xlu1 }
 0x14b   :  { %676 = vmatprep.subr.bf16.mxu1 %v517_v6 }
 0x14c   :  { %677 = vmatpush1.bf16.msra.mxu1 %v516_v4  ;;  %v4608_v63 = vpop.trf.xlu0 }
 0x14d   :  { %v447_v7 = vpop.f32.mrb[44].mxu0  ;;  %v4612_v0 = vpop.trf.xlu1 }
 0x14e   :  { %v449_v8 = vpop.f32.mrb[45].mxu0 }
 0x14f   :  { %v451_v9 = vpop.f32.mrb[46].mxu0 }
 0x150   :  { %v518_v10 = vpack.c.bf16 %v451_v9, %v447_v7  ;;  %v453_v11 = vpop.f32.mrb[47].mxu0  ;;  %v4614_v1 = vpop.trf.xlu0 }
 0x151   :  { %v519_v12 = vpack.c.bf16 %v453_v11, %v449_v8  ;;  %5663 = vst [vmem:[#allocation13_spill] sm:$0xff] %v4614_v1  ;;  %v4618_v3 = vpop.trf.xlu1 }
 0x152   :  { %5664 = vst [vmem:[#allocation14_spill] sm:$0xff] %v4618_v3 }
 0x153   :  { %678 = vmatprep.subr.bf16.mxu1 %v519_v12 }
 0x154   :  { %679 = vmatpush1.bf16.msra.mxu1 %v518_v10  ;;  %v4620_v4 = vpop.trf.xlu0 }
 0x155   :  { %v457_v13 = vpop.f32.mrb[48].mxu0  ;;  %5665 = vst [vmem:[#allocation15_spill] sm:$0xff] %v4620_v4  ;;  %v4624_v5 = vpop.trf.xlu1 }
 0x156   :  { %v459_v14 = vpop.f32.mrb[49].mxu0  ;;  %5666 = vst [vmem:[#allocation16_spill] sm:$0xff] %v4624_v5 }
 0x157   :  { %v461_v15 = vpop.f32.mrb[50].mxu0 }
 0x158   :  { %v520_v16 = vpack.c.bf16 %v461_v15, %v457_v13  ;;  %v463_v17 = vpop.f32.mrb[51].mxu0 }
 0x159   :  { %v521_v18 = vpack.c.bf16 %v463_v17, %v459_v14 }
 0x15b   :  { %680 = vmatprep.subr.bf16.mxu1 %v521_v18 }
 0x15c   :  { %681 = vmatpush1.bf16.msra.mxu1 %v520_v16 }
 0x15d   :  { %v467_v19 = vpop.f32.mrb[52].mxu0 }
 0x15e   :  { %v469_v20 = vpop.f32.mrb[53].mxu0 }
 0x15f   :  { %v471_v21 = vpop.f32.mrb[54].mxu0 }
 0x160   :  { %v522_v22 = vpack.c.bf16 %v471_v21, %v467_v19  ;;  %v473_v23 = vpop.f32.mrb[55].mxu0 }
 0x161   :  { %v523_v24 = vpack.c.bf16 %v473_v23, %v469_v20 }
 0x163   :  { %682 = vmatprep.subr.bf16.mxu1 %v523_v24 }
 0x164   :  { %683 = vmatpush1.bf16.msra.mxu1 %v522_v22 }
 0x165   :  { %v477_v25 = vpop.f32.mrb[56].mxu0 }
 0x166   :  { %v479_v26 = vpop.f32.mrb[57].mxu0 }
 0x167   :  { %v481_v27 = vpop.f32.mrb[58].mxu0 }
 0x168   :  { %v524_v28 = vpack.c.bf16 %v481_v27, %v477_v25  ;;  %v483_v29 = vpop.f32.mrb[59].mxu0 }
 0x169   :  { %v525_v30 = vpack.c.bf16 %v483_v29, %v479_v26 }
 0x16b   :  { %684 = vmatprep.subr.bf16.mxu1 %v525_v30 }
 0x16c   :  { %685 = vmatpush1.bf16.msra.mxu1 %v524_v28 }
 0x16d   :  { %v487_v32 = vpop.f32.mrb[60].mxu0 }
 0x16e   :  { %v489_v37 = vpop.f32.mrb[61].mxu0 }
 0x16f   :  { %v491_v49 = vpop.f32.mrb[62].mxu0 }
 0x170   :  { %v526_v51 = vpack.c.bf16 %v491_v49, %v487_v32  ;;  %v493_v52 = vpop.f32.mrb[63].mxu0 }
 0x171   :  { %v527_v53 = vpack.c.bf16 %v493_v52, %v489_v37 }
 0x173   :  { %686 = vmatprep.subr.bf16.mxu1 %v527_v53 }
 0x174   :  { %687 = vmatpush1.bf16.msra.mxu1 %v526_v51 }
 0x177   :  { %689 = vmatmul.mubr.bf16.vlgmr.msra.gmra.mrb[0].mxu1 %v4582_v54 }
 0x178   :  { %698 = vmatprep.mubr.bf16.mxu1 %v4584_v55 }
 0x17f   :  { %699 = vmatmul.mubr.bf16.gmra.mrb[4].mxu1 %v4588_v56 }
 0x180   :  { %708 = vmatprep.mubr.bf16.mxu1 %v4590_v57 }
 0x187   :  { %709 = vmatmul.mubr.bf16.gmra.mrb[8].mxu1 %v4594_v58 }
 0x188   :  { %718 = vmatprep.mubr.bf16.mxu1 %v4596_v59 }
 0x18f   :  { %719 = vmatmul.mubr.bf16.gmra.mrb[12].mxu1 %v4600_v60 }
 0x190   :  { %728 = vmatprep.mubr.bf16.mxu1 %v4602_v61 }
 0x197   :  { %729 = vmatmul.mubr.bf16.gmra.mrb[16].mxu1 %v4606_v62 }
 0x198   :  { %738 = vmatprep.mubr.bf16.mxu1 %v4608_v63 }
 0x19f   :  { %739 = vmatmul.mubr.bf16.gmra.mrb[20].mxu1 %v4612_v0 }
 0x1a0   :  { %748 = vmatprep.mubr.bf16.mxu1 %v4614_v1 }
 0x1a7   :  { %749 = vmatmul.mubr.bf16.gmra.mrb[24].mxu1 %v4618_v3 }
 0x1a8   :  { %758 = vmatprep.mubr.bf16.mxu1 %v4620_v4 }
 0x1af   :  { %759 = vmatmul.mubr.bf16.gmra.mrb[28].mxu1 %v4624_v5 }
 0x1b0   :  { %849 = vmatprep.mubr.bf16.mxu1 %v5645_v2 }
 0x24a   :  { %v690_v6 = vpop.f32.mrb[0].mxu1 }
 0x24b   :  { %v692_v7 = vpop.f32.mrb[1].mxu1  ;;  %v769_v9 = vmax.f32 %v690_v6, 0.0 }
 0x24c   :  { %v694_v8 = vpop.f32.mrb[2].mxu1  ;;  %v770_v12 = vmax.f32 %v692_v7, 0.0 }
 0x24d   :  { %v771_v10 = vmax.f32 %v694_v8, 0.0  ;;  %v696_v11 = vpop.f32.mrb[3].mxu1 }
 0x24e   :  { %v772_v13 = vmax.f32 %v696_v11, 0.0 }
 0x24f   :  { %v801_v14 = vpack.c.bf16 %v771_v10, %v769_v9 }
 0x250   :  { %v802_v15 = vpack.c.bf16 %v772_v13, %v770_v12 }
 0x252   :  { %v700_v16 = vpop.f32.mrb[4].mxu1  ;;  %817 = vmatprep.subr.bf16.mxu1 %v802_v15 }
 0x253   :  { %v702_v17 = vpop.f32.mrb[5].mxu1  ;;  %818 = vmatpush1.bf16.msra.mxu1 %v801_v14  ;;  %v773_v19 = vmax.f32 %v700_v16, 0.0 }
 0x254   :  { %v704_v18 = vpop.f32.mrb[6].mxu1  ;;  %v774_v22 = vmax.f32 %v702_v17, 0.0 }
 0x255   :  { %v775_v20 = vmax.f32 %v704_v18, 0.0  ;;  %v706_v21 = vpop.f32.mrb[7].mxu1 }
 0x256   :  { %v776_v23 = vmax.f32 %v706_v21, 0.0 }
 0x257   :  { %v803_v24 = vpack.c.bf16 %v775_v20, %v773_v19 }
 0x258   :  { %v804_v25 = vpack.c.bf16 %v776_v23, %v774_v22 }
 0x25a   :  { %v710_v26 = vpop.f32.mrb[8].mxu1  ;;  %819 = vmatprep.subr.bf16.mxu1 %v804_v25 }
 0x25b   :  { %v712_v27 = vpop.f32.mrb[9].mxu1  ;;  %820 = vmatpush1.bf16.msra.mxu1 %v803_v24  ;;  %v777_v29 = vmax.f32 %v710_v26, 0.0 }
 0x25c   :  { %v714_v28 = vpop.f32.mrb[10].mxu1  ;;  %v778_v37 = vmax.f32 %v712_v27, 0.0 }
 0x25d   :  { %v779_v30 = vmax.f32 %v714_v28, 0.0  ;;  %v716_v32 = vpop.f32.mrb[11].mxu1 }
 0x25e   :  { %v780_v49 = vmax.f32 %v716_v32, 0.0 }
 0x25f   :  { %v805_v51 = vpack.c.bf16 %v779_v30, %v777_v29 }
 0x260   :  { %v806_v52 = vpack.c.bf16 %v780_v49, %v778_v37 }
 0x262   :  { %v720_v53 = vpop.f32.mrb[12].mxu1  ;;  %821 = vmatprep.subr.bf16.mxu1 %v806_v52 }
 0x263   :  { %v722_v6 = vpop.f32.mrb[13].mxu1  ;;  %822 = vmatpush1.bf16.msra.mxu1 %v805_v51  ;;  %v781_v8 = vmax.f32 %v720_v53, 0.0 }
 0x264   :  { %v724_v7 = vpop.f32.mrb[14].mxu1  ;;  %v782_v11 = vmax.f32 %v722_v6, 0.0 }
 0x265   :  { %v783_v9 = vmax.f32 %v724_v7, 0.0  ;;  %v726_v10 = vpop.f32.mrb[15].mxu1 }
 0x266   :  { %v784_v12 = vmax.f32 %v726_v10, 0.0 }
 0x267   :  { %v807_v13 = vpack.c.bf16 %v783_v9, %v781_v8 }
 0x268   :  { %v808_v14 = vpack.c.bf16 %v784_v12, %v782_v11 }
 0x26a   :  { %v730_v15 = vpop.f32.mrb[16].mxu1  ;;  %823 = vmatprep.subr.bf16.mxu1 %v808_v14 }
 0x26b   :  { %v732_v16 = vpop.f32.mrb[17].mxu1  ;;  %824 = vmatpush1.bf16.msra.mxu1 %v807_v13  ;;  %v785_v18 = vmax.f32 %v730_v15, 0.0 }
 0x26c   :  { %v734_v17 = vpop.f32.mrb[18].mxu1  ;;  %v786_v21 = vmax.f32 %v732_v16, 0.0 }
 0x26d   :  { %v787_v19 = vmax.f32 %v734_v17, 0.0  ;;  %v736_v20 = vpop.f32.mrb[19].mxu1 }
 0x26e   :  { %v788_v22 = vmax.f32 %v736_v20, 0.0 }
 0x26f   :  { %v809_v23 = vpack.c.bf16 %v787_v19, %v785_v18 }
 0x270   :  { %v810_v24 = vpack.c.bf16 %v788_v22, %v786_v21  ;;  %v3787_v22 = vld [vmem:[%s5632_s3] ss:$8 sps:$4 sm:$0xff]  }
 0x272   :  { %v740_v25 = vpop.f32.mrb[20].mxu1  ;;  %825 = vmatprep.subr.bf16.mxu1 %v810_v24 }
 0x273   :  { %v742_v26 = vpop.f32.mrb[21].mxu1  ;;  %826 = vmatpush1.bf16.msra.mxu1 %v809_v23  ;;  %v789_v28 = vmax.f32 %v740_v25, 0.0  ;;  %v3789_v23 = vld [vmem:[%s5632_s3 + $0x4] ss:$8 sps:$4 sm:$0xff]   ;;  %v3792_v25 = vld [vmem:[%s5632_s3 + $0x14] ss:$8 sps:$4 sm:$0xff]  }
 0x274   :  { %v744_v27 = vpop.f32.mrb[22].mxu1  ;;  %v790_v32 = vmax.f32 %v742_v26, 0.0  ;;  %1234 = vmatprep.subr.bf16.mxu0 %v3789_v23 }
 0x275   :  { %v791_v29 = vmax.f32 %v744_v27, 0.0  ;;  %v746_v30 = vpop.f32.mrb[23].mxu1  ;;  %1235 = vmatpush1.bf16.msra.mxu0 %v3787_v22  ;;  %v3790_v27 = vld [vmem:[%s5632_s3 + $0x10] ss:$8 sps:$4 sm:$0xff]  }
 0x276   :  { %v792_v37 = vmax.f32 %v746_v30, 0.0  ;;  %1236 = vmatprep.subr.bf16.mxu0 %v3792_v25  ;;  %v3798_v30 = vld [vmem:[%s5632_s3 + $0x34] ss:$8 sps:$4 sm:$0xff]  }
 0x277   :  { %v811_v49 = vpack.c.bf16 %v791_v29, %v789_v28  ;;  %v3795_v28 = vld [vmem:[%s5632_s3 + $0x24] ss:$8 sps:$4 sm:$0xff]   ;;  %v3793_v29 = vld [vmem:[%s5632_s3 + $0x20] ss:$8 sps:$4 sm:$0xff]  }
 0x278   :  { %v812_v51 = vpack.c.bf16 %v792_v37, %v790_v32  ;;  %v3796_v32 = vld [vmem:[%s5632_s3 + $0x30] ss:$8 sps:$4 sm:$0xff]   ;;  %v3801_v37 = vld [vmem:[%s5632_s3 + $0x44] ss:$8 sps:$4 sm:$0xff]  }
 0x279   :  { %1237 = vmatpush1.bf16.msra.mxu0 %v3790_v27 }
 0x27a   :  { %v750_v52 = vpop.f32.mrb[24].mxu1  ;;  %827 = vmatprep.subr.bf16.mxu1 %v812_v51  ;;  %1238 = vmatprep.subr.bf16.mxu0 %v3795_v28  ;;  %v3802_v51 = vld [vmem:[%s5632_s3 + $0x50] ss:$8 sps:$4 sm:$0xff]  }
 0x27b   :  { %v752_v53 = vpop.f32.mrb[25].mxu1  ;;  %828 = vmatpush1.bf16.msra.mxu1 %v811_v49  ;;  %v793_v7 = vmax.f32 %v750_v52, 0.0  ;;  %v3804_v49 = vld [vmem:[%s5632_s3 + $0x54] ss:$8 sps:$4 sm:$0xff]   ;;  %v3807_v52 = vld [vmem:[%s5632_s3 + $0x64] ss:$8 sps:$4 sm:$0xff]  }
 0x27c   :  { %v754_v6 = vpop.f32.mrb[26].mxu1  ;;  %v794_v10 = vmax.f32 %v752_v53, 0.0  ;;  %v3810_v53 = vld [vmem:[%s5632_s3 + $0x74] ss:$8 sps:$4 sm:$0xff]  }
 0x27d   :  { %v795_v8 = vmax.f32 %v754_v6, 0.0  ;;  %v756_v9 = vpop.f32.mrb[27].mxu1  ;;  %1239 = vmatpush1.bf16.msra.mxu0 %v3793_v29  ;;  %v3808_v6 = vld [vmem:[%s5632_s3 + $0x70] ss:$8 sps:$4 sm:$0xff]  }
 0x27e   :  { %v796_v11 = vmax.f32 %v756_v9, 0.0  ;;  %1240 = vmatprep.subr.bf16.mxu0 %v3798_v30  ;;  %v3814_v9 = vld [vmem:[%s5632_s3 + $0x90] ss:$8 sps:$4 sm:$0xff]  }
 0x27f   :  { %v813_v12 = vpack.c.bf16 %v795_v8, %v793_v7  ;;  %v3813_v7 = vld [vmem:[%s5632_s3 + $0x84] ss:$8 sps:$4 sm:$0xff]   ;;  %v3816_v8 = vld [vmem:[%s5632_s3 + $0x94] ss:$8 sps:$4 sm:$0xff]  }
 0x280   :  { %v814_v13 = vpack.c.bf16 %v796_v11, %v794_v10  ;;  %v3819_v10 = vld [vmem:[%s5632_s3 + $0xa4] ss:$8 sps:$4 sm:$0xff]   ;;  %v3822_v11 = vld [vmem:[%s5632_s3 + $0xb4] ss:$8 sps:$4 sm:$0xff]  }
 0x281   :  { %1241 = vmatpush1.bf16.msra.mxu0 %v3796_v32 }
 0x282   :  { %v760_v14 = vpop.f32.mrb[28].mxu1  ;;  %829 = vmatprep.subr.bf16.mxu1 %v814_v13  ;;  %1242 = vmatprep.subr.bf16.mxu0 %v3801_v37  ;;  %v3825_v13 = vld [vmem:[%s5632_s3 + $0xc4] ss:$8 sps:$4 sm:$0xff]  }
 0x283   :  { %v762_v15 = vpop.f32.mrb[29].mxu1  ;;  %830 = vmatpush1.bf16.msra.mxu1 %v813_v12  ;;  %v797_v17 = vmax.f32 %v760_v14, 0.0  ;;  %v3820_v12 = vld [vmem:[%s5632_s3 + $0xb0] ss:$8 sps:$4 sm:$0xff]   ;;  %v3828_v14 = vld [vmem:[%s5632_s3 + $0xd4] ss:$8 sps:$4 sm:$0xff]  }
 0x284   :  { %v764_v16 = vpop.f32.mrb[30].mxu1  ;;  %v798_v20 = vmax.f32 %v762_v15, 0.0  ;;  %v3826_v15 = vld [vmem:[%s5632_s3 + $0xd0] ss:$8 sps:$4 sm:$0xff]  }
 0x285   :  { %v799_v18 = vmax.f32 %v764_v16, 0.0  ;;  %v766_v19 = vpop.f32.mrb[31].mxu1  ;;  %v3831_v16 = vld [vmem:[%s5632_s3 + $0xe4] ss:$8 sps:$4 sm:$0xff]  }
 0x286   :  { %v800_v21 = vmax.f32 %v766_v19, 0.0 }
 0x287   :  { %v815_v24 = vpack.c.bf16 %v799_v18, %v797_v17 }
 0x288   :  { %v816_v26 = vpack.c.bf16 %v800_v21, %v798_v20 }
 0x28a   :  { %831 = vmatprep.subr.bf16.mxu1 %v816_v26 }
 0x28b   :  { %832 = vmatpush1.bf16.msra.mxu1 %v815_v24 }
 0x28e   :  { %850 = vmatmul.mubr.bf16.vlgmr.msra.gmra.mrb[32].mxu1 %v4487_v33  ;;  %v3799_v33 = vld [vmem:[%s5632_s3 + $0x40] ss:$8 sps:$4 sm:$0xff]  }
 0x28f   :  { %859 = vmatprep.mubr.bf16.mxu1 %v5645_v2  ;;  %1243 = vmatpush1.bf16.msra.mxu0 %v3799_v33 }
 0x290   :  { %1244 = vmatprep.subr.bf16.mxu0 %v3804_v49 }
 0x293   :  { %1245 = vmatpush1.bf16.msra.mxu0 %v3802_v51 }
 0x294   :  { %1246 = vmatprep.subr.bf16.mxu0 %v3807_v52 }
 0x296   :  { %860 = vmatmul.mubr.bf16.gmra.mrb[36].mxu1 %v4499_v35  ;;  %v3805_v35 = vld [vmem:[%s5632_s3 + $0x60] ss:$8 sps:$4 sm:$0xff]  }
 0x297   :  { %869 = vmatprep.mubr.bf16.mxu1 %v5645_v2  ;;  %1247 = vmatpush1.bf16.msra.mxu0 %v3805_v35 }
 0x298   :  { %1248 = vmatprep.subr.bf16.mxu0 %v3810_v53 }
 0x29b   :  { %1249 = vmatpush1.bf16.msra.mxu0 %v3808_v6 }
 0x29c   :  { %1250 = vmatprep.subr.bf16.mxu0 %v3813_v7 }
 0x29e   :  { %870 = vmatmul.mubr.bf16.gmra.mrb[40].mxu1 %v4515_v38  ;;  %v3811_v38 = vld [vmem:[%s5632_s3 + $0x80] ss:$8 sps:$4 sm:$0xff]  }
 0x29f   :  { %879 = vmatprep.mubr.bf16.mxu1 %v5645_v2  ;;  %1251 = vmatpush1.bf16.msra.mxu0 %v3811_v38 }
 0x2a0   :  { %1252 = vmatprep.subr.bf16.mxu0 %v3816_v8 }
 0x2a3   :  { %1253 = vmatpush1.bf16.msra.mxu0 %v3814_v9 }
 0x2a4   :  { %1254 = vmatprep.subr.bf16.mxu0 %v3819_v10 }
 0x2a6   :  { %880 = vmatmul.mubr.bf16.gmra.mrb[44].mxu1 %v4527_v40  ;;  %v3817_v40 = vld [vmem:[%s5632_s3 + $0xa0] ss:$8 sps:$4 sm:$0xff]  }
 0x2a7   :  { %889 = vmatprep.mubr.bf16.mxu1 %v5645_v2  ;;  %1255 = vmatpush1.bf16.msra.mxu0 %v3817_v40 }
 0x2a8   :  { %1256 = vmatprep.subr.bf16.mxu0 %v3822_v11 }
 0x2ab   :  { %1257 = vmatpush1.bf16.msra.mxu0 %v3820_v12 }
 0x2ac   :  { %1258 = vmatprep.subr.bf16.mxu0 %v3825_v13 }
 0x2ae   :  { %890 = vmatmul.mubr.bf16.gmra.mrb[48].mxu1 %v4539_v42  ;;  %v3823_v42 = vld [vmem:[%s5632_s3 + $0xc0] ss:$8 sps:$4 sm:$0xff]  }
 0x2af   :  { %899 = vmatprep.mubr.bf16.mxu1 %v5645_v2  ;;  %1259 = vmatpush1.bf16.msra.mxu0 %v3823_v42 }
 0x2b0   :  { %1260 = vmatprep.subr.bf16.mxu0 %v3828_v14 }
 0x2b3   :  { %1261 = vmatpush1.bf16.msra.mxu0 %v3826_v15 }
 0x2b4   :  { %1262 = vmatprep.subr.bf16.mxu0 %v3831_v16 }
 0x2b6   :  { %900 = vmatmul.mubr.bf16.gmra.mrb[52].mxu1 %v4551_v44  ;;  %v3829_v44 = vld [vmem:[%s5632_s3 + $0xe0] ss:$8 sps:$4 sm:$0xff]  }
 0x2b7   :  { %909 = vmatprep.mubr.bf16.mxu1 %v5645_v2  ;;  %1263 = vmatpush1.bf16.msra.mxu0 %v3829_v44 }
 0x2be   :  { %910 = vmatmul.mubr.bf16.gmra.mrb[56].mxu1 %v4563_v46  ;;  %v3834_v46 = vld [vmem:[%s5632_s3 + $0xf4] ss:$8 sps:$4 sm:$0xff]  }
 0x2bf   :  { %919 = vmatprep.mubr.bf16.mxu1 %v5645_v2  ;;  %1264 = vmatprep.subr.bf16.mxu0 %v3834_v46 }
 0x2c6   :  { %920 = vmatmul.mubr.bf16.gmra.mrb[60].mxu1 %v4575_v48  ;;  %v3832_v48 = vld [vmem:[%s5632_s3 + $0xf0] ss:$8 sps:$4 sm:$0xff]  }
 0x2c7   :  { %929 = vmatprep.mubr.bf16.mxu1 %v5645_v2  ;;  %1265 = vmatpush1.bf16.msra.mxu0 %v3832_v48 }
 0x2ce   :  { %930 = vmatmul.mubr.bf16.gmra.mrb[64].mxu1 %v4479_v31 }
 0x2cf   :  { %939 = vmatprep.mubr.bf16.mxu1 %v5645_v2 }
 0x2d6   :  { %940 = vmatmul.mubr.bf16.gmra.mrb[68].mxu1 %v4494_v34 }
 0x2d7   :  { %949 = vmatprep.mubr.bf16.mxu1 %v5645_v2 }
 0x2de   :  { %950 = vmatmul.mubr.bf16.gmra.mrb[72].mxu1 %v4507_v36 }
 0x2df   :  { %959 = vmatprep.mubr.bf16.mxu1 %v5645_v2 }
 0x2e6   :  { %960 = vmatmul.mubr.bf16.gmra.mrb[76].mxu1 %v4522_v39 }
 0x2e7   :  { %969 = vmatprep.mubr.bf16.mxu1 %v5645_v2 }
 0x2ee   :  { %970 = vmatmul.mubr.bf16.gmra.mrb[80].mxu1 %v4534_v41 }
 0x2ef   :  { %979 = vmatprep.mubr.bf16.mxu1 %v5645_v2 }
 0x2f6   :  { %980 = vmatmul.mubr.bf16.gmra.mrb[84].mxu1 %v4546_v43 }
 0x2f7   :  { %989 = vmatprep.mubr.bf16.mxu1 %v5645_v2 }
 0x2fe   :  { %990 = vmatmul.mubr.bf16.gmra.mrb[88].mxu1 %v4558_v45 }
 0x2ff   :  { %999 = vmatprep.mubr.bf16.mxu1 %v5645_v2 }
 0x306   :  { %1000 = vmatmul.mubr.bf16.gmra.mrb[92].mxu1 %v4570_v47 }
 0x361   :  { %v851_v31 = vpop.f32.mrb[32].mxu1 }
 0x362   :  { %v853_v34 = vpop.f32.mrb[33].mxu1 }
 0x363   :  { %v855_v36 = vpop.f32.mrb[34].mxu1 }
 0x364   :  { %v1042_v39 = vpack.c.bf16 %v855_v36, %v851_v31  ;;  %v857_v17 = vpop.f32.mrb[35].mxu1 }
 0x365   :  { %v1043_v18 = vpack.c.bf16 %v857_v17, %v853_v34 }
 0x367   :  { %1266 = vmatprep.mubr.bf16.mxu0 %v1043_v18 }
 0x368   :  { %1267 = vmatmul.mubr.bf16.vlgmr.msra.gmra.mrb[64].mxu0 %v1042_v39 }
 0x369   :  { %v861_v41 = vpop.f32.mrb[36].mxu1 }
 0x36a   :  { %v863_v19 = vpop.f32.mrb[37].mxu1 }
 0x36b   :  { %v865_v20 = vpop.f32.mrb[38].mxu1 }
 0x36c   :  { %v1044_v43 = vpack.c.bf16 %v865_v20, %v861_v41  ;;  %v867_v21 = vpop.f32.mrb[39].mxu1 }
 0x36d   :  { %v1045_v22 = vpack.c.bf16 %v867_v21, %v863_v19 }
 0x36f   :  { %1276 = vmatprep.mubr.bf16.mxu0 %v1045_v22 }
 0x370   :  { %1277 = vmatmul.mubr.bf16.gmra.mrb[68].mxu0 %v1044_v43 }
 0x371   :  { %v871_v45 = vpop.f32.mrb[40].mxu1 }
 0x372   :  { %v873_v23 = vpop.f32.mrb[41].mxu1 }
 0x373   :  { %v875_v24 = vpop.f32.mrb[42].mxu1 }
 0x374   :  { %v1046_v47 = vpack.c.bf16 %v875_v24, %v871_v45  ;;  %v877_v25 = vpop.f32.mrb[43].mxu1 }
 0x375   :  { %v1047_v26 = vpack.c.bf16 %v877_v25, %v873_v23 }
 0x377   :  { %1286 = vmatprep.mubr.bf16.mxu0 %v1047_v26 }
 0x378   :  { %1287 = vmatmul.mubr.bf16.gmra.mrb[72].mxu0 %v1046_v47 }
 0x379   :  { %v881_v27 = vpop.f32.mrb[44].mxu1 }
 0x37a   :  { %v883_v28 = vpop.f32.mrb[45].mxu1 }
 0x37b   :  { %v885_v29 = vpop.f32.mrb[46].mxu1 }
 0x37c   :  { %v1048_v30 = vpack.c.bf16 %v885_v29, %v881_v27  ;;  %v887_v32 = vpop.f32.mrb[47].mxu1 }
 0x37d   :  { %v1049_v37 = vpack.c.bf16 %v887_v32, %v883_v28 }
 0x37f   :  { %1296 = vmatprep.mubr.bf16.mxu0 %v1049_v37 }
 0x380   :  { %1297 = vmatmul.mubr.bf16.gmra.mrb[76].mxu0 %v1048_v30 }
 0x381   :  { %v891_v33 = vpop.f32.mrb[48].mxu1 }
 0x382   :  { %v893_v49 = vpop.f32.mrb[49].mxu1 }
 0x383   :  { %v895_v51 = vpop.f32.mrb[50].mxu1 }
 0x384   :  { %v1050_v52 = vpack.c.bf16 %v895_v51, %v891_v33  ;;  %v897_v35 = vpop.f32.mrb[51].mxu1 }
 0x385   :  { %v1051_v53 = vpack.c.bf16 %v897_v35, %v893_v49 }
 0x387   :  { %1306 = vmatprep.mubr.bf16.mxu0 %v1051_v53 }
 0x388   :  { %1307 = vmatmul.mubr.bf16.gmra.mrb[80].mxu0 %v1050_v52 }
 0x389   :  { %v901_v6 = vpop.f32.mrb[52].mxu1 }
 0x38a   :  { %v903_v7 = vpop.f32.mrb[53].mxu1 }
 0x38b   :  { %v905_v38 = vpop.f32.mrb[54].mxu1 }
 0x38c   :  { %v1052_v8 = vpack.c.bf16 %v905_v38, %v901_v6  ;;  %v907_v9 = vpop.f32.mrb[55].mxu1 }
 0x38d   :  { %v1053_v10 = vpack.c.bf16 %v907_v9, %v903_v7 }
 0x38f   :  { %1316 = vmatprep.mubr.bf16.mxu0 %v1053_v10 }
 0x390   :  { %1317 = vmatmul.mubr.bf16.gmra.mrb[84].mxu0 %v1052_v8 }
 0x391   :  { %v911_v40 = vpop.f32.mrb[56].mxu1 }
 0x392   :  { %v913_v11 = vpop.f32.mrb[57].mxu1 }
 0x393   :  { %v915_v12 = vpop.f32.mrb[58].mxu1 }
 0x394   :  { %v1054_v13 = vpack.c.bf16 %v915_v12, %v911_v40  ;;  %v917_v42 = vpop.f32.mrb[59].mxu1 }
 0x395   :  { %v1055_v14 = vpack.c.bf16 %v917_v42, %v913_v11 }
 0x397   :  { %1326 = vmatprep.mubr.bf16.mxu0 %v1055_v14 }
 0x398   :  { %1327 = vmatmul.mubr.bf16.gmra.mrb[88].mxu0 %v1054_v13 }
 0x399   :  { %v921_v15 = vpop.f32.mrb[60].mxu1 }
 0x39a   :  { %v923_v16 = vpop.f32.mrb[61].mxu1 }
 0x39b   :  { %v925_v44 = vpop.f32.mrb[62].mxu1 }
 0x39c   :  { %v1056_v46 = vpack.c.bf16 %v925_v44, %v921_v15  ;;  %v927_v48 = vpop.f32.mrb[63].mxu1 }
 0x39d   :  { %v1057_v31 = vpack.c.bf16 %v927_v48, %v923_v16 }
 0x39f   :  { %1336 = vmatprep.mubr.bf16.mxu0 %v1057_v31 }
 0x3a0   :  { %1337 = vmatmul.mubr.bf16.gmra.mrb[92].mxu0 %v1056_v46 }
 0x3a1   :  { %v931_v34 = vpop.f32.mrb[64].mxu1 }
 0x3a2   :  { %v933_v36 = vpop.f32.mrb[65].mxu1 }
 0x3a3   :  { %v935_v39 = vpop.f32.mrb[66].mxu1 }
 0x3a4   :  { %v1058_v17 = vpack.c.bf16 %v935_v39, %v931_v34  ;;  %v937_v18 = vpop.f32.mrb[67].mxu1 }
 0x3a5   :  { %v1059_v41 = vpack.c.bf16 %v937_v18, %v933_v36  ;;  %v4758_v36 = vld [vmem:[%s5639_s10] sm:$0xff] }
 0x3a6   :  { %v3485_v39 = vcombine.high %v4758_v36, %v4758_v36 }
 0x3a7   :  { %1346 = vmatprep.mubr.bf16.mxu0 %v1059_v41 }
 0x3a8   :  { %1347 = vmatmul.mubr.bf16.gmra.mrb[96].mxu0 %v1058_v17  ;;  %1675 = vmatprep.mubr.bf16.mxu1 %v3485_v39 }
 0x3a9   :  { %v941_v19 = vpop.f32.mrb[68].mxu1 }
 0x3aa   :  { %v943_v20 = vpop.f32.mrb[69].mxu1 }
 0x3ab   :  { %v945_v43 = vpop.f32.mrb[70].mxu1 }
 0x3ac   :  { %v1060_v21 = vpack.c.bf16 %v945_v43, %v941_v19  ;;  %v947_v22 = vpop.f32.mrb[71].mxu1 }
 0x3ad   :  { %v1061_v45 = vpack.c.bf16 %v947_v22, %v943_v20 }
 0x3af   :  { %1356 = vmatprep.mubr.bf16.mxu0 %v1061_v45 }
 0x3b0   :  { %1357 = vmatmul.mubr.bf16.gmra.mrb[100].mxu0 %v1060_v21 }
 0x3b1   :  { %v951_v23 = vpop.f32.mrb[72].mxu1 }
 0x3b2   :  { %v953_v24 = vpop.f32.mrb[73].mxu1 }
 0x3b3   :  { %v955_v47 = vpop.f32.mrb[74].mxu1 }
 0x3b4   :  { %v1062_v25 = vpack.c.bf16 %v955_v47, %v951_v23  ;;  %v957_v26 = vpop.f32.mrb[75].mxu1 }
 0x3b5   :  { %v1063_v27 = vpack.c.bf16 %v957_v26, %v953_v24 }
 0x3b7   :  { %1366 = vmatprep.mubr.bf16.mxu0 %v1063_v27 }
 0x3b8   :  { %1367 = vmatmul.mubr.bf16.gmra.mrb[104].mxu0 %v1062_v25 }
 0x3b9   :  { %v961_v28 = vpop.f32.mrb[76].mxu1 }
 0x3ba   :  { %v963_v29 = vpop.f32.mrb[77].mxu1 }
 0x3bb   :  { %v965_v30 = vpop.f32.mrb[78].mxu1 }
 0x3bc   :  { %v1064_v32 = vpack.c.bf16 %v965_v30, %v961_v28  ;;  %v967_v37 = vpop.f32.mrb[79].mxu1 }
 0x3bd   :  { %v1065_v33 = vpack.c.bf16 %v967_v37, %v963_v29  ;;  %v1427_v29 = vld [vmem:[%s5636_s7] sm:$0xff] }
 0x3bf   :  { %1376 = vmatprep.mubr.bf16.mxu0 %v1065_v33 }
 0x3c0   :  { %1377 = vmatmul.mubr.bf16.gmra.mrb[108].mxu0 %v1064_v32  ;;  %v1428_v32 = vld [vmem:[%s5636_s7 + $0x8] sm:$0xff] }
 0x3c1   :  { %v971_v49 = vpop.f32.mrb[80].mxu1 }
 0x3c2   :  { %v973_v51 = vpop.f32.mrb[81].mxu1 }
 0x3c3   :  { %v975_v52 = vpop.f32.mrb[82].mxu1 }
 0x3c4   :  { %v1066_v35 = vpack.c.bf16 %v975_v52, %v971_v49  ;;  %v977_v53 = vpop.f32.mrb[83].mxu1 }
 0x3c5   :  { %v1067_v6 = vpack.c.bf16 %v977_v53, %v973_v51 }
 0x3c7   :  { %1386 = vmatprep.mubr.bf16.mxu0 %v1067_v6 }
 0x3c8   :  { %1387 = vmatmul.mubr.bf16.gmra.mrb[112].mxu0 %v1066_v35 }
 0x3c9   :  { %v981_v7 = vpop.f32.mrb[84].mxu1 }
 0x3ca   :  { %v983_v38 = vpop.f32.mrb[85].mxu1 }
 0x3cb   :  { %v985_v8 = vpop.f32.mrb[86].mxu1 }
 0x3cc   :  { %v1068_v9 = vpack.c.bf16 %v985_v8, %v981_v7  ;;  %v987_v10 = vpop.f32.mrb[87].mxu1 }
 0x3cd   :  { %v1069_v40 = vpack.c.bf16 %v987_v10, %v983_v38 }
 0x3cf   :  { %1396 = vmatprep.mubr.bf16.mxu0 %v1069_v40 }
 0x3d0   :  { %1397 = vmatmul.mubr.bf16.gmra.mrb[116].mxu0 %v1068_v9  ;;  %v1429_v9 = vld [vmem:[%s5636_s7 + $0x10] sm:$0xff] }
 0x3d1   :  { %v991_v11 = vpop.f32.mrb[88].mxu1 }
 0x3d2   :  { %v993_v12 = vpop.f32.mrb[89].mxu1 }
 0x3d3   :  { %v995_v13 = vpop.f32.mrb[90].mxu1 }
 0x3d4   :  { %v1070_v42 = vpack.c.bf16 %v995_v13, %v991_v11  ;;  %v997_v14 = vpop.f32.mrb[91].mxu1  ;;  %v1430_v13 = vld [vmem:[%s5636_s7 + $0x18] sm:$0xff] }
 0x3d5   :  { %v1071_v15 = vpack.c.bf16 %v997_v14, %v993_v12 }
 0x3d7   :  { %1406 = vmatprep.mubr.bf16.mxu0 %v1071_v15 }
 0x3d8   :  { %1407 = vmatmul.mubr.bf16.gmra.mrb[120].mxu0 %v1070_v42 }
 0x3d9   :  { %v1001_v16 = vpop.f32.mrb[92].mxu1 }
 0x3da   :  { %v1003_v44 = vpop.f32.mrb[93].mxu1 }
 0x3db   :  { %v1005_v46 = vpop.f32.mrb[94].mxu1 }
 0x3dc   :  { %v1072_v48 = vpack.c.bf16 %v1005_v46, %v1001_v16  ;;  %v1007_v31 = vpop.f32.mrb[95].mxu1 }
 0x3dd   :  { %v1073_v34 = vpack.c.bf16 %v1007_v31, %v1003_v44 }
 0x3df   :  { %1416 = vmatprep.mubr.bf16.mxu0 %v1073_v34 }
 0x3e0   :  { %1417 = vmatmul.mubr.bf16.gmra.mrb[124].mxu0 %v1072_v48 }
 0x3e1   :  { %1731 = vmatprep.mubr.bf16.mxu0 %v3485_v39 }
 0x43b   :  { %v4762_v17 = vpop.f32.mrb[64].mxu0 }
 0x43c   :  { %v4764_v18 = vpop.f32.mrb[65].mxu0 }
 0x43d   :  { %v1459_v41 = vmul.f32 1.442695, %v4764_v18  ;;  %v4767_v19 = vpop.f32.mrb[66].mxu0 }
 0x43e   :  { %v4771_v43 = vpop.f32.mrb[67].mxu0 }
 0x43f   :  { %3917 = vpow2.f32 %v1459_v41  ;;  %v1461_v21 = vmul.f32 1.442695, %v4771_v43 }
 0x441   :  { %3919 = vpow2.f32 %v1461_v21 }
 0x443   :  { %v4776_v45 = vpop.f32.mrb[68].mxu0 }
 0x444   :  { %v4778_v23 = vpop.f32.mrb[69].mxu0 }
 0x445   :  { %v1463_v24 = vmul.f32 1.442695, %v4778_v23  ;;  %v4781_v47 = vpop.f32.mrb[70].mxu0 }
 0x446   :  { %v4785_v26 = vpop.f32.mrb[71].mxu0 }
 0x447   :  { %3921 = vpow2.f32 %v1463_v24  ;;  %v1465_v27 = vmul.f32 1.442695, %v4785_v26 }
 0x449   :  { %v3918_v30 = vpop.eup %3917  ;;  %3923 = vpow2.f32 %v1465_v27  ;;  %v1431_v27 = vld [vmem:[%s5636_s7 + $0x20] sm:$0xff] }
 0x44a   :  { %v1523_v37 = vmul.f32 %v3918_v30, %v1427_v29 }
 0x44b   :  { %v3920_v33 = vpop.eup %3919  ;;  %v4796_v49 = vpop.f32.mrb[72].mxu0 }
 0x44c   :  { %v4798_v51 = vpop.f32.mrb[73].mxu0  ;;  %v1524_v52 = vmul.f32 %v3920_v33, %v1428_v32  ;;  %v4801_v35 = vadd.f32 %v1523_v37, %v4762_v17  ;;  %v1432_v32 = vld [vmem:[%s5636_s7 + $0x28] sm:$0xff] }
 0x44d   :  { %v1467_v53 = vmul.f32 1.442695, %v4798_v51  ;;  %v4804_v6 = vpop.f32.mrb[74].mxu0 }
 0x44e   :  { %v4808_v38 = vpop.f32.mrb[75].mxu0  ;;  %v4811_v8 = vadd.f32 %v1524_v52, %v4767_v19  ;;  %1587 = vst [vmem:[#allocation6] sm:$0xff] %v4801_v35 }
 0x44f   :  { %3925 = vpow2.f32 %v1467_v53  ;;  %v1469_v10 = vmul.f32 1.442695, %v4808_v38 }
 0x450   :  { %1588 = vst [vmem:[#allocation6 + $0x8] sm:$0xff] %v4811_v8 }
 0x451   :  { %v3922_v12 = vpop.eup %3921  ;;  %3927 = vpow2.f32 %v1469_v10 }
 0x452   :  { %v1525_v42 = vmul.f32 %v3922_v12, %v1429_v9 }
 0x453   :  { %v3924_v14 = vpop.eup %3923  ;;  %v4826_v15 = vpop.f32.mrb[76].mxu0 }
 0x454   :  { %v1526_v16 = vmul.f32 %v3924_v14, %v1430_v13  ;;  %v4828_v44 = vpop.f32.mrb[77].mxu0  ;;  %v4831_v46 = vadd.f32 %v1525_v42, %v4776_v45 }
 0x455   :  { %v1471_v48 = vmul.f32 1.442695, %v4828_v44  ;;  %v4834_v31 = vpop.f32.mrb[78].mxu0 }
 0x456   :  { %5667 = vst [vmem:[#allocation17_spill] sm:$0xff] %v4831_v46  ;;  %v4838_v39 = vpop.f32.mrb[79].mxu0  ;;  %v4841_v41 = vadd.f32 %v1526_v16, %v4781_v47  ;;  %1589 = vst [vmem:[#allocation6 + $0x10] sm:$0xff] %v4831_v46 }
 0x457   :  { %3929 = vpow2.f32 %v1471_v48  ;;  %v1473_v21 = vmul.f32 1.442695, %v4838_v39 }
 0x458   :  { %5668 = vst [vmem:[#allocation18_spill] sm:$0xff] %v4841_v41  ;;  %1590 = vst [vmem:[#allocation6 + $0x18] sm:$0xff] %v4841_v41 }
 0x459   :  { %v3926_v30 = vpop.eup %3925  ;;  %3931 = vpow2.f32 %v1473_v21 }
 0x45a   :  { %v1527_v37 = vmul.f32 %v3926_v30, %v1431_v27  ;;  %v1433_v27 = vld [vmem:[%s5636_s7 + $0x30] sm:$0xff] }
 0x45b   :  { %v3928_v33 = vpop.eup %3927  ;;  %v4856_v52 = vpop.f32.mrb[80].mxu0 }
 0x45c   :  { %v4858_v53 = vpop.f32.mrb[81].mxu0  ;;  %v1528_v9 = vmul.f32 %v3928_v33, %v1432_v32  ;;  %v4861_v10 = vadd.f32 %v1527_v37, %v4796_v49  ;;  %v1434_v37 = vld [vmem:[%s5636_s7 + $0x38] sm:$0xff] }
 0x45d   :  { %v1475_v12 = vmul.f32 1.442695, %v4858_v53  ;;  %v4864_v13 = vpop.f32.mrb[82].mxu0 }
 0x45e   :  { %5669 = vst [vmem:[#allocation19_spill] sm:$0xff] %v4861_v10  ;;  %v4868_v14 = vpop.f32.mrb[83].mxu0  ;;  %v4871_v16 = vadd.f32 %v1528_v9, %v4804_v6  ;;  %1591 = vst [vmem:[#allocation6 + $0x20] sm:$0xff] %v4861_v10 }
 0x45f   :  { %3933 = vpow2.f32 %v1475_v12  ;;  %v1477_v48 = vmul.f32 1.442695, %v4868_v14 }
 0x460   :  { %5670 = vst [vmem:[#allocation20_spill] sm:$0xff] %v4871_v16  ;;  %1592 = vst [vmem:[#allocation6 + $0x28] sm:$0xff] %v4871_v16 }
 0x461   :  { %v3930_v32 = vpop.eup %3929  ;;  %3935 = vpow2.f32 %v1477_v48 }
 0x462   :  { %v1529_v33 = vmul.f32 %v3930_v32, %v1433_v27 }
 0x463   :  { %v3932_v9 = vpop.eup %3931  ;;  %v4886_v12 = vpop.f32.mrb[84].mxu0 }
 0x464   :  { %v4888_v29 = vpop.f32.mrb[85].mxu0  ;;  %v1530_v11 = vmul.f32 %v3932_v9, %v1434_v37  ;;  %v4891_v2 = vadd.f32 %v1529_v33, %v4826_v15  ;;  %v1435_v33 = vld [vmem:[%s5636_s7 + $0x40] sm:$0xff] }
 0x465   :  { %v1479_v21 = vmul.f32 1.442695, %v4888_v29  ;;  %v4894_v42 = vpop.f32.mrb[86].mxu0 }
 0x466   :  { %5671 = vst [vmem:[#allocation21_spill] sm:$0xff] %v4891_v2  ;;  %v4898_v30 = vpop.f32.mrb[87].mxu0  ;;  %v4901_v27 = vadd.f32 %v1530_v11, %v4834_v31  ;;  %1593 = vst [vmem:[#allocation6 + $0x30] sm:$0xff] %v4891_v2  ;;  %v1436_v11 = vld [vmem:[%s5636_s7 + $0x48] sm:$0xff] }
 0x467   :  { %3937 = vpow2.f32 %v1479_v21  ;;  %v1481_v32 = vmul.f32 1.442695, %v4898_v30 }
 0x468   :  { %5672 = vst [vmem:[#allocation22_spill] sm:$0xff] %v4901_v27  ;;  %1594 = vst [vmem:[#allocation6 + $0x38] sm:$0xff] %v4901_v27 }
 0x469   :  { %v3934_v48 = vpop.eup %3933  ;;  %3939 = vpow2.f32 %v1481_v32 }
 0x46a   :  { %v1531_v21 = vmul.f32 %v3934_v48, %v1435_v33 }
 0x46b   :  { %v3936_v24 = vpop.eup %3935  ;;  %v4916_v34 = vpop.f32.mrb[88].mxu0 }
 0x46c   :  { %v4918_v37 = vpop.f32.mrb[89].mxu0  ;;  %v1532_v40 = vmul.f32 %v3936_v24, %v1436_v11  ;;  %v4921_v7 = vadd.f32 %v1531_v21, %v4856_v52  ;;  %v1437_v11 = vld [vmem:[%s5636_s7 + $0x50] sm:$0xff] }
 0x46d   :  { %v1483_v28 = vmul.f32 1.442695, %v4918_v37  ;;  %v4924_v25 = vpop.f32.mrb[90].mxu0 }
 0x46e   :  { %5673 = vst [vmem:[#allocation23_spill] sm:$0xff] %v4921_v7  ;;  %v4928_v9 = vpop.f32.mrb[91].mxu0  ;;  %v4931_v48 = vadd.f32 %v1532_v40, %v4864_v13  ;;  %1595 = vst [vmem:[#allocation6 + $0x40] sm:$0xff] %v4921_v7 }
 0x46f   :  { %3941 = vpow2.f32 %v1483_v28  ;;  %v1485_v24 = vmul.f32 1.442695, %v4928_v9  ;;  %v1438_v28 = vld [vmem:[%s5636_s7 + $0x58] sm:$0xff] }
 0x470   :  { %5674 = vst [vmem:[#allocation24_spill] sm:$0xff] %v4931_v48  ;;  %1596 = vst [vmem:[#allocation6 + $0x48] sm:$0xff] %v4931_v48 }
 0x471   :  { %v3938_v32 = vpop.eup %3937  ;;  %3943 = vpow2.f32 %v1485_v24 }
 0x472   :  { %v1533_v40 = vmul.f32 %v3938_v32, %v1437_v11 }
 0x473   :  { %v3940_v22 = vpop.eup %3939  ;;  %v4946_v20 = vpop.f32.mrb[92].mxu0 }
 0x474   :  { %v4948_v33 = vpop.f32.mrb[93].mxu0  ;;  %v1534_v2 = vmul.f32 %v3940_v22, %v1438_v28  ;;  %v4951_v27 = vadd.f32 %v1533_v40, %v4886_v12  ;;  %v1439_v28 = vld [vmem:[%s5636_s7 + $0x60] sm:$0xff] }
 0x475   :  { %v1487_v10 = vmul.f32 1.442695, %v4948_v33  ;;  %v4954_v16 = vpop.f32.mrb[94].mxu0 }
 0x476   :  { %5675 = vst [vmem:[#allocation25_spill] sm:$0xff] %v4951_v27  ;;  %v4958_v21 = vpop.f32.mrb[95].mxu0  ;;  %v4961_v32 = vadd.f32 %v1534_v2, %v4894_v42  ;;  %1597 = vst [vmem:[#allocation6 + $0x50] sm:$0xff] %v4951_v27  ;;  %v1440_v2 = vld [vmem:[%s5636_s7 + $0x68] sm:$0xff] }
 0x477   :  { %3945 = vpow2.f32 %v1487_v10  ;;  %v1489_v22 = vmul.f32 1.442695, %v4958_v21 }
 0x478   :  { %1598 = vst [vmem:[#allocation6 + $0x58] sm:$0xff] %v4961_v32 }
 0x479   :  { %v3942_v24 = vpop.eup %3941  ;;  %3947 = vpow2.f32 %v1489_v22 }
 0x47a   :  { %v1535_v10 = vmul.f32 %v3942_v24, %v1439_v28  ;;  %v1441_v24 = vld [vmem:[%s5636_s7 + $0x70] sm:$0xff] }
 0x47b   :  { %v3944_v7 = vpop.eup %3943  ;;  %v1348_v48 = vpop.f32.mrb[96].mxu0 }
 0x47c   :  { %v1350_v46 = vpop.f32.mrb[97].mxu0  ;;  %v1536_v11 = vmul.f32 %v3944_v7, %v1440_v2  ;;  %v4977_v41 = vadd.f32 %v1535_v10, %v4916_v34 }
 0x47d   :  { %v1491_v5 = vmul.f32 1.442695, %v1350_v46  ;;  %v1352_v4 = vpop.f32.mrb[98].mxu0 }
 0x47e   :  { %5676 = vst [vmem:[#allocation26_spill] sm:$0xff] %v4977_v41  ;;  %v1628_v3 = vpack.c.bf16 %v1352_v4, %v1348_v48  ;;  %v1354_v1 = vpop.f32.mrb[99].mxu0  ;;  %v4980_v40 = vadd.f32 %v1536_v11, %v4924_v25  ;;  %1599 = vst [vmem:[#allocation6 + $0x60] sm:$0xff] %v4977_v41  ;;  %v5677_v11 = vpack.c.bf16 %v4767_v19, %v4762_v17 }
 0x47f   :  { %3949 = vpow2.f32 %v1491_v5  ;;  %v1493_v22 = vmul.f32 1.442695, %v1354_v1  ;;  %v1691_v27 = vpack.c.bf16 %v1354_v1, %v1350_v46  ;;  %v1442_v1 = vld [vmem:[%s5636_s7 + $0x78] sm:$0xff]  ;;  %v5678_v5 = vpack.c.bf16 %v4771_v43, %v4764_v18 }
 0x480   :  { %3575 = vmatprep.subr.bf16.mxu1 %v1628_v3  ;;  %1600 = vst [vmem:[#allocation6 + $0x68] sm:$0xff] %v4980_v40 }
 0x481   :  { %v3946_v28 = vpop.eup %3945  ;;  %3951 = vpow2.f32 %v1493_v22  ;;  %3576 = vmatpush3.bf16.msra.mxu1 %v5677_v11  ;;  %3597 = vmatprep.subr.bf16.mxu0 %v1691_v27 }
 0x482   :  { %3598 = vmatpush3.bf16.msra.mxu0 %v5678_v5  ;;  %v1537_v3 = vmul.f32 %v3946_v28, %v1441_v24  ;;  %v1443_v24 = vld [vmem:[%s5636_s7 + $0x80] sm:$0xff]  ;;  %v5682_v5 = vpack.c.bf16 %v4785_v26, %v4778_v23  ;;  %v1445_v23 = vld [vmem:[%s5636_s7 + $0x90] sm:$0xff] }
 0x483   :  { %v3948_v46 = vpop.eup %3947  ;;  %v1358_v2 = vpop.f32.mrb[100].mxu0 }
 0x484   :  { %v1360_v10 = vpop.f32.mrb[101].mxu0  ;;  %v1538_v7 = vmul.f32 %v3948_v46, %v1442_v1  ;;  %v4999_v22 = vadd.f32 %v1537_v3, %v4946_v20 }
 0x485   :  { %v1495_v41 = vmul.f32 1.442695, %v1360_v10  ;;  %v1362_v17 = vpop.f32.mrb[102].mxu0 }
 0x486   :  { %5679 = vst [vmem:[#allocation27_spill] sm:$0xff] %v4999_v22  ;;  %v1629_v19 = vpack.c.bf16 %v1362_v17, %v1358_v2  ;;  %v1364_v27 = vpop.f32.mrb[103].mxu0  ;;  %v5002_v11 = vadd.f32 %v1538_v7, %v4954_v16  ;;  %1601 = vst [vmem:[#allocation6 + $0x70] sm:$0xff] %v4999_v22  ;;  %v5681_v7 = vpack.c.bf16 %v4781_v47, %v4776_v45 }
 0x487   :  { %3953 = vpow2.f32 %v1495_v41  ;;  %v1497_v18 = vmul.f32 1.442695, %v1364_v27  ;;  %v1692_v43 = vpack.c.bf16 %v1364_v27, %v1360_v10  ;;  %v1444_v41 = vld [vmem:[%s5636_s7 + $0x88] sm:$0xff] }
 0x488   :  { %5680 = vst [vmem:[#allocation28_spill] sm:$0xff] %v5002_v11  ;;  %3577 = vmatprep.subr.bf16.mxu1 %v1629_v19  ;;  %1602 = vst [vmem:[#allocation6 + $0x78] sm:$0xff] %v5002_v11 }
 0x489   :  { %v3950_v1 = vpop.eup %3949  ;;  %3955 = vpow2.f32 %v1497_v18  ;;  %3578 = vmatpush3.bf16.msra.mxu1 %v5681_v7  ;;  %3599 = vmatprep.subr.bf16.mxu0 %v1692_v43 }
 0x48a   :  { %3600 = vmatpush3.bf16.msra.mxu0 %v5682_v5  ;;  %v1539_v3 = vmul.f32 %v3950_v1, %v1443_v24  ;;  %v1446_v24 = vld [vmem:[%s5636_s7 + $0x98] sm:$0xff]  ;;  %v5684_v1 = vpack.c.bf16 %v4808_v38, %v4798_v51  ;;  %v1447_v51 = vld [vmem:[%s5636_s7 + $0xa0] sm:$0xff] }
 0x48b   :  { %v3952_v46 = vpop.eup %3951  ;;  %v1368_v10 = vpop.f32.mrb[104].mxu0 }
 0x48c   :  { %v1370_v19 = vpop.f32.mrb[105].mxu0  ;;  %v1540_v27 = vmul.f32 %v3952_v46, %v1444_v41  ;;  %v5020_v28 = vadd.f32 %v1539_v3, %v1348_v48 }
 0x48d   :  { %v1499_v18 = vmul.f32 1.442695, %v1370_v19  ;;  %v1372_v22 = vpop.f32.mrb[106].mxu0 }
 0x48e   :  { %v1630_v45 = vpack.c.bf16 %v1372_v22, %v1368_v10  ;;  %v1374_v47 = vpop.f32.mrb[107].mxu0  ;;  %v5022_v43 = vadd.f32 %v1540_v27, %v1352_v4  ;;  %1603 = vst [vmem:[#allocation6 + $0x80] sm:$0xff] %v5020_v28  ;;  %v5683_v4 = vpack.c.bf16 %v4804_v6, %v4796_v49 }
 0x48f   :  { %3957 = vpow2.f32 %v1499_v18  ;;  %v1501_v7 = vmul.f32 1.442695, %v1374_v47  ;;  %v1693_v11 = vpack.c.bf16 %v1374_v47, %v1370_v19 }
 0x490   :  { %3579 = vmatprep.subr.bf16.mxu1 %v1630_v45  ;;  %1604 = vst [vmem:[#allocation6 + $0x88] sm:$0xff] %v5022_v43  ;;  %v2881_v26 = vpack.c.bf16 %v5022_v43, %v5020_v28 }
 0x491   :  { %v3954_v48 = vpop.eup %3953  ;;  %3959 = vpow2.f32 %v1501_v7  ;;  %3580 = vmatpush3.bf16.msra.mxu1 %v5683_v4  ;;  %3601 = vmatprep.subr.bf16.mxu0 %v1693_v11 }
 0x492   :  { %3602 = vmatpush3.bf16.msra.mxu0 %v5684_v1  ;;  %v1541_v41 = vmul.f32 %v3954_v48, %v1445_v23  ;;  %v1448_v23 = vld [vmem:[%s5636_s7 + $0xa8] sm:$0xff]  ;;  %v5686_v48 = vpack.c.bf16 %v4838_v39, %v4828_v44  ;;  %v1449_v44 = vld [vmem:[%s5636_s7 + $0xb0] sm:$0xff] }
 0x493   :  { %v3956_v5 = vpop.eup %3955  ;;  %v1378_v3 = vpop.f32.mrb[108].mxu0 }
 0x494   :  { %v1380_v46 = vpop.f32.mrb[109].mxu0  ;;  %v1542_v19 = vmul.f32 %v3956_v5, %v1446_v24  ;;  %v5040_v27 = vadd.f32 %v1541_v41, %v1358_v2 }
 0x495   :  { %v1503_v18 = vmul.f32 1.442695, %v1380_v46  ;;  %v1382_v45 = vpop.f32.mrb[110].mxu0 }
 0x496   :  { %v1631_v49 = vpack.c.bf16 %v1382_v45, %v1378_v3  ;;  %v1384_v6 = vpop.f32.mrb[111].mxu0  ;;  %v5042_v11 = vadd.f32 %v1542_v19, %v1362_v17  ;;  %1605 = vst [vmem:[#allocation6 + $0x90] sm:$0xff] %v5040_v27  ;;  %v5685_v17 = vpack.c.bf16 %v4834_v31, %v4826_v15 }
 0x497   :  { %3961 = vpow2.f32 %v1503_v18  ;;  %v1505_v47 = vmul.f32 1.442695, %v1384_v6  ;;  %v1694_v7 = vpack.c.bf16 %v1384_v6, %v1380_v46 }
 0x498   :  { %3581 = vmatprep.subr.bf16.mxu1 %v1631_v49  ;;  %1606 = vst [vmem:[#allocation6 + $0x98] sm:$0xff] %v5042_v11  ;;  %v2882_v38 = vpack.c.bf16 %v5042_v11, %v5040_v27 }
 0x499   :  { %v3958_v2 = vpop.eup %3957  ;;  %3963 = vpow2.f32 %v1505_v47  ;;  %3582 = vmatpush3.bf16.msra.mxu1 %v5685_v17  ;;  %3603 = vmatprep.subr.bf16.mxu0 %v1694_v7  ;;  %v1450_v7 = vld [vmem:[%s5636_s7 + $0xb8] sm:$0xff] }
 0x49a   :  { %3604 = vmatpush3.bf16.msra.mxu0 %v5686_v48  ;;  %v1543_v4 = vmul.f32 %v3958_v2, %v1447_v51  ;;  %v5688_v51 = vpack.c.bf16 %v4868_v14, %v4858_v53  ;;  %v1451_v53 = vld [vmem:[%s5636_s7 + $0xc0] sm:$0xff] }
 0x49b   :  { %v3960_v24 = vpop.eup %3959  ;;  %v1388_v1 = vpop.f32.mrb[112].mxu0 }
 0x49c   :  { %v1390_v41 = vpop.f32.mrb[113].mxu0  ;;  %v1544_v5 = vmul.f32 %v3960_v24, %v1448_v23  ;;  %v5060_v46 = vadd.f32 %v1543_v4, %v1368_v10 }
 0x49d   :  { %v1507_v19 = vmul.f32 1.442695, %v1390_v41  ;;  %v1392_v18 = vpop.f32.mrb[114].mxu0 }
 0x49e   :  { %v1632_v15 = vpack.c.bf16 %v1392_v18, %v1388_v1  ;;  %v1394_v31 = vpop.f32.mrb[115].mxu0  ;;  %v5062_v49 = vadd.f32 %v1544_v5, %v1372_v22  ;;  %1607 = vst [vmem:[#allocation6 + $0xa0] sm:$0xff] %v5060_v46  ;;  %v5687_v22 = vpack.c.bf16 %v4864_v13, %v4856_v52 }
 0x49f   :  { %3965 = vpow2.f32 %v1507_v19  ;;  %v1509_v6 = vmul.f32 1.442695, %v1394_v31  ;;  %v1695_v47 = vpack.c.bf16 %v1394_v31, %v1390_v41 }
 0x4a0   :  { %3583 = vmatprep.subr.bf16.mxu1 %v1632_v15  ;;  %1608 = vst [vmem:[#allocation6 + $0xa8] sm:$0xff] %v5062_v49  ;;  %v2883_v39 = vpack.c.bf16 %v5062_v49, %v5060_v46 }
 0x4a1   :  { %v3962_v10 = vpop.eup %3961  ;;  %3967 = vpow2.f32 %v1509_v6  ;;  %3584 = vmatpush3.bf16.msra.mxu1 %v5687_v22  ;;  %3605 = vmatprep.subr.bf16.mxu0 %v1695_v47  ;;  %v1452_v6 = vld [vmem:[%s5636_s7 + $0xc8] sm:$0xff]  ;;  %v5690_v47 = vpack.c.bf16 %v4898_v30, %v4888_v29  ;;  %v1453_v29 = vld [vmem:[%s5636_s7 + $0xd0] sm:$0xff] }
 0x4a2   :  { %3606 = vmatpush3.bf16.msra.mxu0 %v5688_v51  ;;  %v1545_v2 = vmul.f32 %v3962_v10, %v1449_v44 }
 0x4a3   :  { %v3964_v17 = vpop.eup %3963  ;;  %v1398_v23 = vpop.f32.mrb[116].mxu0 }
 0x4a4   :  { %v1400_v48 = vpop.f32.mrb[117].mxu0  ;;  %v1546_v4 = vmul.f32 %v3964_v17, %v1450_v7  ;;  %v5080_v24 = vadd.f32 %v1545_v2, %v1378_v3 }
 0x4a5   :  { %v1511_v41 = vmul.f32 1.442695, %v1400_v48  ;;  %v1402_v5 = vpop.f32.mrb[118].mxu0 }
 0x4a6   :  { %v1633_v52 = vpack.c.bf16 %v1402_v5, %v1398_v23  ;;  %v1404_v13 = vpop.f32.mrb[119].mxu0  ;;  %v5082_v19 = vadd.f32 %v1546_v4, %v1382_v45  ;;  %1609 = vst [vmem:[#allocation6 + $0xb0] sm:$0xff] %v5080_v24  ;;  %v5689_v45 = vpack.c.bf16 %v4894_v42, %v4886_v12 }
 0x4a7   :  { %3969 = vpow2.f32 %v1511_v41  ;;  %v1513_v15 = vmul.f32 1.442695, %v1404_v13  ;;  %v1696_v31 = vpack.c.bf16 %v1404_v13, %v1400_v48  ;;  %v1454_v13 = vld [vmem:[%s5636_s7 + $0xd8] sm:$0xff] }
 0x4a8   :  { %3585 = vmatprep.subr.bf16.mxu1 %v1633_v52  ;;  %1610 = vst [vmem:[#allocation6 + $0xb8] sm:$0xff] %v5082_v19  ;;  %v2884_v14 = vpack.c.bf16 %v5082_v19, %v5080_v24 }
 0x4a9   :  { %v3966_v3 = vpop.eup %3965  ;;  %3971 = vpow2.f32 %v1513_v15  ;;  %3586 = vmatpush3.bf16.msra.mxu1 %v5689_v45  ;;  %3607 = vmatprep.subr.bf16.mxu0 %v1696_v31  ;;  %v5692_v15 = vpack.c.bf16 %v4928_v9, %v4918_v37 }
 0x4aa   :  { %3608 = vmatpush3.bf16.msra.mxu0 %v5690_v47  ;;  %v1547_v44 = vmul.f32 %v3966_v3, %v1451_v53 }
 0x4ab   :  { %v3968_v10 = vpop.eup %3967  ;;  %v1408_v22 = vpop.f32.mrb[120].mxu0 }
 0x4ac   :  { %v1410_v7 = vpop.f32.mrb[121].mxu0  ;;  %v1548_v51 = vmul.f32 %v3968_v10, %v1452_v6  ;;  %v5100_v2 = vadd.f32 %v1547_v44, %v1388_v1 }
 0x4ad   :  { %v1515_v17 = vmul.f32 1.442695, %v1410_v7  ;;  %v1412_v48 = vpop.f32.mrb[122].mxu0 }
 0x4ae   :  { %v1634_v42 = vpack.c.bf16 %v1412_v48, %v1408_v22  ;;  %v1414_v12 = vpop.f32.mrb[123].mxu0  ;;  %v5102_v4 = vadd.f32 %v1548_v51, %v1392_v18  ;;  %1611 = vst [vmem:[#allocation6 + $0xc0] sm:$0xff] %v5100_v2  ;;  %v5691_v18 = vpack.c.bf16 %v4924_v25, %v4916_v34 }
 0x4af   :  { %3973 = vpow2.f32 %v1515_v17  ;;  %v1517_v41 = vmul.f32 1.442695, %v1414_v12  ;;  %v1697_v52 = vpack.c.bf16 %v1414_v12, %v1410_v7  ;;  %v3839_v7 = vld [vmem:[%s5634_s5 + $0x4] ss:$8 sps:$4 sm:$0xff]   ;;  %v3484_v17 = vcombine.low %v4758_v36, %v4758_v36 }
 0x4b0   :  { %3587 = vmatprep.subr.bf16.mxu1 %v1634_v42  ;;  %1612 = vst [vmem:[#allocation6 + $0xc8] sm:$0xff] %v5102_v4  ;;  %v2885_v30 = vpack.c.bf16 %v5102_v4, %v5100_v2  ;;  %v5693_v12 = vpack.c.bf16 %v4954_v16, %v4946_v20  ;;  %v1456_v36 = vld [vmem:[%s5636_s7 + $0xe8] sm:$0xff] }
 0x4b1   :  { %v3970_v1 = vpop.eup %3969  ;;  %3975 = vpow2.f32 %v1517_v41  ;;  %3588 = vmatpush3.bf16.msra.mxu1 %v5691_v18  ;;  %3609 = vmatprep.subr.bf16.mxu0 %v1697_v52  ;;  %v3837_v41 = vld [vmem:[%s5634_s5] ss:$8 sps:$4 sm:$0xff]   ;;  %v5694_v52 = vpack.c.bf16 %v4958_v21, %v4948_v33  ;;  %v3845_v33 = vld [vmem:[%s5634_s5 + $0x24] ss:$8 sps:$4 sm:$0xff]   ;;  %v5695_v21 = vmov 0  }
 0x4b2   :  { %3610 = vmatpush3.bf16.msra.mxu0 %v5692_v15  ;;  %v1549_v31 = vmul.f32 %v3970_v1, %v1453_v29  ;;  %v3842_v29 = vld [vmem:[%s5634_s5 + $0x14] ss:$8 sps:$4 sm:$0xff]  }
 0x4b3   :  { %v3972_v53 = vpop.eup %3971  ;;  %v1418_v3 = vpop.f32.mrb[124].mxu0 }
 0x4b4   :  { %v1420_v45 = vpop.f32.mrb[125].mxu0  ;;  %v1550_v6 = vmul.f32 %v3972_v53, %v1454_v13  ;;  %v5120_v47 = vadd.f32 %v1549_v31, %v1398_v23  ;;  %v1455_v23 = vld [vmem:[%s5636_s7 + $0xe0] sm:$0xff]  ;;  %v3840_v13 = vld [vmem:[%s5634_s5 + $0x10] ss:$8 sps:$4 sm:$0xff]  }
 0x4b5   :  { %v1519_v44 = vmul.f32 1.442695, %v1420_v45  ;;  %v1422_v10 = vpop.f32.mrb[126].mxu0 }
 0x4b6   :  { %v1635_v25 = vpack.c.bf16 %v1422_v10, %v1418_v3  ;;  %v1424_v34 = vpop.f32.mrb[127].mxu0  ;;  %v5125_v51 = vadd.f32 %v1550_v6, %v1402_v5  ;;  %1613 = vst [vmem:[#allocation6 + $0xd0] sm:$0xff] %v5120_v47  ;;  %v3848_v6 = vld [vmem:[%s5634_s5 + $0x34] ss:$8 sps:$4 sm:$0xff]  }
 0x4b7   :  { %3977 = vpow2.f32 %v1519_v44  ;;  %v1521_v37 = vmul.f32 1.442695, %v1424_v34  ;;  %v1698_v9 = vpack.c.bf16 %v1424_v34, %v1420_v45  ;;  %v1458_v45 = vld [vmem:[%s5636_s7 + $0xf8] sm:$0xff] }
 0x4b8   :  { %3589 = vmatprep.subr.bf16.mxu1 %v1635_v25  ;;  %1614 = vst [vmem:[#allocation6 + $0xd8] sm:$0xff] %v5125_v51  ;;  %v2886_v42 = vpack.c.bf16 %v5125_v51, %v5120_v47 }
 0x4b9   :  { %v3974_v5 = vpop.eup %3973  ;;  %3979 = vpow2.f32 %v1521_v37  ;;  %3590 = vmatpush3.bf16.msra.mxu1 %v5693_v12  ;;  %3611 = vmatprep.subr.bf16.mxu0 %v1698_v9  ;;  %v3846_v37 = vld [vmem:[%s5634_s5 + $0x30] ss:$8 sps:$4 sm:$0xff]   ;;  %v3851_v9 = vld [vmem:[%s5634_s5 + $0x44] ss:$8 sps:$4 sm:$0xff]  }
 0x4ba   :  { %3612 = vmatpush3.bf16.msra.mxu0 %v5694_v52  ;;  %1905 = vmatprep.subr.bf16.mxu1 %v3839_v7  ;;  %v1551_v20 = vmul.f32 %v3974_v5, %v1455_v23  ;;  %v3854_v5 = vld [vmem:[%s5634_s5 + $0x54] ss:$8 sps:$4 sm:$0xff]   ;;  %v3857_v12 = vld [vmem:[%s5634_s5 + $0x64] ss:$8 sps:$4 sm:$0xff]   ;;  %v3858_v52 = vld [vmem:[%s5634_s5 + $0x70] ss:$8 sps:$4 sm:$0xff]  }
 0x4bb   :  { %v3976_v16 = vpop.eup %3975 }
 0x4bc   :  { %1676 = vmatmul.mubr.bf16.vlgmr.msra.gmra.mrb[96].mxu1 %v3484_v17  ;;  %v1552_v1 = vmul.f32 %v3976_v16, %v1456_v36  ;;  %v5151_v18 = vadd.f32 %v1551_v20, %v1408_v22  ;;  %v1457_v22 = vld [vmem:[%s5636_s7 + $0xf0] sm:$0xff]  ;;  %v3862_v20 = vld [vmem:[%s5633_s4 + $0x8] sm:$0xff]  }
 0x4bd   :  { %1732 = vmatmul.mubr.bf16.vlgmr.msra.gmra.mrb[128].mxu0 %v3484_v17  ;;  %1906 = vmatpush1.bf16.msra.mxu1 %v3837_v41  ;;  %v3849_v17 = vld [vmem:[%s5634_s5 + $0x40] ss:$8 sps:$4 sm:$0xff]   ;;  %v3860_v36 = vld [vmem:[%s5634_s5 + $0x74] ss:$8 sps:$4 sm:$0xff]  }
 0x4be   :  { %1907 = vmatprep.subr.bf16.mxu1 %v3842_v29  ;;  %1937 = vmatprep.mubr.bf16.mxu1 %v5695_v21  ;;  %v5160_v15 = vadd.f32 %v1552_v1, %v1412_v48  ;;  %1615 = vst [vmem:[#allocation6 + $0xe0] sm:$0xff] %v5151_v18  ;;  %v3843_v48 = vld [vmem:[%s5634_s5 + $0x20] ss:$8 sps:$4 sm:$0xff]   ;;  %v3863_v16 = vld [vmem:[%s5633_s4 + $0x10] sm:$0xff]   ;;  %v3864_v1 = vld [vmem:[%s5633_s4 + $0x18] sm:$0xff]  }
 0x4bf   :  { %2066 = vmatprep.mubr.bf16.mxu0 %v5695_v21  ;;  %v3855_v41 = vld [vmem:[%s5634_s5 + $0x60] ss:$8 sps:$4 sm:$0xff]  }
 0x4c0   :  { %1616 = vst [vmem:[#allocation6 + $0xe8] sm:$0xff] %v5160_v15  ;;  %v2887_v31 = vpack.c.bf16 %v5160_v15, %v5151_v18  ;;  %v3861_v29 = vld [vmem:[%s5633_s4] sm:$0xff]  }
 0x4c1   :  { %v3978_v53 = vpop.eup %3977  ;;  %1908 = vmatpush1.bf16.msra.mxu1 %v3840_v13  ;;  %v3865_v13 = vld [vmem:[%s5633_s4 + $0x20] sm:$0xff]  }
 0x4c2   :  { %1909 = vmatprep.subr.bf16.mxu1 %v3845_v33  ;;  %v1553_v44 = vmul.f32 %v3978_v53, %v1457_v22  ;;  %v3866_v33 = vld [vmem:[%s5633_s4 + $0x28] sm:$0xff]   ;;  %v3867_v22 = vld [vmem:[%s5633_s4 + $0x30] sm:$0xff]   ;;  %v3868_v53 = vld [vmem:[%s5633_s4 + $0x38] sm:$0xff]  }
 0x4c3   :  { %v3980_v25 = vpop.eup %3979 }
 0x4c4   :  { %v1554_v34 = vmul.f32 %v3980_v25, %v1458_v45  ;;  %v5179_v7 = vadd.f32 %v1553_v44, %v1418_v3 }
 0x4c5   :  { %1910 = vmatpush1.bf16.msra.mxu1 %v3843_v48 }
 0x4c6   :  { %1911 = vmatprep.subr.bf16.mxu1 %v3848_v6  ;;  %v5187_v23 = vadd.f32 %v1554_v34, %v1422_v10  ;;  %1617 = vst [vmem:[#allocation6 + $0xf0] sm:$0xff] %v5179_v7  ;;  %v3852_v10 = vld [vmem:[%s5634_s5 + $0x50] ss:$8 sps:$4 sm:$0xff]  }
 0x4c8   :  { %1618 = vst [vmem:[#allocation6 + $0xf8] sm:$0xff] %v5187_v23  ;;  %v2888_v3 = vpack.c.bf16 %v5187_v23, %v5179_v7 }
 0x4c9   :  { %1912 = vmatpush1.bf16.msra.mxu1 %v3846_v37 }
 0x4ca   :  { %1913 = vmatprep.subr.bf16.mxu1 %v3851_v9 }
 0x4cd   :  { %1914 = vmatpush1.bf16.msra.mxu1 %v3849_v17 }
 0x4ce   :  { %1915 = vmatprep.subr.bf16.mxu1 %v3854_v5 }
 0x4d1   :  { %1916 = vmatpush1.bf16.msra.mxu1 %v3852_v10 }
 0x4d2   :  { %1917 = vmatprep.subr.bf16.mxu1 %v3857_v12  ;;  %v1739_v12 = vld [vmem:[%s5638_s9] sm:$0xff] }
 0x4d5   :  { %1918 = vmatpush1.bf16.msra.mxu1 %v3855_v41 }
 0x4d6   :  { %1919 = vmatprep.subr.bf16.mxu1 %v3860_v36 }
 0x4d9   :  { %1920 = vmatpush1.bf16.msra.mxu1 %v3858_v52 }
 0x4dc   :  { %1938 = vmatmul.mubr.bf16.vlgmr.msra.gmra.mrb[100].mxu1 %v3861_v29 }
 0x4dd   :  { %1947 = vmatprep.mubr.bf16.mxu1 %v5695_v21 }
 0x4e4   :  { %1948 = vmatmul.mubr.bf16.gmra.mrb[104].mxu1 %v3862_v20 }
 0x4e5   :  { %1957 = vmatprep.mubr.bf16.mxu1 %v5695_v21 }
 0x4ec   :  { %1958 = vmatmul.mubr.bf16.gmra.mrb[108].mxu1 %v3863_v16 }
 0x4ed   :  { %1967 = vmatprep.mubr.bf16.mxu1 %v5695_v21 }
 0x4f4   :  { %1968 = vmatmul.mubr.bf16.gmra.mrb[112].mxu1 %v3864_v1 }
 0x4f5   :  { %1977 = vmatprep.mubr.bf16.mxu1 %v5695_v21 }
 0x4fc   :  { %1978 = vmatmul.mubr.bf16.gmra.mrb[116].mxu1 %v3865_v13 }
 0x4fd   :  { %1987 = vmatprep.mubr.bf16.mxu1 %v5695_v21 }
 0x504   :  { %1988 = vmatmul.mubr.bf16.gmra.mrb[120].mxu1 %v3866_v33 }
 0x505   :  { %1997 = vmatprep.mubr.bf16.mxu1 %v5695_v21 }
 0x50c   :  { %1998 = vmatmul.mubr.bf16.gmra.mrb[124].mxu1 %v3867_v22 }
 0x50d   :  { %2007 = vmatprep.mubr.bf16.mxu1 %v5695_v21 }
 0x514   :  { %2008 = vmatmul.mubr.bf16.gmra.mrb[128].mxu1 %v3868_v53 }
 0x515   :  { %2355 = vmatprep.mubr.bf16.mxu1 %v4579_v50 }
 0x58f   :  { %v3591_v48 = vpop.f32.mrb[96].mxu1 }
 0x590   :  { %v3613_v45 = vpop.f32.mrb[128].mxu0  ;;  %v3592_v6 = vpop.f32.mrb[97].mxu1 }
 0x591   :  { %v3593_v44 = vadd.f32 %v3592_v6, %v3591_v48  ;;  %v3614_v25 = vpop.f32.mrb[129].mxu0  ;;  %v3594_v34 = vpop.f32.mrb[98].mxu1 }
 0x592   :  { %v3615_v37 = vadd.f32 %v3614_v25, %v3613_v45  ;;  %v3595_v9 = vpop.f32.mrb[99].mxu1  ;;  %v3616_v17 = vpop.f32.mrb[130].mxu0 }
 0x593   :  { %v3617_v5 = vpop.f32.mrb[131].mxu0 }
 0x594   :  { %v1740_v10 = vmul.f32 1.442695, %v3615_v37 }
 0x596   :  { %3981 = vpow2.f32 %v1740_v10 }
 0x5a0   :  { %v3982_v41 = vpop.eup %3981 }
 0x5a1   :  { %v1742_v36 = vmul.f32 %v3982_v41, %v1739_v12 }
 0x5a3   :  { %v1743_v52 = vadd.f32 %v3593_v44, %v1742_v36 }
 0x5a5   :  { %1744 = vst [vmem:[#allocation9] sm:$0xff] %v1743_v52 }
 0x5af   :  { %v1939_v50 = vpop.f32.mrb[100].mxu1 }
 0x5b0   :  { %v1941_v29 = vpop.f32.mrb[101].mxu1 }
 0x5b1   :  { %v1943_v20 = vpop.f32.mrb[102].mxu1 }
 0x5b2   :  { %v2018_v16 = vpack.c.bf16 %v1943_v20, %v1939_v50  ;;  %v1945_v1 = vpop.f32.mrb[103].mxu1 }
 0x5b3   :  { %v2019_v13 = vpack.c.bf16 %v1945_v1, %v1941_v29 }
 0x5b5   :  { %2034 = vmatprep.subr.bf16.mxu0 %v2019_v13 }
 0x5b6   :  { %2035 = vmatpush1.bf16.msra.mxu0 %v2018_v16 }
 0x5b7   :  { %v1949_v33 = vpop.f32.mrb[104].mxu1 }
 0x5b8   :  { %v1951_v22 = vpop.f32.mrb[105].mxu1 }
 0x5b9   :  { %v1953_v53 = vpop.f32.mrb[106].mxu1 }
 0x5ba   :  { %v2020_v48 = vpack.c.bf16 %v1953_v53, %v1949_v33  ;;  %v1955_v45 = vpop.f32.mrb[107].mxu1 }
 0x5bb   :  { %v2021_v6 = vpack.c.bf16 %v1955_v45, %v1951_v22 }
 0x5bd   :  { %2036 = vmatprep.subr.bf16.mxu0 %v2021_v6 }
 0x5be   :  { %2037 = vmatpush1.bf16.msra.mxu0 %v2020_v48 }
 0x5bf   :  { %v1959_v25 = vpop.f32.mrb[108].mxu1 }
 0x5c0   :  { %v1961_v34 = vpop.f32.mrb[109].mxu1 }
 0x5c1   :  { %v1963_v44 = vpop.f32.mrb[110].mxu1 }
 0x5c2   :  { %v2022_v37 = vpack.c.bf16 %v1963_v44, %v1959_v25  ;;  %v1965_v9 = vpop.f32.mrb[111].mxu1 }
 0x5c3   :  { %v2023_v17 = vpack.c.bf16 %v1965_v9, %v1961_v34 }
 0x5c5   :  { %2038 = vmatprep.subr.bf16.mxu0 %v2023_v17 }
 0x5c6   :  { %2039 = vmatpush1.bf16.msra.mxu0 %v2022_v37 }
 0x5c7   :  { %v1969_v5 = vpop.f32.mrb[112].mxu1 }
 0x5c8   :  { %v1971_v10 = vpop.f32.mrb[113].mxu1 }
 0x5c9   :  { %v1973_v12 = vpop.f32.mrb[114].mxu1 }
 0x5ca   :  { %v2024_v41 = vpack.c.bf16 %v1973_v12, %v1969_v5  ;;  %v1975_v36 = vpop.f32.mrb[115].mxu1 }
 0x5cb   :  { %v2025_v52 = vpack.c.bf16 %v1975_v36, %v1971_v10 }
 0x5cd   :  { %2040 = vmatprep.subr.bf16.mxu0 %v2025_v52 }
 0x5ce   :  { %2041 = vmatpush1.bf16.msra.mxu0 %v2024_v41 }
 0x5cf   :  { %v1979_v50 = vpop.f32.mrb[116].mxu1 }
 0x5d0   :  { %v1981_v29 = vpop.f32.mrb[117].mxu1 }
 0x5d1   :  { %v1983_v20 = vpop.f32.mrb[118].mxu1 }
 0x5d2   :  { %v2026_v16 = vpack.c.bf16 %v1983_v20, %v1979_v50  ;;  %v1985_v1 = vpop.f32.mrb[119].mxu1  ;;  %v4147_v50 = vld [vmem:[%s5629_s0] sm:$0xff]   ;;  %v4149_v20 = vld [vmem:[%s5629_s0 + $0x10] sm:$0xff]  }
 0x5d3   :  { %v2027_v13 = vpack.c.bf16 %v1985_v1, %v1981_v29  ;;  %v4148_v29 = vld [vmem:[%s5629_s0 + $0x8] sm:$0xff]   ;;  %v4151_v1 = vld [vmem:[%s5629_s0 + $0x20] sm:$0xff]  }
 0x5d5   :  { %2042 = vmatprep.subr.bf16.mxu0 %v2027_v13  ;;  %v4152_v13 = vld [vmem:[%s5629_s0 + $0x28] sm:$0xff]  }
 0x5d6   :  { %2043 = vmatpush1.bf16.msra.mxu0 %v2026_v16  ;;  %v4150_v16 = vld [vmem:[%s5629_s0 + $0x18] sm:$0xff]  }
 0x5d7   :  { %v1989_v33 = vpop.f32.mrb[120].mxu1 }
 0x5d8   :  { %v1991_v22 = vpop.f32.mrb[121].mxu1 }
 0x5d9   :  { %v1993_v53 = vpop.f32.mrb[122].mxu1 }
 0x5da   :  { %v2028_v48 = vpack.c.bf16 %v1993_v53, %v1989_v33  ;;  %v1995_v45 = vpop.f32.mrb[123].mxu1  ;;  %v4153_v33 = vld [vmem:[%s5629_s0 + $0x30] sm:$0xff]   ;;  %v4155_v53 = vld [vmem:[%s5629_s0 + $0x40] sm:$0xff]  }
 0x5db   :  { %v2029_v6 = vpack.c.bf16 %v1995_v45, %v1991_v22  ;;  %v4154_v22 = vld [vmem:[%s5629_s0 + $0x38] sm:$0xff]   ;;  %v4157_v45 = vld [vmem:[%s5629_s0 + $0x50] sm:$0xff]  }
 0x5dd   :  { %2044 = vmatprep.subr.bf16.mxu0 %v2029_v6  ;;  %v4158_v6 = vld [vmem:[%s5629_s0 + $0x58] sm:$0xff]  }
 0x5de   :  { %2045 = vmatpush1.bf16.msra.mxu0 %v2028_v48  ;;  %v4156_v48 = vld [vmem:[%s5629_s0 + $0x48] sm:$0xff]  }
 0x5df   :  { %v1999_v25 = vpop.f32.mrb[124].mxu1 }
 0x5e0   :  { %v2001_v34 = vpop.f32.mrb[125].mxu1 }
 0x5e1   :  { %v2003_v44 = vpop.f32.mrb[126].mxu1 }
 0x5e2   :  { %v2030_v37 = vpack.c.bf16 %v2003_v44, %v1999_v25  ;;  %v2005_v9 = vpop.f32.mrb[127].mxu1  ;;  %v4159_v25 = vld [vmem:[%s5629_s0 + $0x60] sm:$0xff]   ;;  %v4161_v44 = vld [vmem:[%s5629_s0 + $0x70] sm:$0xff]  }
 0x5e3   :  { %v2031_v17 = vpack.c.bf16 %v2005_v9, %v2001_v34  ;;  %v4160_v34 = vld [vmem:[%s5629_s0 + $0x68] sm:$0xff]   ;;  %v5696_v9 = vpack.c.bf16 %v4811_v8, %v4801_v35 }
 0x5e5   :  { %2046 = vmatprep.subr.bf16.mxu0 %v2031_v17 }
 0x5e6   :  { %2047 = vmatpush1.bf16.msra.mxu0 %v2030_v37  ;;  %v4162_v37 = vld [vmem:[%s5629_s0 + $0x78] sm:$0xff]  }
 0x5e7   :  { %v2009_v5 = vpop.f32.mrb[128].mxu1 }
 0x5e8   :  { %v2011_v10 = vpop.f32.mrb[129].mxu1 }
 0x5e9   :  { %v2013_v12 = vpop.f32.mrb[130].mxu1 }
 0x5ea   :  { %v2032_v41 = vpack.c.bf16 %v2013_v12, %v2009_v5  ;;  %v2015_v36 = vpop.f32.mrb[131].mxu1 }
 0x5eb   :  { %v2033_v52 = vpack.c.bf16 %v2015_v36, %v2011_v10 }
 0x5ed   :  { %2048 = vmatprep.subr.bf16.mxu0 %v2033_v52 }
 0x5ee   :  { %2049 = vmatpush1.bf16.msra.mxu0 %v2032_v41 }
 0x5f1   :  { %2067 = vmatmul.mubr.bf16.vlgmr.msra.gmra.mrb[132].mxu0 %v4147_v50 }
 0x5f2   :  { %2076 = vmatprep.mubr.bf16.mxu0 %v5695_v21 }
 0x5f9   :  { %2077 = vmatmul.mubr.bf16.gmra.mrb[136].mxu0 %v4148_v29 }
 0x5fa   :  { %2086 = vmatprep.mubr.bf16.mxu0 %v5695_v21 }
 0x601   :  { %2087 = vmatmul.mubr.bf16.gmra.mrb[140].mxu0 %v4149_v20 }
 0x602   :  { %2096 = vmatprep.mubr.bf16.mxu0 %v5695_v21 }
 0x609   :  { %2097 = vmatmul.mubr.bf16.gmra.mrb[144].mxu0 %v4150_v16 }
 0x60a   :  { %2106 = vmatprep.mubr.bf16.mxu0 %v5695_v21 }
 0x611   :  { %2107 = vmatmul.mubr.bf16.gmra.mrb[148].mxu0 %v4151_v1 }
 0x612   :  { %2116 = vmatprep.mubr.bf16.mxu0 %v5695_v21 }
 0x619   :  { %2117 = vmatmul.mubr.bf16.gmra.mrb[152].mxu0 %v4152_v13 }
 0x61a   :  { %2126 = vmatprep.mubr.bf16.mxu0 %v5695_v21 }
 0x621   :  { %2127 = vmatmul.mubr.bf16.gmra.mrb[156].mxu0 %v4153_v33 }
 0x622   :  { %2136 = vmatprep.mubr.bf16.mxu0 %v5695_v21 }
 0x629   :  { %2137 = vmatmul.mubr.bf16.gmra.mrb[160].mxu0 %v4154_v22 }
 0x62a   :  { %2146 = vmatprep.mubr.bf16.mxu0 %v5695_v21 }
 0x631   :  { %2147 = vmatmul.mubr.bf16.gmra.mrb[164].mxu0 %v4155_v53 }
 0x632   :  { %2156 = vmatprep.mubr.bf16.mxu0 %v5695_v21 }
 0x639   :  { %2157 = vmatmul.mubr.bf16.gmra.mrb[168].mxu0 %v4156_v48 }
 0x63a   :  { %2166 = vmatprep.mubr.bf16.mxu0 %v5695_v21 }
 0x641   :  { %2167 = vmatmul.mubr.bf16.gmra.mrb[172].mxu0 %v4157_v45 }
 0x642   :  { %2176 = vmatprep.mubr.bf16.mxu0 %v5695_v21 }
 0x649   :  { %2177 = vmatmul.mubr.bf16.gmra.mrb[176].mxu0 %v4158_v6 }
 0x64a   :  { %2186 = vmatprep.mubr.bf16.mxu0 %v5695_v21 }
 0x651   :  { %2187 = vmatmul.mubr.bf16.gmra.mrb[180].mxu0 %v4159_v25 }
 0x652   :  { %2196 = vmatprep.mubr.bf16.mxu0 %v5695_v21 }
 0x659   :  { %2197 = vmatmul.mubr.bf16.gmra.mrb[184].mxu0 %v4160_v34 }
 0x65a   :  { %2206 = vmatprep.mubr.bf16.mxu0 %v5695_v21 }
 0x661   :  { %2207 = vmatmul.mubr.bf16.gmra.mrb[188].mxu0 %v4161_v44 }
 0x662   :  { %2216 = vmatprep.mubr.bf16.mxu0 %v5695_v21 }
 0x669   :  { %2217 = vmatmul.mubr.bf16.gmra.mrb[192].mxu0 %v4162_v37 }
 0x66a   :  { %3668 = vmatprep.mubr.bf16.mxu0 %v5696_v9 }
 0x6c4   :  { %v2068_v17 = vpop.f32.mrb[132].mxu0 }
 0x6c5   :  { %v2070_v5 = vpop.f32.mrb[133].mxu0  ;;  %v2227_v12 = vmax.f32 %v2068_v17, 0.0 }
 0x6c6   :  { %v2072_v10 = vpop.f32.mrb[134].mxu0  ;;  %v2228_v52 = vmax.f32 %v2070_v5, 0.0 }
 0x6c7   :  { %v2229_v41 = vmax.f32 %v2072_v10, 0.0  ;;  %v2074_v36 = vpop.f32.mrb[135].mxu0 }
 0x6c8   :  { %v2230_v50 = vmax.f32 %v2074_v36, 0.0 }
 0x6c9   :  { %v2291_v29 = vpack.c.bf16 %v2229_v41, %v2227_v12 }
 0x6ca   :  { %v2292_v20 = vpack.c.bf16 %v2230_v50, %v2228_v52 }
 0x6cc   :  { %v2078_v21 = vpop.f32.mrb[136].mxu0  ;;  %2323 = vmatprep.subr.bf16.mxu1 %v2292_v20 }
 0x6cd   :  { %v2080_v16 = vpop.f32.mrb[137].mxu0  ;;  %2324 = vmatpush1.bf16.msra.mxu1 %v2291_v29  ;;  %v2231_v13 = vmax.f32 %v2078_v21, 0.0 }
 0x6ce   :  { %v2082_v1 = vpop.f32.mrb[138].mxu0  ;;  %v2232_v35 = vmax.f32 %v2080_v16, 0.0 }
 0x6cf   :  { %v2233_v33 = vmax.f32 %v2082_v1, 0.0  ;;  %v2084_v22 = vpop.f32.mrb[139].mxu0 }
 0x6d0   :  { %v2234_v8 = vmax.f32 %v2084_v22, 0.0 }
 0x6d1   :  { %v2293_v53 = vpack.c.bf16 %v2233_v33, %v2231_v13 }
 0x6d2   :  { %v2294_v48 = vpack.c.bf16 %v2234_v8, %v2232_v35 }
 0x6d4   :  { %v2088_v45 = vpop.f32.mrb[140].mxu0  ;;  %2325 = vmatprep.subr.bf16.mxu1 %v2294_v48 }
 0x6d5   :  { %v2090_v6 = vpop.f32.mrb[141].mxu0  ;;  %2326 = vmatpush1.bf16.msra.mxu1 %v2293_v53  ;;  %v2235_v34 = vmax.f32 %v2088_v45, 0.0 }
 0x6d6   :  { %v2092_v25 = vpop.f32.mrb[142].mxu0  ;;  %v2236_v9 = vmax.f32 %v2090_v6, 0.0 }
 0x6d7   :  { %v2237_v44 = vmax.f32 %v2092_v25, 0.0  ;;  %v2094_v37 = vpop.f32.mrb[143].mxu0 }
 0x6d8   :  { %v2238_v17 = vmax.f32 %v2094_v37, 0.0 }
 0x6d9   :  { %v2295_v5 = vpack.c.bf16 %v2237_v44, %v2235_v34 }
 0x6da   :  { %v2296_v10 = vpack.c.bf16 %v2238_v17, %v2236_v9 }
 0x6dc   :  { %v2098_v12 = vpop.f32.mrb[144].mxu0  ;;  %2327 = vmatprep.subr.bf16.mxu1 %v2296_v10 }
 0x6dd   :  { %v2100_v41 = vpop.f32.mrb[145].mxu0  ;;  %2328 = vmatpush1.bf16.msra.mxu1 %v2295_v5  ;;  %v2239_v52 = vmax.f32 %v2098_v12, 0.0 }
 0x6de   :  { %v2102_v36 = vpop.f32.mrb[146].mxu0  ;;  %v2240_v20 = vmax.f32 %v2100_v41, 0.0 }
 0x6df   :  { %v2241_v50 = vmax.f32 %v2102_v36, 0.0  ;;  %v2104_v29 = vpop.f32.mrb[147].mxu0 }
 0x6e0   :  { %v2242_v21 = vmax.f32 %v2104_v29, 0.0 }
 0x6e1   :  { %v2297_v16 = vpack.c.bf16 %v2241_v50, %v2239_v52 }
 0x6e2   :  { %v2298_v1 = vpack.c.bf16 %v2242_v21, %v2240_v20 }
 0x6e4   :  { %v2108_v13 = vpop.f32.mrb[148].mxu0  ;;  %2329 = vmatprep.subr.bf16.mxu1 %v2298_v1 }
 0x6e5   :  { %v2110_v33 = vpop.f32.mrb[149].mxu0  ;;  %2330 = vmatpush1.bf16.msra.mxu1 %v2297_v16  ;;  %v2243_v35 = vmax.f32 %v2108_v13, 0.0 }
 0x6e6   :  { %v2112_v22 = vpop.f32.mrb[150].mxu0  ;;  %v2244_v48 = vmax.f32 %v2110_v33, 0.0 }
 0x6e7   :  { %v2245_v8 = vmax.f32 %v2112_v22, 0.0  ;;  %v2114_v53 = vpop.f32.mrb[151].mxu0 }
 0x6e8   :  { %v2246_v45 = vmax.f32 %v2114_v53, 0.0 }
 0x6e9   :  { %v2299_v6 = vpack.c.bf16 %v2245_v8, %v2243_v35 }
 0x6ea   :  { %v2300_v25 = vpack.c.bf16 %v2246_v45, %v2244_v48 }
 0x6ec   :  { %v2118_v34 = vpop.f32.mrb[152].mxu0  ;;  %2331 = vmatprep.subr.bf16.mxu1 %v2300_v25 }
 0x6ed   :  { %v2120_v44 = vpop.f32.mrb[153].mxu0  ;;  %2332 = vmatpush1.bf16.msra.mxu1 %v2299_v6  ;;  %v2247_v9 = vmax.f32 %v2118_v34, 0.0 }
 0x6ee   :  { %v2122_v37 = vpop.f32.mrb[154].mxu0  ;;  %v2248_v10 = vmax.f32 %v2120_v44, 0.0 }
 0x6ef   :  { %v2249_v17 = vmax.f32 %v2122_v37, 0.0  ;;  %v2124_v5 = vpop.f32.mrb[155].mxu0 }
 0x6f0   :  { %v2250_v12 = vmax.f32 %v2124_v5, 0.0 }
 0x6f1   :  { %v2301_v41 = vpack.c.bf16 %v2249_v17, %v2247_v9 }
 0x6f2   :  { %v2302_v36 = vpack.c.bf16 %v2250_v12, %v2248_v10 }
 0x6f4   :  { %v2128_v52 = vpop.f32.mrb[156].mxu0  ;;  %2333 = vmatprep.subr.bf16.mxu1 %v2302_v36 }
 0x6f5   :  { %v2130_v50 = vpop.f32.mrb[157].mxu0  ;;  %2334 = vmatpush1.bf16.msra.mxu1 %v2301_v41  ;;  %v2251_v20 = vmax.f32 %v2128_v52, 0.0 }
 0x6f6   :  { %v2132_v29 = vpop.f32.mrb[158].mxu0  ;;  %v2252_v1 = vmax.f32 %v2130_v50, 0.0 }
 0x6f7   :  { %v2253_v21 = vmax.f32 %v2132_v29, 0.0  ;;  %v2134_v16 = vpop.f32.mrb[159].mxu0 }
 0x6f8   :  { %v2254_v13 = vmax.f32 %v2134_v16, 0.0 }
 0x6f9   :  { %v2303_v33 = vpack.c.bf16 %v2253_v21, %v2251_v20 }
 0x6fa   :  { %v2304_v22 = vpack.c.bf16 %v2254_v13, %v2252_v1 }
 0x6fc   :  { %v2138_v35 = vpop.f32.mrb[160].mxu0  ;;  %2335 = vmatprep.subr.bf16.mxu1 %v2304_v22 }
 0x6fd   :  { %v2140_v8 = vpop.f32.mrb[161].mxu0  ;;  %2336 = vmatpush1.bf16.msra.mxu1 %v2303_v33  ;;  %v2255_v48 = vmax.f32 %v2138_v35, 0.0 }
 0x6fe   :  { %v2142_v53 = vpop.f32.mrb[162].mxu0  ;;  %v2256_v25 = vmax.f32 %v2140_v8, 0.0 }
 0x6ff   :  { %v2257_v45 = vmax.f32 %v2142_v53, 0.0  ;;  %v2144_v6 = vpop.f32.mrb[163].mxu0 }
 0x700   :  { %v2258_v34 = vmax.f32 %v2144_v6, 0.0 }
 0x701   :  { %v2305_v44 = vpack.c.bf16 %v2257_v45, %v2255_v48 }
 0x702   :  { %v2306_v37 = vpack.c.bf16 %v2258_v34, %v2256_v25 }
 0x704   :  { %v2148_v9 = vpop.f32.mrb[164].mxu0  ;;  %2337 = vmatprep.subr.bf16.mxu1 %v2306_v37 }
 0x705   :  { %v2150_v17 = vpop.f32.mrb[165].mxu0  ;;  %2338 = vmatpush1.bf16.msra.mxu1 %v2305_v44  ;;  %v2259_v10 = vmax.f32 %v2148_v9, 0.0 }
 0x706   :  { %v2152_v5 = vpop.f32.mrb[166].mxu0  ;;  %v2260_v36 = vmax.f32 %v2150_v17, 0.0 }
 0x707   :  { %v2261_v12 = vmax.f32 %v2152_v5, 0.0  ;;  %v2154_v41 = vpop.f32.mrb[167].mxu0 }
 0x708   :  { %v2262_v52 = vmax.f32 %v2154_v41, 0.0 }
 0x709   :  { %v2307_v50 = vpack.c.bf16 %v2261_v12, %v2259_v10 }
 0x70a   :  { %v2308_v29 = vpack.c.bf16 %v2262_v52, %v2260_v36 }
 0x70c   :  { %v2158_v20 = vpop.f32.mrb[168].mxu0  ;;  %2339 = vmatprep.subr.bf16.mxu1 %v2308_v29 }
 0x70d   :  { %v2160_v21 = vpop.f32.mrb[169].mxu0  ;;  %2340 = vmatpush1.bf16.msra.mxu1 %v2307_v50  ;;  %v2263_v1 = vmax.f32 %v2158_v20, 0.0 }
 0x70e   :  { %v2162_v16 = vpop.f32.mrb[170].mxu0  ;;  %v2264_v22 = vmax.f32 %v2160_v21, 0.0 }
 0x70f   :  { %v2265_v13 = vmax.f32 %v2162_v16, 0.0  ;;  %v2164_v33 = vpop.f32.mrb[171].mxu0 }
 0x710   :  { %v2266_v35 = vmax.f32 %v2164_v33, 0.0 }
 0x711   :  { %v2309_v8 = vpack.c.bf16 %v2265_v13, %v2263_v1 }
 0x712   :  { %v2310_v53 = vpack.c.bf16 %v2266_v35, %v2264_v22 }
 0x714   :  { %v2168_v48 = vpop.f32.mrb[172].mxu0  ;;  %2341 = vmatprep.subr.bf16.mxu1 %v2310_v53 }
 0x715   :  { %v2170_v45 = vpop.f32.mrb[173].mxu0  ;;  %2342 = vmatpush1.bf16.msra.mxu1 %v2309_v8  ;;  %v2267_v25 = vmax.f32 %v2168_v48, 0.0 }
 0x716   :  { %v2172_v6 = vpop.f32.mrb[174].mxu0  ;;  %v2268_v37 = vmax.f32 %v2170_v45, 0.0 }
 0x717   :  { %v2269_v34 = vmax.f32 %v2172_v6, 0.0  ;;  %v2174_v44 = vpop.f32.mrb[175].mxu0 }
 0x718   :  { %v2270_v9 = vmax.f32 %v2174_v44, 0.0 }
 0x719   :  { %v2311_v17 = vpack.c.bf16 %v2269_v34, %v2267_v25 }
 0x71a   :  { %v2312_v5 = vpack.c.bf16 %v2270_v9, %v2268_v37 }
 0x71c   :  { %v2178_v10 = vpop.f32.mrb[176].mxu0  ;;  %2343 = vmatprep.subr.bf16.mxu1 %v2312_v5 }
 0x71d   :  { %v2180_v12 = vpop.f32.mrb[177].mxu0  ;;  %2344 = vmatpush1.bf16.msra.mxu1 %v2311_v17  ;;  %v2271_v36 = vmax.f32 %v2178_v10, 0.0 }
 0x71e   :  { %v2182_v41 = vpop.f32.mrb[178].mxu0  ;;  %v2272_v29 = vmax.f32 %v2180_v12, 0.0 }
 0x71f   :  { %v2273_v52 = vmax.f32 %v2182_v41, 0.0  ;;  %v2184_v50 = vpop.f32.mrb[179].mxu0 }
 0x720   :  { %v2274_v20 = vmax.f32 %v2184_v50, 0.0 }
 0x721   :  { %v2313_v21 = vpack.c.bf16 %v2273_v52, %v2271_v36 }
 0x722   :  { %v2314_v16 = vpack.c.bf16 %v2274_v20, %v2272_v29 }
 0x724   :  { %v2188_v1 = vpop.f32.mrb[180].mxu0  ;;  %2345 = vmatprep.subr.bf16.mxu1 %v2314_v16 }
 0x725   :  { %v2190_v13 = vpop.f32.mrb[181].mxu0  ;;  %2346 = vmatpush1.bf16.msra.mxu1 %v2313_v21  ;;  %v2275_v22 = vmax.f32 %v2188_v1, 0.0 }
 0x726   :  { %v2192_v33 = vpop.f32.mrb[182].mxu0  ;;  %v2276_v53 = vmax.f32 %v2190_v13, 0.0 }
 0x727   :  { %v2277_v35 = vmax.f32 %v2192_v33, 0.0  ;;  %v2194_v8 = vpop.f32.mrb[183].mxu0 }
 0x728   :  { %v2278_v48 = vmax.f32 %v2194_v8, 0.0 }
 0x729   :  { %v2315_v45 = vpack.c.bf16 %v2277_v35, %v2275_v22 }
 0x72a   :  { %v2316_v6 = vpack.c.bf16 %v2278_v48, %v2276_v53 }
 0x72c   :  { %v2198_v25 = vpop.f32.mrb[184].mxu0  ;;  %2347 = vmatprep.subr.bf16.mxu1 %v2316_v6 }
 0x72d   :  { %v2200_v34 = vpop.f32.mrb[185].mxu0  ;;  %2348 = vmatpush1.bf16.msra.mxu1 %v2315_v45  ;;  %v2279_v37 = vmax.f32 %v2198_v25, 0.0 }
 0x72e   :  { %v2202_v44 = vpop.f32.mrb[186].mxu0  ;;  %v2280_v5 = vmax.f32 %v2200_v34, 0.0 }
 0x72f   :  { %v2281_v9 = vmax.f32 %v2202_v44, 0.0  ;;  %v2204_v17 = vpop.f32.mrb[187].mxu0 }
 0x730   :  { %v2282_v10 = vmax.f32 %v2204_v17, 0.0  ;;  %v3874_v17 = vld [vmem:[%s5635_s6 + $0x14] ss:$8 sps:$4 sm:$0xff]  }
 0x731   :  { %v2317_v12 = vpack.c.bf16 %v2281_v9, %v2279_v37  ;;  %v3871_v37 = vld [vmem:[%s5635_s6 + $0x4] ss:$8 sps:$4 sm:$0xff]   ;;  %v3869_v9 = vld [vmem:[%s5635_s6] ss:$8 sps:$4 sm:$0xff]  }
 0x732   :  { %v2318_v41 = vpack.c.bf16 %v2282_v10, %v2280_v5  ;;  %v3872_v5 = vld [vmem:[%s5635_s6 + $0x10] ss:$8 sps:$4 sm:$0xff]   ;;  %v3877_v10 = vld [vmem:[%s5635_s6 + $0x24] ss:$8 sps:$4 sm:$0xff]  }
 0x734   :  { %v2208_v36 = vpop.f32.mrb[188].mxu0  ;;  %2349 = vmatprep.subr.bf16.mxu1 %v2318_v41  ;;  %v3883_v41 = vld [vmem:[%s5635_s6 + $0x44] ss:$8 sps:$4 sm:$0xff]  }
 0x735   :  { %v2210_v52 = vpop.f32.mrb[189].mxu0  ;;  %2350 = vmatpush1.bf16.msra.mxu1 %v2317_v12  ;;  %v2283_v29 = vmax.f32 %v2208_v36, 0.0  ;;  %v3875_v12 = vld [vmem:[%s5635_s6 + $0x20] ss:$8 sps:$4 sm:$0xff]  }
 0x736   :  { %v2212_v50 = vpop.f32.mrb[190].mxu0  ;;  %v2284_v16 = vmax.f32 %v2210_v52, 0.0  ;;  %v3881_v36 = vld [vmem:[%s5635_s6 + $0x40] ss:$8 sps:$4 sm:$0xff]   ;;  %v3889_v52 = vld [vmem:[%s5635_s6 + $0x64] ss:$8 sps:$4 sm:$0xff]  }
 0x737   :  { %v2285_v20 = vmax.f32 %v2212_v50, 0.0  ;;  %v2214_v21 = vpop.f32.mrb[191].mxu0  ;;  %v3887_v50 = vld [vmem:[%s5635_s6 + $0x60] ss:$8 sps:$4 sm:$0xff]  }
 0x738   :  { %v2286_v1 = vmax.f32 %v2214_v21, 0.0  ;;  %v3901_v21 = vld [vmem:[%s5635_s6 + $0xa4] ss:$8 sps:$4 sm:$0xff]  }
 0x739   :  { %v2319_v13 = vpack.c.bf16 %v2285_v20, %v2283_v29  ;;  %v3895_v29 = vld [vmem:[%s5635_s6 + $0x84] ss:$8 sps:$4 sm:$0xff]   ;;  %v3893_v20 = vld [vmem:[%s5635_s6 + $0x80] ss:$8 sps:$4 sm:$0xff]  }
 0x73a   :  { %v2320_v33 = vpack.c.bf16 %v2286_v1, %v2284_v16  ;;  %v3899_v16 = vld [vmem:[%s5635_s6 + $0xa0] ss:$8 sps:$4 sm:$0xff]   ;;  %v3902_v1 = vld [vmem:[%s5635_s6 + $0xb0] ss:$8 sps:$4 sm:$0xff]  }
 0x73c   :  { %v2218_v22 = vpop.f32.mrb[192].mxu0  ;;  %2351 = vmatprep.subr.bf16.mxu1 %v2320_v33  ;;  %v3905_v33 = vld [vmem:[%s5635_s6 + $0xc0] ss:$8 sps:$4 sm:$0xff]  }
 0x73d   :  { %v2220_v35 = vpop.f32.mrb[193].mxu0  ;;  %2352 = vmatpush1.bf16.msra.mxu1 %v2319_v13  ;;  %v2287_v53 = vmax.f32 %v2218_v22, 0.0  ;;  %v3907_v13 = vld [vmem:[%s5635_s6 + $0xc4] ss:$8 sps:$4 sm:$0xff]   ;;  %v5698_v22 = vld [vmem:[#allocation14_spill] sm:$0xff] }
 0x73e   :  { %v2222_v8 = vpop.f32.mrb[194].mxu0  ;;  %v2288_v6 = vmax.f32 %v2220_v35, 0.0  ;;  %v5699_v35 = vld [vmem:[#allocation15_spill] sm:$0xff] }
 0x73f   :  { %v2289_v48 = vmax.f32 %v2222_v8, 0.0  ;;  %v2224_v45 = vpop.f32.mrb[195].mxu0  ;;  %v3908_v8 = vld [vmem:[%s5635_s6 + $0xd0] ss:$8 sps:$4 sm:$0xff]  }
 0x740   :  { %v2290_v25 = vmax.f32 %v2224_v45, 0.0  ;;  %v5700_v45 = vld [vmem:[#allocation16_spill] sm:$0xff] }
 0x741   :  { %v2321_v34 = vpack.c.bf16 %v2289_v48, %v2287_v53  ;;  %v3913_v53 = vld [vmem:[%s5635_s6 + $0xe4] ss:$8 sps:$4 sm:$0xff]   ;;  %v3911_v48 = vld [vmem:[%s5635_s6 + $0xe0] ss:$8 sps:$4 sm:$0xff]  }
 0x742   :  { %v2322_v44 = vpack.c.bf16 %v2290_v25, %v2288_v6  ;;  %v3916_v6 = vld [vmem:[%s5635_s6 + $0xf4] ss:$8 sps:$4 sm:$0xff]   ;;  %v3914_v25 = vld [vmem:[%s5635_s6 + $0xf0] ss:$8 sps:$4 sm:$0xff]  }
 0x744   :  { %2353 = vmatprep.subr.bf16.mxu1 %v2322_v44 }
 0x745   :  { %2354 = vmatpush1.bf16.msra.mxu1 %v2321_v34 }
 0x746   :  { %2644 = vmatprep.subr.bf16.mxu1 %v3871_v37 }
 0x748   :  { %2356 = vmatmul.mubr.bf16.vlgmr.msra.gmra.mrb[132].mxu1 %v4582_v54  ;;  %v3880_v54 = vld [vmem:[%s5635_s6 + $0x34] ss:$8 sps:$4 sm:$0xff]  }
 0x749   :  { %2365 = vmatprep.mubr.bf16.mxu1 %v4584_v55  ;;  %2645 = vmatpush1.bf16.msra.mxu1 %v3869_v9  ;;  %v3878_v55 = vld [vmem:[%s5635_s6 + $0x30] ss:$8 sps:$4 sm:$0xff]  }
 0x74a   :  { %2646 = vmatprep.subr.bf16.mxu1 %v3874_v17 }
 0x74d   :  { %2647 = vmatpush1.bf16.msra.mxu1 %v3872_v5 }
 0x74e   :  { %2648 = vmatprep.subr.bf16.mxu1 %v3877_v10 }
 0x750   :  { %2366 = vmatmul.mubr.bf16.gmra.mrb[136].mxu1 %v4588_v56  ;;  %v3886_v56 = vld [vmem:[%s5635_s6 + $0x54] ss:$8 sps:$4 sm:$0xff]  }
 0x751   :  { %2375 = vmatprep.mubr.bf16.mxu1 %v4590_v57  ;;  %2649 = vmatpush1.bf16.msra.mxu1 %v3875_v12  ;;  %v3884_v57 = vld [vmem:[%s5635_s6 + $0x50] ss:$8 sps:$4 sm:$0xff]  }
 0x752   :  { %2650 = vmatprep.subr.bf16.mxu1 %v3880_v54 }
 0x755   :  { %2651 = vmatpush1.bf16.msra.mxu1 %v3878_v55 }
 0x756   :  { %2652 = vmatprep.subr.bf16.mxu1 %v3883_v41 }
 0x758   :  { %2376 = vmatmul.mubr.bf16.gmra.mrb[140].mxu1 %v4594_v58  ;;  %v3892_v58 = vld [vmem:[%s5635_s6 + $0x74] ss:$8 sps:$4 sm:$0xff]  }
 0x759   :  { %2385 = vmatprep.mubr.bf16.mxu1 %v4596_v59  ;;  %2653 = vmatpush1.bf16.msra.mxu1 %v3881_v36  ;;  %v3890_v59 = vld [vmem:[%s5635_s6 + $0x70] ss:$8 sps:$4 sm:$0xff]  }
 0x75a   :  { %2654 = vmatprep.subr.bf16.mxu1 %v3886_v56 }
 0x75d   :  { %2655 = vmatpush1.bf16.msra.mxu1 %v3884_v57 }
 0x75e   :  { %2656 = vmatprep.subr.bf16.mxu1 %v3889_v52 }
 0x760   :  { %2386 = vmatmul.mubr.bf16.gmra.mrb[144].mxu1 %v4600_v60  ;;  %v3898_v60 = vld [vmem:[%s5635_s6 + $0x94] ss:$8 sps:$4 sm:$0xff]  }
 0x761   :  { %2395 = vmatprep.mubr.bf16.mxu1 %v4602_v61  ;;  %2657 = vmatpush1.bf16.msra.mxu1 %v3887_v50  ;;  %v3896_v61 = vld [vmem:[%s5635_s6 + $0x90] ss:$8 sps:$4 sm:$0xff]  }
 0x762   :  { %2658 = vmatprep.subr.bf16.mxu1 %v3892_v58 }
 0x765   :  { %2659 = vmatpush1.bf16.msra.mxu1 %v3890_v59 }
 0x766   :  { %2660 = vmatprep.subr.bf16.mxu1 %v3895_v29 }
 0x768   :  { %2396 = vmatmul.mubr.bf16.gmra.mrb[148].mxu1 %v4606_v62  ;;  %v3904_v62 = vld [vmem:[%s5635_s6 + $0xb4] ss:$8 sps:$4 sm:$0xff]  }
 0x769   :  { %2405 = vmatprep.mubr.bf16.mxu1 %v4608_v63  ;;  %2661 = vmatpush1.bf16.msra.mxu1 %v3893_v20  ;;  %v5697_v63 = vld [vmem:[#allocation13_spill] sm:$0xff] }
 0x76a   :  { %2662 = vmatprep.subr.bf16.mxu1 %v3898_v60 }
 0x76d   :  { %2663 = vmatpush1.bf16.msra.mxu1 %v3896_v61 }
 0x76e   :  { %2664 = vmatprep.subr.bf16.mxu1 %v3901_v21 }
 0x770   :  { %2406 = vmatmul.mubr.bf16.gmra.mrb[152].mxu1 %v4612_v0  ;;  %v3910_v0 = vld [vmem:[%s5635_s6 + $0xd4] ss:$8 sps:$4 sm:$0xff]  }
 0x771   :  { %2415 = vmatprep.mubr.bf16.mxu1 %v5697_v63  ;;  %2665 = vmatpush1.bf16.msra.mxu1 %v3899_v16 }
 0x772   :  { %2666 = vmatprep.subr.bf16.mxu1 %v3904_v62 }
 0x775   :  { %2667 = vmatpush1.bf16.msra.mxu1 %v3902_v1 }
 0x776   :  { %2668 = vmatprep.subr.bf16.mxu1 %v3907_v13 }
 0x778   :  { %2416 = vmatmul.mubr.bf16.gmra.mrb[156].mxu1 %v5698_v22 }
 0x779   :  { %2425 = vmatprep.mubr.bf16.mxu1 %v5699_v35  ;;  %2669 = vmatpush1.bf16.msra.mxu1 %v3905_v33 }
 0x77a   :  { %2670 = vmatprep.subr.bf16.mxu1 %v3910_v0 }
 0x77d   :  { %2671 = vmatpush1.bf16.msra.mxu1 %v3908_v8 }
 0x77e   :  { %2672 = vmatprep.subr.bf16.mxu1 %v3913_v53 }
 0x780   :  { %2426 = vmatmul.mubr.bf16.gmra.mrb[160].mxu1 %v5700_v45 }
 0x781   :  { %2673 = vmatpush1.bf16.msra.mxu1 %v3911_v48 }
 0x782   :  { %2674 = vmatprep.subr.bf16.mxu1 %v3916_v6 }
 0x785   :  { %2675 = vmatpush1.bf16.msra.mxu1 %v3914_v25 }
 0x81b   :  { %v2357_v34 = vpop.f32.mrb[132].mxu1 }
 0x81c   :  { %v2359_v44 = vpop.f32.mrb[133].mxu1 }
 0x81d   :  { %v2361_v37 = vpop.f32.mrb[134].mxu1 }
 0x81e   :  { %v2468_v9 = vpack.c.bf16 %v2361_v37, %v2357_v34  ;;  %v2363_v17 = vpop.f32.mrb[135].mxu1 }
 0x81f   :  { %v2469_v5 = vpack.c.bf16 %v2363_v17, %v2359_v44 }
 0x821   :  { %2676 = vmatprep.mubr.bf16.mxu1 %v2469_v5 }
 0x822   :  { %2677 = vmatmul.mubr.bf16.vlgmr.msra.gmra.mrb[164].mxu1 %v2468_v9 }
 0x823   :  { %v2367_v10 = vpop.f32.mrb[136].mxu1 }
 0x824   :  { %v2369_v12 = vpop.f32.mrb[137].mxu1 }
 0x825   :  { %v2371_v54 = vpop.f32.mrb[138].mxu1 }
 0x826   :  { %v2470_v55 = vpack.c.bf16 %v2371_v54, %v2367_v10  ;;  %v2373_v41 = vpop.f32.mrb[139].mxu1 }
 0x827   :  { %v2471_v36 = vpack.c.bf16 %v2373_v41, %v2369_v12  ;;  %v4281_v41 = vmov 0.0  }
 0x828   :  { %3700 = vmatprep.subr.bf16.mxu1 %v4281_v41 }
 0x829   :  { %2686 = vmatprep.mubr.bf16.mxu1 %v2471_v36 }
 0x82a   :  { %2687 = vmatmul.mubr.bf16.gmra.mrb[168].mxu1 %v2470_v55 }
 0x82b   :  { %v2377_v56 = vpop.f32.mrb[140].mxu1 }
 0x82c   :  { %v2379_v57 = vpop.f32.mrb[141].mxu1 }
 0x82d   :  { %v2381_v52 = vpop.f32.mrb[142].mxu1 }
 0x82e   :  { %v2472_v50 = vpack.c.bf16 %v2381_v52, %v2377_v56  ;;  %v2383_v58 = vpop.f32.mrb[143].mxu1 }
 0x82f   :  { %v2473_v59 = vpack.c.bf16 %v2383_v58, %v2379_v57 }
 0x831   :  { %2696 = vmatprep.mubr.bf16.mxu1 %v2473_v59  ;;  %v2853_v59 = vlaneseq }
 0x832   :  { %2697 = vmatmul.mubr.bf16.gmra.mrb[172].mxu1 %v2472_v50 }
 0x833   :  { %v2387_v29 = vpop.f32.mrb[144].mxu1 }
 0x834   :  { %v2389_v20 = vpop.f32.mrb[145].mxu1 }
 0x835   :  { %v2391_v60 = vpop.f32.mrb[146].mxu1 }
 0x836   :  { %v2474_v61 = vpack.c.bf16 %v2391_v60, %v2387_v29  ;;  %v2393_v21 = vpop.f32.mrb[147].mxu1 }
 0x837   :  { %v2475_v16 = vpack.c.bf16 %v2393_v21, %v2389_v20 }
 0x839   :  { %2706 = vmatprep.mubr.bf16.mxu1 %v2475_v16  ;;  %v2854_v16 = vand.u32 127, %v2853_v59 }
 0x83a   :  { %2707 = vmatmul.mubr.bf16.gmra.mrb[176].mxu1 %v2474_v61 }
 0x83b   :  { %v2397_v62 = vpop.f32.mrb[148].mxu1  ;;  %vm2855_vm1 = vcmp.ge.s32.totalorder %v2854_v16, 127  ;;  %v2761_v16 = vld [vmem:[%s5637_s8 + $0x20] sm:$0xff] }
 0x83c   :  { %v2399_v63 = vpop.f32.mrb[149].mxu1 }
 0x83d   :  { %v2401_v1 = vpop.f32.mrb[150].mxu1 }
 0x83e   :  { %v2476_v13 = vpack.c.bf16 %v2401_v1, %v2397_v62  ;;  %v2403_v33 = vpop.f32.mrb[151].mxu1 }
 0x83f   :  { %v2477_v0 = vpack.c.bf16 %v2403_v33, %v2399_v63  ;;  %v2757_v63 = vld [vmem:[%s5637_s8] sm:$0xff] }
 0x841   :  { %2716 = vmatprep.mubr.bf16.mxu1 %v2477_v0 }
 0x842   :  { %2717 = vmatmul.mubr.bf16.gmra.mrb[180].mxu1 %v2476_v13  ;;  %v2758_v13 = vld [vmem:[%s5637_s8 + $0x8] sm:$0xff] }
 0x843   :  { %v2407_v22 = vpop.f32.mrb[152].mxu1 }
 0x844   :  { %v2409_v35 = vpop.f32.mrb[153].mxu1 }
 0x845   :  { %v2411_v8 = vpop.f32.mrb[154].mxu1 }
 0x846   :  { %v2478_v53 = vpack.c.bf16 %v2411_v8, %v2407_v22  ;;  %v2413_v48 = vpop.f32.mrb[155].mxu1 }
 0x847   :  { %v2479_v45 = vpack.c.bf16 %v2413_v48, %v2409_v35 }
 0x849   :  { %2726 = vmatprep.mubr.bf16.mxu1 %v2479_v45 }
 0x84a   :  { %2727 = vmatmul.mubr.bf16.gmra.mrb[184].mxu1 %v2478_v53 }
 0x84b   :  { %v2417_v6 = vpop.f32.mrb[156].mxu1 }
 0x84c   :  { %v2419_v25 = vpop.f32.mrb[157].mxu1 }
 0x84d   :  { %v2421_v34 = vpop.f32.mrb[158].mxu1 }
 0x84e   :  { %v2480_v44 = vpack.c.bf16 %v2421_v34, %v2417_v6  ;;  %v2423_v37 = vpop.f32.mrb[159].mxu1  ;;  %v4283_v6 = vmov 1.0  }
 0x84f   :  { %v2481_v9 = vpack.c.bf16 %v2423_v37, %v2419_v25  ;;  %v5434_v25 = vsel %vm2855_vm1, -1.0, %v4283_v6 }
 0x851   :  { %2736 = vmatprep.mubr.bf16.mxu1 %v2481_v9  ;;  %v2759_v9 = vld [vmem:[%s5637_s8 + $0x10] sm:$0xff] }
 0x852   :  { %2737 = vmatmul.mubr.bf16.gmra.mrb[188].mxu1 %v2480_v44 }
 0x853   :  { %v2427_v17 = vpop.f32.mrb[160].mxu1 }
 0x854   :  { %v2429_v5 = vpop.f32.mrb[161].mxu1 }
 0x855   :  { %v2431_v10 = vpop.f32.mrb[162].mxu1 }
 0x856   :  { %v2482_v12 = vpack.c.bf16 %v2431_v10, %v2427_v17  ;;  %v2433_v54 = vpop.f32.mrb[163].mxu1 }
 0x857   :  { %v2483_v55 = vpack.c.bf16 %v2433_v54, %v2429_v5 }
 0x859   :  { %2746 = vmatprep.mubr.bf16.mxu1 %v2483_v55 }
 0x85a   :  { %2747 = vmatmul.mubr.bf16.gmra.mrb[192].mxu1 %v2482_v12  ;;  %v2760_v12 = vld [vmem:[%s5637_s8 + $0x18] sm:$0xff] }
 0x85b   :  { %3716 = vmatprep.mubr.msk.bf16.mxu1 %vm4282_vm0, %v4281_v41 }
 0x8f5   :  { %v2678_v36 = vpop.f32.mrb[164].mxu1 }
 0x8f6   :  { %v2680_v56 = vpop.f32.mrb[165].mxu1 }
 0x8f7   :  { %v2773_v57 = vmul.f32 1.442695, %v2680_v56  ;;  %v2682_v52 = vpop.f32.mrb[166].mxu1 }
 0x8f8   :  { %v2684_v50 = vpop.f32.mrb[167].mxu1 }
 0x8f9   :  { %3983 = vpow2.f32 %v2773_v57  ;;  %v2775_v58 = vmul.f32 1.442695, %v2684_v50 }
 0x8fb   :  { %3985 = vpow2.f32 %v2775_v58 }
 0x8fd   :  { %v2688_v29 = vpop.f32.mrb[168].mxu1 }
 0x8fe   :  { %v2690_v20 = vpop.f32.mrb[169].mxu1 }
 0x8ff   :  { %v2777_v60 = vmul.f32 1.442695, %v2690_v20  ;;  %v2692_v61 = vpop.f32.mrb[170].mxu1 }
 0x900   :  { %v2694_v21 = vpop.f32.mrb[171].mxu1 }
 0x901   :  { %3987 = vpow2.f32 %v2777_v60  ;;  %v2779_v62 = vmul.f32 1.442695, %v2694_v21 }
 0x903   :  { %v3984_v1 = vpop.eup %3983  ;;  %3989 = vpow2.f32 %v2779_v62 }
 0x904   :  { %v2805_v33 = vmul.f32 %v3984_v1, %v2757_v63  ;;  %v2762_v1 = vld [vmem:[%s5637_s8 + $0x28] sm:$0xff] }
 0x905   :  { %v3986_v0 = vpop.eup %3985  ;;  %v2698_v22 = vpop.f32.mrb[172].mxu1 }
 0x906   :  { %v2700_v35 = vpop.f32.mrb[173].mxu1  ;;  %v2806_v8 = vmul.f32 %v3986_v0, %v2758_v13  ;;  %v2821_v53 = vadd.f32 %v2805_v33, %v2678_v36 }
 0x907   :  { %v2781_v48 = vmul.f32 1.442695, %v2700_v35  ;;  %v2702_v45 = vpop.f32.mrb[174].mxu1 }
 0x908   :  { %v2704_v34 = vpop.f32.mrb[175].mxu1  ;;  %v2822_v44 = vadd.f32 %v2806_v8, %v2682_v52  ;;  %2837 = vst [vmem:[#allocation7] sm:$0xff] %v2821_v53  ;;  %v2857_v17 = vmul.f32 %v5434_v25, %v2821_v53 }
 0x909   :  { %3991 = vpow2.f32 %v2781_v48  ;;  %v2783_v37 = vmul.f32 1.442695, %v2704_v34 }
 0x90a   :  { %2838 = vst [vmem:[#allocation7 + $0x8] sm:$0xff] %v2822_v44  ;;  %v2858_v5 = vmul.f32 %v5434_v25, %v2822_v44 }
 0x90b   :  { %v3988_v10 = vpop.eup %3987  ;;  %3993 = vpow2.f32 %v2783_v37 }
 0x90c   :  { %v2889_v54 = vpack.c.bf16 %v2858_v5, %v2857_v17  ;;  %v2807_v55 = vmul.f32 %v3988_v10, %v2759_v9  ;;  %v2763_v9 = vld [vmem:[%s5637_s8 + $0x30] sm:$0xff]  ;;  %v2764_v10 = vld [vmem:[%s5637_s8 + $0x38] sm:$0xff] }
 0x90d   :  { %v3990_v36 = vpop.eup %3989  ;;  %v2708_v56 = vpop.f32.mrb[176].mxu1 }
 0x90e   :  { %v2710_v57 = vpop.f32.mrb[177].mxu1  ;;  %3652 = vmatprep.subr.bf16.mxu0 %v2889_v54  ;;  %3701 = vmatpush3.bf16.xpose.msra.mxu1 %v2889_v54  ;;  %v2808_v52 = vmul.f32 %v3990_v36, %v2760_v12  ;;  %v2823_v50 = vadd.f32 %v2807_v55, %v2688_v29 }
 0x90f   :  { %v2785_v58 = vmul.f32 1.442695, %v2710_v57  ;;  %v2712_v59 = vpop.f32.mrb[178].mxu1  ;;  %3653 = vmatpush3.bf16.xpose.msra.mxu0 %v2889_v54  ;;  %3702 = vmatprep.subr.bf16.mxu1 %v4281_v41 }
 0x910   :  { %v2714_v20 = vpop.f32.mrb[179].mxu1  ;;  %v2824_v60 = vadd.f32 %v2808_v52, %v2692_v61  ;;  %2839 = vst [vmem:[#allocation7 + $0x10] sm:$0xff] %v2823_v50  ;;  %v2859_v62 = vmul.f32 %v5434_v25, %v2823_v50 }
 0x911   :  { %3995 = vpow2.f32 %v2785_v58  ;;  %v2787_v21 = vmul.f32 1.442695, %v2714_v20 }
 0x912   :  { %2840 = vst [vmem:[#allocation7 + $0x18] sm:$0xff] %v2824_v60  ;;  %v2860_v63 = vmul.f32 %v5434_v25, %v2824_v60 }
 0x913   :  { %v3992_v29 = vpop.eup %3991  ;;  %3997 = vpow2.f32 %v2787_v21 }
 0x914   :  { %v2890_v13 = vpack.c.bf16 %v2860_v63, %v2859_v62  ;;  %v2809_v61 = vmul.f32 %v3992_v29, %v2761_v16  ;;  %v2765_v16 = vld [vmem:[%s5637_s8 + $0x40] sm:$0xff]  ;;  %v2766_v29 = vld [vmem:[%s5637_s8 + $0x48] sm:$0xff] }
 0x915   :  { %v3994_v33 = vpop.eup %3993  ;;  %v2718_v0 = vpop.f32.mrb[180].mxu1 }
 0x916   :  { %v2720_v35 = vpop.f32.mrb[181].mxu1  ;;  %3654 = vmatprep.subr.bf16.mxu0 %v2890_v13  ;;  %3703 = vmatpush3.bf16.xpose.msra.mxu1 %v2890_v13  ;;  %v2810_v8 = vmul.f32 %v3994_v33, %v2762_v1  ;;  %v2825_v53 = vadd.f32 %v2809_v61, %v2698_v22 }
 0x917   :  { %v2789_v48 = vmul.f32 1.442695, %v2720_v35  ;;  %v2722_v6 = vpop.f32.mrb[182].mxu1  ;;  %3655 = vmatpush3.bf16.xpose.msra.mxu0 %v2890_v13  ;;  %3704 = vmatprep.subr.bf16.mxu1 %v4281_v41 }
 0x918   :  { %v2724_v34 = vpop.f32.mrb[183].mxu1  ;;  %v2826_v44 = vadd.f32 %v2810_v8, %v2702_v45  ;;  %2841 = vst [vmem:[#allocation7 + $0x20] sm:$0xff] %v2825_v53  ;;  %v2861_v17 = vmul.f32 %v5434_v25, %v2825_v53 }
 0x919   :  { %3999 = vpow2.f32 %v2789_v48  ;;  %v2791_v37 = vmul.f32 1.442695, %v2724_v34 }
 0x91a   :  { %2842 = vst [vmem:[#allocation7 + $0x28] sm:$0xff] %v2826_v44  ;;  %v2862_v5 = vmul.f32 %v5434_v25, %v2826_v44 }
 0x91b   :  { %v3996_v22 = vpop.eup %3995  ;;  %4001 = vpow2.f32 %v2791_v37 }
 0x91c   :  { %v2891_v12 = vpack.c.bf16 %v2862_v5, %v2861_v17  ;;  %v2811_v45 = vmul.f32 %v3996_v22, %v2763_v9  ;;  %v2767_v9 = vld [vmem:[%s5637_s8 + $0x50] sm:$0xff]  ;;  %v2768_v22 = vld [vmem:[%s5637_s8 + $0x58] sm:$0xff] }
 0x91d   :  { %v3998_v54 = vpop.eup %3997  ;;  %v2728_v55 = vpop.f32.mrb[184].mxu1 }
 0x91e   :  { %v2730_v36 = vpop.f32.mrb[185].mxu1  ;;  %3656 = vmatprep.subr.bf16.mxu0 %v2891_v12  ;;  %3705 = vmatpush3.bf16.xpose.msra.mxu1 %v2891_v12  ;;  %v2812_v57 = vmul.f32 %v3998_v54, %v2764_v10  ;;  %v2827_v52 = vadd.f32 %v2811_v45, %v2708_v56 }
 0x91f   :  { %v2793_v50 = vmul.f32 1.442695, %v2730_v36  ;;  %v2732_v58 = vpop.f32.mrb[186].mxu1  ;;  %3657 = vmatpush3.bf16.xpose.msra.mxu0 %v2891_v12  ;;  %3706 = vmatprep.subr.bf16.mxu1 %v4281_v41 }
 0x920   :  { %v2734_v20 = vpop.f32.mrb[187].mxu1  ;;  %v2828_v60 = vadd.f32 %v2812_v57, %v2712_v59  ;;  %2843 = vst [vmem:[#allocation7 + $0x30] sm:$0xff] %v2827_v52  ;;  %v2863_v62 = vmul.f32 %v5434_v25, %v2827_v52 }
 0x921   :  { %4003 = vpow2.f32 %v2793_v50  ;;  %v2795_v21 = vmul.f32 1.442695, %v2734_v20 }
 0x922   :  { %2844 = vst [vmem:[#allocation7 + $0x38] sm:$0xff] %v2828_v60  ;;  %v2864_v63 = vmul.f32 %v5434_v25, %v2828_v60 }
 0x923   :  { %v4000_v56 = vpop.eup %3999  ;;  %4005 = vpow2.f32 %v2795_v21 }
 0x924   :  { %v2892_v1 = vpack.c.bf16 %v2864_v63, %v2863_v62  ;;  %v2813_v59 = vmul.f32 %v4000_v56, %v2765_v16  ;;  %v2769_v16 = vld [vmem:[%s5637_s8 + $0x60] sm:$0xff]  ;;  %v2770_v56 = vld [vmem:[%s5637_s8 + $0x68] sm:$0xff] }
 0x925   :  { %v4002_v13 = vpop.eup %4001  ;;  %v2738_v61 = vpop.f32.mrb[188].mxu1 }
 0x926   :  { %v2740_v33 = vpop.f32.mrb[189].mxu1  ;;  %3658 = vmatprep.subr.bf16.mxu0 %v2892_v1  ;;  %3707 = vmatpush3.bf16.xpose.msra.mxu1 %v2892_v1  ;;  %v2814_v35 = vmul.f32 %v4002_v13, %v2766_v29  ;;  %v2829_v8 = vadd.f32 %v2813_v59, %v2718_v0 }
 0x927   :  { %v2797_v53 = vmul.f32 1.442695, %v2740_v33  ;;  %v2742_v48 = vpop.f32.mrb[190].mxu1  ;;  %3659 = vmatpush3.bf16.xpose.msra.mxu0 %v2892_v1  ;;  %3708 = vmatprep.subr.bf16.mxu1 %v4281_v41 }
 0x928   :  { %v2744_v34 = vpop.f32.mrb[191].mxu1  ;;  %v2830_v44 = vadd.f32 %v2814_v35, %v2722_v6  ;;  %2845 = vst [vmem:[#allocation7 + $0x40] sm:$0xff] %v2829_v8  ;;  %v2865_v17 = vmul.f32 %v5434_v25, %v2829_v8  ;;  %v2771_v35 = vld [vmem:[%s5637_s8 + $0x70] sm:$0xff] }
 0x929   :  { %4007 = vpow2.f32 %v2797_v53  ;;  %v2799_v37 = vmul.f32 1.442695, %v2744_v34 }
 0x92a   :  { %2846 = vst [vmem:[#allocation7 + $0x48] sm:$0xff] %v2830_v44  ;;  %v2866_v5 = vmul.f32 %v5434_v25, %v2830_v44  ;;  %v2772_v44 = vld [vmem:[%s5637_s8 + $0x78] sm:$0xff]  ;;  %s4284_s8 = smov [#allocation7]  }
 0x92b   :  { %v4004_v0 = vpop.eup %4003  ;;  %4009 = vpow2.f32 %v2799_v37  ;;  %s3369_s17 = sshll.u32 %s4284_s8, 4  ;;  %s3370_s17 = int_to_ptr.vmem [resolvable:$true] %s3369_s17 }
 0x92c   :  { %v2893_v10 = vpack.c.bf16 %v2866_v5, %v2865_v17  ;;  %v2815_v6 = vmul.f32 %v4004_v0, %v2767_v9  ;;  %s4164_s18 = scalar_lea.vmem %s3370_s17, 2048  ;;  %p4169_p1 = scmp.lt.s32.totalorder %s3370_s17, %s3370_s17 }
 0x92d   :  { %v4006_v12 = vpop.eup %4005  ;;  %v2748_v45 = vpop.f32.mrb[192].mxu1  ;;  %p4165_p0 = scmp.ne.s32.totalorder %s3370_s17, %s4164_s18  ;;  %p4170_p2 = scmp.lt.s32.totalorder %s4164_s18, %s4164_s18 }
 0x92e   :  { %v2750_v54 = vpop.f32.mrb[193].mxu1  ;;  %3660 = vmatprep.subr.bf16.mxu0 %v2893_v10  ;;  %3709 = vmatpush3.bf16.xpose.msra.mxu1 %v2893_v10  ;;  %v2816_v36 = vmul.f32 %v4006_v12, %v2768_v22  ;;  %v2831_v57 = vadd.f32 %v2815_v6, %v2728_v55  ;;  %v4163_v6 = vld [vmem:[#allocation9] sm:$0xff] }
 0x92f   :  { %v2801_v52 = vmul.f32 1.442695, %v2750_v54  ;;  %v2752_v50 = vpop.f32.mrb[194].mxu1  ;;  %3661 = vmatpush3.bf16.xpose.msra.mxu0 %v2893_v10  ;;  %3710 = vmatprep.subr.bf16.mxu1 %v4281_v41  ;;  %v3282_v12 = vpack.c.bf16 %v4163_v6, %v4163_v6  ;;  %v5701_v54 = vld [vmem:[#allocation18_spill] sm:$0xff]  ;;  %p4171_p3 = por %p4170_p2, %p4169_p1 }
 0x930   :  { %v2754_v20 = vpop.f32.mrb[195].mxu1  ;;  %v2832_v60 = vadd.f32 %v2816_v36, %v2732_v58  ;;  %2847 = vst [vmem:[#allocation7 + $0x50] sm:$0xff] %v2831_v57  ;;  %v2867_v62 = vmul.f32 %v5434_v25, %v2831_v57  ;;  %v5702_v36 = vld [vmem:[#allocation17_spill] sm:$0xff]  ;;  %v5704_v57 = vld [vmem:[#allocation20_spill] sm:$0xff] }
 0x931   :  { %4011 = vpow2.f32 %v2801_v52  ;;  %v2803_v21 = vmul.f32 1.442695, %v2754_v20  ;;  %v5708_v20 = vld [vmem:[#allocation21_spill] sm:$0xff]  ;;  %p4172_p4 = pnand %p4171_p3, %p4165_p0 }
 0x932   :  { %2848 = vst [vmem:[#allocation7 + $0x58] sm:$0xff] %v2832_v60  ;;  %v2868_v63 = vmul.f32 %v5434_v25, %v2832_v60 }
 0x933   :  { %v4008_v55 = vpop.eup %4007  ;;  %4013 = vpow2.f32 %v2803_v21  ;;  %v5711_v21 = vld [vmem:[#allocation23_spill] sm:$0xff] }
 0x934   :  { %v2894_v29 = vpack.c.bf16 %v2868_v63, %v2867_v62  ;;  %v2817_v58 = vmul.f32 %v4008_v55, %v2769_v16  ;;  %v5713_v62 = vld [vmem:[#allocation25_spill] sm:$0xff]  ;;  %v5715_v55 = vld [vmem:[#allocation26_spill] sm:$0xff] }
 0x935   :  { %v4010_v1 = vpop.eup %4009  ;;  %v5714_v63 = vpack.c.bf16 %v4961_v32, %v5713_v62 }
 0x936   :  { %3662 = vmatprep.subr.bf16.mxu0 %v2894_v29  ;;  %3711 = vmatpush3.bf16.xpose.msra.mxu1 %v2894_v29  ;;  %v2818_v59 = vmul.f32 %v4010_v1, %v2770_v56  ;;  %v2833_v13 = vadd.f32 %v2817_v58, %v2738_v61  ;;  %v5716_v56 = vpack.c.bf16 %v4980_v40, %v5715_v55  ;;  %v5718_v58 = vld [vmem:[#allocation27_spill] sm:$0xff] }
 0x937   :  { %3663 = vmatpush3.bf16.xpose.msra.mxu0 %v2894_v29  ;;  %3712 = vmatprep.subr.bf16.mxu1 %v4281_v41  ;;  %v5717_v29 = vld [vmem:[#allocation28_spill] sm:$0xff] }
 0x938   :  { %v2834_v33 = vadd.f32 %v2818_v59, %v2742_v48  ;;  %2849 = vst [vmem:[#allocation7 + $0x60] sm:$0xff] %v2833_v13  ;;  %v2869_v8 = vmul.f32 %v5434_v25, %v2833_v13  ;;  %v5719_v1 = vpack.c.bf16 %v5717_v29, %v5718_v58 }
 0x93a   :  { %2850 = vst [vmem:[#allocation7 + $0x68] sm:$0xff] %v2834_v33  ;;  %v2870_v53 = vmul.f32 %v5434_v25, %v2834_v33 }
 0x93b   :  { %v4012_v34 = vpop.eup %4011 }
 0x93c   :  { %v2895_v61 = vpack.c.bf16 %v2870_v53, %v2869_v8  ;;  %v2819_v37 = vmul.f32 %v4012_v34, %v2771_v35 }
 0x93d   :  { %v4014_v9 = vpop.eup %4013 }
 0x93e   :  { %3664 = vmatprep.subr.bf16.mxu0 %v2895_v61  ;;  %3713 = vmatpush3.bf16.xpose.msra.mxu1 %v2895_v61  ;;  %v2820_v48 = vmul.f32 %v4014_v9, %v2772_v44  ;;  %v2835_v17 = vadd.f32 %v2819_v37, %v2748_v45  ;;  %v5703_v45 = vpack.c.bf16 %v5701_v54, %v5702_v36 }
 0x93f   :  { %3665 = vmatpush3.bf16.xpose.msra.mxu0 %v2895_v61  ;;  %3714 = vmatprep.subr.bf16.mxu1 %v4281_v41  ;;  %v5705_v41 = vld [vmem:[#allocation19_spill] sm:$0xff] }
 0x940   :  { %v2836_v5 = vadd.f32 %v2820_v48, %v2752_v50  ;;  %2851 = vst [vmem:[#allocation7 + $0x70] sm:$0xff] %v2835_v17  ;;  %v2871_v0 = vmul.f32 %v5434_v25, %v2835_v17  ;;  %v5706_v52 = vpack.c.bf16 %v5704_v57, %v5705_v41  ;;  %v5707_v50 = vld [vmem:[#allocation22_spill] sm:$0xff] }
 0x941   :  { %v5709_v60 = vpack.c.bf16 %v5707_v50, %v5708_v20 }
 0x942   :  { %2852 = vst [vmem:[#allocation7 + $0x78] sm:$0xff] %v2836_v5  ;;  %v2872_v22 = vmul.f32 %v5434_v25, %v2836_v5  ;;  %v5710_v25 = vld [vmem:[#allocation24_spill] sm:$0xff] }
 0x943   :  { %v5712_v16 = vpack.c.bf16 %v5710_v25, %v5711_v21 }
 0x944   :  { %v2896_v10 = vpack.c.bf16 %v2872_v22, %v2871_v0 }
 0x946   :  { %3666 = vmatprep.subr.bf16.mxu0 %v2896_v10  ;;  %3715 = vmatpush3.bf16.xpose.msra.mxu1 %v2896_v10 }
 0x947   :  { %3667 = vmatpush3.bf16.xpose.msra.mxu0 %v2896_v10 }
 0x94d   :  { %3717 = vmatmul.mubr.bf16.vlgmr.msra.gmra.mrb[196].mxu1 %v3282_v12 }
 0x94e   :  { %3669 = vmatmul.mubr.bf16.vlgmr.msra.gmra.mrb[196].mxu0 %v5703_v45 }
 0x94f   :  { %3672 = vmatprep.mubr.bf16.mxu0 %v5706_v52 }
 0x956   :  { %3673 = vmatmul.mubr.bf16.gmra.mrb[200].mxu0 %v5709_v60 }
 0x957   :  { %3676 = vmatprep.mubr.bf16.mxu0 %v5712_v16 }
 0x95e   :  { %3677 = vmatmul.mubr.bf16.gmra.mrb[204].mxu0 %v5714_v63 }
 0x95f   :  { %3680 = vmatprep.mubr.bf16.mxu0 %v5716_v56 }
 0x966   :  { %3681 = vmatmul.mubr.bf16.gmra.mrb[208].mxu0 %v5719_v1 }
 0x967   :  { %3684 = vmatprep.mubr.bf16.mxu0 %v2881_v26 }
 0x96e   :  { %3685 = vmatmul.mubr.bf16.gmra.mrb[212].mxu0 %v2882_v38 }
 0x96f   :  { %3688 = vmatprep.mubr.bf16.mxu0 %v2883_v39 }
 0x976   :  { %3689 = vmatmul.mubr.bf16.gmra.mrb[216].mxu0 %v2884_v14 }
 0x977   :  { %3692 = vmatprep.mubr.bf16.mxu0 %v2885_v30 }
 0x97e   :  { %3693 = vmatmul.mubr.bf16.gmra.mrb[220].mxu0 %v2886_v42 }
 0x97f   :  { %3696 = vmatprep.mubr.bf16.mxu0 %v2887_v31 }
 0x986   :  { %3697 = vmatmul.mubr.bf16.gmra.mrb[224].mxu0 %v2888_v3 }
 0x987   :  { %4175 = shalt.err (!%p4172_p4)
}
 0x988   :  { %s4176_s1 = scalar_lea.hbm %s5643_s14, 2048 }
 0x989   :  { %p4177_p5 = scmp.ne.s32.totalorder %s5643_s14, %s4176_s1  ;;  %p4180_p6 = scmp.lt.u32.totalorder %s4176_s1, %s5643_s14 }
 0x98b   :  { %p4182_p7 = pnand %p4180_p6, %p4177_p5 }
 0x98d   :  { %4185 = shalt.err (!%p4182_p7)
}
 0x98e   :  { %s4285_s22 = smov 128   ;;  %s4286_s23 = smov 8  }
 0x98f   :  { %3375 = dma.vmem_to_hbm [thread:$0]  %s3370_s17, 2048, %s5643_s14, [#allocation8], %s4285_s22, %s4285_s22, %s4286_s23  }
 0x990   :  { %s4287_s2 = smov [#allocation9]  }
 0x991   :  { %s3382_s26 = sshll.u32 %s4287_s2, 4  ;;  %s3383_s26 = int_to_ptr.vmem [resolvable:$true] %s3382_s26 }
 0x992   :  { %s4186_s27 = scalar_lea.vmem %s3383_s26, 128  ;;  %p4191_p9 = scmp.lt.s32.totalorder %s3383_s26, %s3383_s26 }
 0x993   :  { %p4187_p8 = scmp.ne.s32.totalorder %s3383_s26, %s4186_s27  ;;  %p4192_p10 = scmp.lt.s32.totalorder %s4186_s27, %s4186_s27 }
 0x995   :  { %p4193_p11 = por %p4192_p10, %p4191_p9 }
 0x997   :  { %p4194_p12 = pnand %p4193_p11, %p4187_p8 }
 0x999   :  { %4197 = shalt.err (!%p4194_p12)
}
 0x99a   :  { %s4198_s6 = scalar_lea.hbm %s5644_s15, 128 }
 0x99b   :  { %p4199_p13 = scmp.ne.s32.totalorder %s5644_s15, %s4198_s6  ;;  %p4202_p0 = scmp.lt.u32.totalorder %s4198_s6, %s5644_s15 }
 0x99d   :  { %p4204_p1 = pnand %p4202_p0, %p4199_p13 }
 0x99f   :  { %4207 = shalt.err (!%p4204_p1)
}
 0x9a0   :  { %3385 = dma.vmem_to_hbm [thread:$0]  %s3383_s26, 128, %s5644_s15, [#allocation8]  }
 0x9a1   :  { %s4288_s15 = smov [#allocation4]   ;;  %s4289_s8 = smov [#allocation6]  }
 0x9a2   :  { %s3348_s16 = sshll.u32 %s4288_s15, 4  ;;  %s3357_s17 = sshll.u32 %s4289_s8, 4  ;;  %s5573_s16 = int_to_ptr.vmem [resolvable:$true] %s3348_s16  ;;  %s5575_s17 = int_to_ptr.vmem [resolvable:$true] %s3357_s17 }
 0x9a3   :  { %s4208_s18 = scalar_lea.vmem %s5573_s16, 128  ;;  %p4213_p3 = scmp.lt.s32.totalorder %s5573_s16, %s5573_s16 }
 0x9a4   :  { %p4209_p2 = scmp.ne.s32.totalorder %s5573_s16, %s4208_s18  ;;  %p4214_p4 = scmp.lt.s32.totalorder %s4208_s18, %s4208_s18 }
 0x9a6   :  { %p4215_p5 = por %p4214_p4, %p4213_p3 }
 0x9a8   :  { %p4216_p6 = pnand %p4215_p5, %p4209_p2 }
 0xa20   :  { %v3317_v32 = vpop.f32.mrb[196].mxu1 }
 0xa21   :  { %v3574_v40 = vmul.f32 -1.442695, %v3317_v32  ;;  %v3670_v28 = vpop.f32.mrb[196].mxu0  ;;  %v3718_v43 = vpop.f32.mrb[197].mxu1 }
 0xa22   :  { %v3544_v26 = vmul.f32 -1.442695, %v3670_v28  ;;  %v2931_v27 = vpop.f32.mrb[197].mxu0  ;;  %v3320_v11 = vpop.f32.mrb[198].mxu1 }
 0xa23   :  { %4015 = vpow2.f32 %v3574_v40  ;;  %v3542_v38 = vmul.f32 -1.442695, %v2931_v27  ;;  %v3671_v46 = vpop.f32.mrb[198].mxu0  ;;  %v3719_v49 = vpop.f32.mrb[199].mxu1 }
 0xa24   :  { %4017 = vpow2.f32 %v3544_v26  ;;  %v3545_v39 = vmul.f32 -1.442695, %v3671_v46  ;;  %v2934_v24 = vpop.f32.mrb[199].mxu0 }
 0xa25   :  { %4019 = vpow2.f32 %v3542_v38  ;;  %v3543_v19 = vmul.f32 -1.442695, %v2934_v24 }
 0xa26   :  { %4021 = vpow2.f32 %v3545_v39 }
 0xa27   :  { %4023 = vpow2.f32 %v3543_v19 }
 0xa29   :  { %v3674_v14 = vpop.f32.mrb[200].mxu0 }
 0xa2a   :  { %v3548_v2 = vmul.f32 -1.442695, %v3674_v14  ;;  %v2947_v4 = vpop.f32.mrb[201].mxu0 }
 0xa2b   :  { %v3546_v30 = vmul.f32 -1.442695, %v2947_v4  ;;  %v3675_v47 = vpop.f32.mrb[202].mxu0 }
 0xa2c   :  { %4025 = vpow2.f32 %v3548_v2  ;;  %v3549_v51 = vmul.f32 -1.442695, %v3675_v47  ;;  %v2950_v42 = vpop.f32.mrb[203].mxu0 }
 0xa2d   :  { %v4016_v18 = vpop.eup %4015  ;;  %4027 = vpow2.f32 %v3546_v30  ;;  %v3547_v15 = vmul.f32 -1.442695, %v2950_v42 }
 0xa2e   :  { %v4018_v31 = vpop.eup %4017  ;;  %4029 = vpow2.f32 %v3549_v51  ;;  %v3326_v7 = vadd.f32 1.0, %v4016_v18 }
 0xa2f   :  { %v4020_v23 = vpop.eup %4019  ;;  %v3156_v3 = vadd.f32 1.0, %v4018_v31  ;;  %4031 = vpow2.f32 %v3547_v15 }
 0xa30   :  { %v4022_v59 = vpop.eup %4021  ;;  %v3154_v13 = vadd.f32 1.0, %v4020_v23  ;;  %4033 = vrcp.f32 %v3326_v7 }
 0xa31   :  { %v4024_v33 = vpop.eup %4023  ;;  %4035 = vrcp.f32 %v3156_v3  ;;  %v3157_v35 = vadd.f32 1.0, %v4022_v59  ;;  %v3678_v8 = vpop.f32.mrb[204].mxu0 }
 0xa32   :  { %4037 = vrcp.f32 %v3154_v13  ;;  %v3155_v53 = vadd.f32 1.0, %v4024_v33  ;;  %v3552_v34 = vmul.f32 -1.442695, %v3678_v8  ;;  %v2963_v44 = vpop.f32.mrb[205].mxu0 }
 0xa33   :  { %4039 = vrcp.f32 %v3157_v35  ;;  %v3550_v61 = vmul.f32 -1.442695, %v2963_v44  ;;  %v3679_v37 = vpop.f32.mrb[206].mxu0 }
 0xa34   :  { %4041 = vrcp.f32 %v3155_v53  ;;  %v3553_v9 = vmul.f32 -1.442695, %v3679_v37  ;;  %v2966_v48 = vpop.f32.mrb[207].mxu0 }
 0xa35   :  { %4043 = vpow2.f32 %v3552_v34  ;;  %v3551_v17 = vmul.f32 -1.442695, %v2966_v48 }
 0xa36   :  { %v4026_v5 = vpop.eup %4025  ;;  %4045 = vpow2.f32 %v3550_v61 }
 0xa37   :  { %v4028_v0 = vpop.eup %4027  ;;  %v3160_v22 = vadd.f32 1.0, %v4026_v5  ;;  %4047 = vpow2.f32 %v3553_v9 }
 0xa38   :  { %v4030_v10 = vpop.eup %4029  ;;  %v3158_v6 = vadd.f32 1.0, %v4028_v0  ;;  %4049 = vpow2.f32 %v3551_v17 }
 0xa39   :  { %v4032_v12 = vpop.eup %4031  ;;  %4051 = vrcp.f32 %v3160_v22  ;;  %v3161_v54 = vadd.f32 1.0, %v4030_v10  ;;  %v3682_v36 = vpop.f32.mrb[208].mxu0 }
 0xa3a   :  { %v4034_v45 = vpop.eup %4033  ;;  %4053 = vrcp.f32 %v3158_v6  ;;  %v3159_v57 = vadd.f32 1.0, %v4032_v12  ;;  %v3556_v41 = vmul.f32 -1.442695, %v3682_v36  ;;  %v2979_v52 = vpop.f32.mrb[209].mxu0 }
 0xa3b   :  { %v4036_v50 = vpop.eup %4035  ;;  %4055 = vrcp.f32 %v3161_v54  ;;  %v3554_v20 = vmul.f32 -1.442695, %v2979_v52  ;;  %v3683_v60 = vpop.f32.mrb[210].mxu0  ;;  %3329 = vst [vmem:[#allocation4] sm:$0xff] %v4034_v45 }
 0xa3c   :  { %v4038_v25 = vpop.eup %4037  ;;  %3252 = vst [vmem:[#allocation2 + $0x10] sm:$0xff] %v4036_v50  ;;  %4057 = vrcp.f32 %v3159_v57  ;;  %v3557_v21 = vmul.f32 -1.442695, %v3683_v60  ;;  %v2982_v16 = vpop.f32.mrb[211].mxu0 }
 0xa3d   :  { %4219 = shalt.err (!%p4216_p6)
}
 0xa3e   :  { %s4220_s1 = scalar_lea.hbm %s5641_s12, 128 }
 0xa3f   :  { %p4221_p7 = scmp.ne.s32.totalorder %s5641_s12, %s4220_s1  ;;  %p4224_p8 = scmp.lt.u32.totalorder %s4220_s1, %s5641_s12 }
 0xa41   :  { %p4226_p9 = pnand %p4224_p8, %p4221_p7 }
 0xa43   :  { %4229 = shalt.err (!%p4226_p9)
}
 0xa44   :  { %3351 = dma.vmem_to_hbm [thread:$0]  %s5573_s16, 128, %s5641_s12, [#allocation5]   ;;  %v4040_v62 = vpop.eup %4039  ;;  %3250 = vst [vmem:[#allocation2] sm:$0xff] %v4038_v25  ;;  %4059 = vpow2.f32 %v3556_v41  ;;  %v3555_v63 = vmul.f32 -1.442695, %v2982_v16 }
 0xa45   :  { %s4230_s2 = scalar_lea.vmem %s5575_s17, 4096  ;;  %p4235_p11 = scmp.lt.s32.totalorder %s5575_s17, %s5575_s17 }
 0xa46   :  { %p4231_p10 = scmp.ne.s32.totalorder %s5575_s17, %s4230_s2  ;;  %p4236_p12 = scmp.lt.s32.totalorder %s4230_s2, %s4230_s2 }
 0xa48   :  { %p4237_p13 = por %p4236_p12, %p4235_p11 }
 0xa4a   :  { %p4238_p0 = pnand %p4237_p13, %p4231_p10 }
 0xa4c   :  { %4241 = shalt.err (!%p4238_p0)
}
 0xa4d   :  { %s4242_s28 = scalar_lea.hbm %s5642_s13, 4096 }
 0xa4e   :  { %p4243_p1 = scmp.ne.s32.totalorder %s5642_s13, %s4242_s28  ;;  %p4246_p2 = scmp.lt.u32.totalorder %s4242_s28, %s5642_s13 }
 0xa50   :  { %p4248_p3 = pnand %p4246_p2, %p4243_p1 }
 0xa52   :  { %4251 = shalt.err (!%p4248_p3)
}
 0xa53   :  { %3363 = dma.vmem_to_hbm [thread:$0]  %s5575_s17, 4096, %s5642_s13, [#allocation5], %s4285_s22, %s4285_s22, %s4286_s23   ;;  %v4042_v55 = vpop.eup %4041  ;;  %3253 = vst [vmem:[#allocation2 + $0x18] sm:$0xff] %v4040_v62  ;;  %4061 = vpow2.f32 %v3554_v20  ;;  %v3686_v40 = vpop.f32.mrb[212].mxu0 }
 0xa54   :  { %v4044_v56 = vpop.eup %4043  ;;  %3251 = vst [vmem:[#allocation2 + $0x8] sm:$0xff] %v4042_v55  ;;  %4063 = vpow2.f32 %v3557_v21  ;;  %v3560_v26 = vmul.f32 -1.442695, %v3686_v40  ;;  %v2995_v27 = vpop.f32.mrb[213].mxu0  ;;  %s4290_s13 = smov [#allocation2]  }
 0xa55   :  { %v4046_v29 = vpop.eup %4045  ;;  %v3164_v58 = vadd.f32 1.0, %v4044_v56  ;;  %4065 = vpow2.f32 %v3555_v63  ;;  %v3558_v46 = vmul.f32 -1.442695, %v2995_v27  ;;  %v3687_v49 = vpop.f32.mrb[214].mxu0  ;;  %s3335_s14 = sshll.u32 %s4290_s13, 4  ;;  %s3336_s14 = int_to_ptr.vmem [resolvable:$true] %s3335_s14 }
 0xa56   :  { %v4048_v1 = vpop.eup %4047  ;;  %v3162_v32 = vadd.f32 1.0, %v4046_v29  ;;  %v3561_v24 = vmul.f32 -1.442695, %v3687_v49  ;;  %v2998_v19 = vpop.f32.mrb[215].mxu0  ;;  %s4252_s30 = scalar_lea.vmem %s3336_s14, 4096  ;;  %p4257_p5 = scmp.lt.s32.totalorder %s3336_s14, %s3336_s14 }
 0xa57   :  { %v4050_v28 = vpop.eup %4049  ;;  %4067 = vrcp.f32 %v3164_v58  ;;  %v3165_v43 = vadd.f32 1.0, %v4048_v1  ;;  %v3559_v2 = vmul.f32 -1.442695, %v2998_v19  ;;  %v3690_v15 = vpop.f32.mrb[216].mxu0  ;;  %p4253_p4 = scmp.ne.s32.totalorder %s3336_s14, %s4252_s30  ;;  %p4258_p6 = scmp.lt.s32.totalorder %s4252_s30, %s4252_s30 }
 0xa58   :  { %v4052_v11 = vpop.eup %4051  ;;  %4069 = vrcp.f32 %v3162_v32  ;;  %v3163_v38 = vadd.f32 1.0, %v4050_v28  ;;  %v3564_v23 = vmul.f32 -1.442695, %v3690_v15  ;;  %v3011_v3 = vpop.f32.mrb[217].mxu0 }
 0xa59   :  { %v4054_v39 = vpop.eup %4053  ;;  %3256 = vst [vmem:[#allocation2 + $0x30] sm:$0xff] %v4052_v11  ;;  %4071 = vrcp.f32 %v3165_v43  ;;  %v3562_v13 = vmul.f32 -1.442695, %v3011_v3  ;;  %v3691_v33 = vpop.f32.mrb[218].mxu0  ;;  %p4259_p7 = por %p4258_p6, %p4257_p5 }
 0xa5a   :  { %v4056_v14 = vpop.eup %4055  ;;  %3254 = vst [vmem:[#allocation2 + $0x20] sm:$0xff] %v4054_v39  ;;  %4073 = vrcp.f32 %v3163_v38  ;;  %v3565_v8 = vmul.f32 -1.442695, %v3691_v33  ;;  %v3014_v53 = vpop.f32.mrb[219].mxu0 }
 0xa5b   :  { %v4058_v4 = vpop.eup %4057  ;;  %3257 = vst [vmem:[#allocation2 + $0x38] sm:$0xff] %v4056_v14  ;;  %4075 = vpow2.f32 %v3560_v26  ;;  %v3563_v44 = vmul.f32 -1.442695, %v3014_v53  ;;  %v3694_v5 = vpop.f32.mrb[220].mxu0  ;;  %p4260_p8 = pnand %p4259_p7, %p4253_p4 }
 0xa5c   :  { %v4060_v30 = vpop.eup %4059  ;;  %3255 = vst [vmem:[#allocation2 + $0x28] sm:$0xff] %v4058_v4  ;;  %4077 = vpow2.f32 %v3558_v46  ;;  %v3027_v10 = vpop.f32.mrb[221].mxu0  ;;  %v3568_v54 = vmul.f32 -1.442695, %v3694_v5 }
 0xa5d   :  { %v4062_v47 = vpop.eup %4061  ;;  %v3168_v51 = vadd.f32 1.0, %v4060_v30  ;;  %4079 = vpow2.f32 %v3561_v24  ;;  %v3695_v36 = vpop.f32.mrb[222].mxu0  ;;  %v3566_v41 = vmul.f32 -1.442695, %v3027_v10 }
 0xa5e   :  { %v4064_v42 = vpop.eup %4063  ;;  %v3166_v18 = vadd.f32 1.0, %v4062_v47  ;;  %4081 = vpow2.f32 %v3559_v2  ;;  %v3030_v52 = vpop.f32.mrb[223].mxu0  ;;  %v3569_v20 = vmul.f32 -1.442695, %v3695_v36 }
 0xa5f   :  { %v4066_v31 = vpop.eup %4065  ;;  %4083 = vrcp.f32 %v3168_v51  ;;  %v3169_v7 = vadd.f32 1.0, %v4064_v42  ;;  %v3567_v25 = vmul.f32 -1.442695, %v3030_v52  ;;  %v3698_v55 = vpop.f32.mrb[224].mxu0 }
 0xa60   :  { %4085 = vrcp.f32 %v3166_v18  ;;  %v3167_v59 = vadd.f32 1.0, %v4066_v31  ;;  %v3043_v58 = vpop.f32.mrb[225].mxu0  ;;  %v3572_v40 = vmul.f32 -1.442695, %v3698_v55 }
 0xa61   :  { %v4068_v35 = vpop.eup %4067  ;;  %4087 = vrcp.f32 %v3169_v7  ;;  %v3699_v28 = vpop.f32.mrb[226].mxu0  ;;  %v3570_v26 = vmul.f32 -1.442695, %v3043_v58 }
 0xa62   :  { %v4070_v34 = vpop.eup %4069  ;;  %3260 = vst [vmem:[#allocation2 + $0x50] sm:$0xff] %v4068_v35  ;;  %4089 = vrcp.f32 %v3167_v59  ;;  %v3046_v27 = vpop.f32.mrb[227].mxu0  ;;  %v3573_v38 = vmul.f32 -1.442695, %v3699_v28 }
 0xa63   :  { %v4072_v61 = vpop.eup %4071  ;;  %3258 = vst [vmem:[#allocation2 + $0x40] sm:$0xff] %v4070_v34  ;;  %4091 = vpow2.f32 %v3564_v23  ;;  %v3571_v49 = vmul.f32 -1.442695, %v3046_v27 }
 0xa64   :  { %v4074_v37 = vpop.eup %4073  ;;  %3261 = vst [vmem:[#allocation2 + $0x58] sm:$0xff] %v4072_v61  ;;  %4093 = vpow2.f32 %v3562_v13 }
 0xa65   :  { %v4076_v9 = vpop.eup %4075  ;;  %3259 = vst [vmem:[#allocation2 + $0x48] sm:$0xff] %v4074_v37  ;;  %4095 = vpow2.f32 %v3565_v8 }
 0xa66   :  { %v4078_v48 = vpop.eup %4077  ;;  %v3172_v17 = vadd.f32 1.0, %v4076_v9  ;;  %4097 = vpow2.f32 %v3563_v44 }
 0xa67   :  { %v4080_v0 = vpop.eup %4079  ;;  %v3170_v22 = vadd.f32 1.0, %v4078_v48 }
 0xa68   :  { %v4082_v6 = vpop.eup %4081  ;;  %4099 = vrcp.f32 %v3172_v17  ;;  %v3173_v12 = vadd.f32 1.0, %v4080_v0 }
 0xa69   :  { %v4084_v45 = vpop.eup %4083  ;;  %4101 = vrcp.f32 %v3170_v22  ;;  %v3171_v57 = vadd.f32 1.0, %v4082_v6 }
 0xa6a   :  { %v4086_v50 = vpop.eup %4085  ;;  %3264 = vst [vmem:[#allocation2 + $0x70] sm:$0xff] %v4084_v45  ;;  %4103 = vrcp.f32 %v3173_v12 }
 0xa6b   :  { %v4088_v60 = vpop.eup %4087  ;;  %3262 = vst [vmem:[#allocation2 + $0x60] sm:$0xff] %v4086_v50  ;;  %4105 = vrcp.f32 %v3171_v57 }
 0xa6c   :  { %v4090_v21 = vpop.eup %4089  ;;  %3265 = vst [vmem:[#allocation2 + $0x78] sm:$0xff] %v4088_v60  ;;  %4107 = vpow2.f32 %v3568_v54 }
 0xa6d   :  { %v4092_v16 = vpop.eup %4091  ;;  %3263 = vst [vmem:[#allocation2 + $0x68] sm:$0xff] %v4090_v21  ;;  %4109 = vpow2.f32 %v3566_v41 }
 0xa6e   :  { %v4094_v62 = vpop.eup %4093  ;;  %v3176_v63 = vadd.f32 1.0, %v4092_v16  ;;  %4111 = vpow2.f32 %v3569_v20 }
 0xa6f   :  { %v4096_v56 = vpop.eup %4095  ;;  %v3174_v29 = vadd.f32 1.0, %v4094_v62  ;;  %4113 = vpow2.f32 %v3567_v25 }
 0xa70   :  { %v4098_v1 = vpop.eup %4097  ;;  %4115 = vrcp.f32 %v3176_v63  ;;  %v3177_v32 = vadd.f32 1.0, %v4096_v56 }
 0xa71   :  { %4117 = vrcp.f32 %v3174_v29  ;;  %v3175_v43 = vadd.f32 1.0, %v4098_v1 }
 0xa72   :  { %v4100_v11 = vpop.eup %4099  ;;  %4119 = vrcp.f32 %v3177_v32 }
 0xa73   :  { %v4102_v46 = vpop.eup %4101  ;;  %3268 = vst [vmem:[#allocation2 + $0x90] sm:$0xff] %v4100_v11  ;;  %4121 = vrcp.f32 %v3175_v43 }
 0xa74   :  { %v4104_v39 = vpop.eup %4103  ;;  %3266 = vst [vmem:[#allocation2 + $0x80] sm:$0xff] %v4102_v46  ;;  %4123 = vpow2.f32 %v3572_v40 }
 0xa75   :  { %v4106_v24 = vpop.eup %4105  ;;  %3269 = vst [vmem:[#allocation2 + $0x98] sm:$0xff] %v4104_v39  ;;  %4125 = vpow2.f32 %v3570_v26 }
 0xa76   :  { %v4108_v19 = vpop.eup %4107  ;;  %3267 = vst [vmem:[#allocation2 + $0x88] sm:$0xff] %v4106_v24  ;;  %4127 = vpow2.f32 %v3573_v38 }
 0xa77   :  { %v4110_v14 = vpop.eup %4109  ;;  %v3180_v2 = vadd.f32 1.0, %v4108_v19  ;;  %4129 = vpow2.f32 %v3571_v49 }
 0xa78   :  { %v4112_v4 = vpop.eup %4111  ;;  %v3178_v30 = vadd.f32 1.0, %v4110_v14 }
 0xa79   :  { %v4114_v47 = vpop.eup %4113  ;;  %4131 = vrcp.f32 %v3180_v2  ;;  %v3181_v51 = vadd.f32 1.0, %v4112_v4 }
 0xa7a   :  { %v4116_v42 = vpop.eup %4115  ;;  %4133 = vrcp.f32 %v3178_v30  ;;  %v3179_v18 = vadd.f32 1.0, %v4114_v47 }
 0xa7b   :  { %v4118_v15 = vpop.eup %4117  ;;  %3272 = vst [vmem:[#allocation2 + $0xb0] sm:$0xff] %v4116_v42  ;;  %4135 = vrcp.f32 %v3181_v51 }
 0xa7c   :  { %v4120_v31 = vpop.eup %4119  ;;  %3270 = vst [vmem:[#allocation2 + $0xa0] sm:$0xff] %v4118_v15  ;;  %4137 = vrcp.f32 %v3179_v18 }
 0xa7d   :  { %v4122_v7 = vpop.eup %4121  ;;  %3273 = vst [vmem:[#allocation2 + $0xb8] sm:$0xff] %v4120_v31 }
 0xa7e   :  { %v4124_v23 = vpop.eup %4123  ;;  %3271 = vst [vmem:[#allocation2 + $0xa8] sm:$0xff] %v4122_v7 }
 0xa7f   :  { %v4126_v3 = vpop.eup %4125  ;;  %v3184_v59 = vadd.f32 1.0, %v4124_v23 }
 0xa80   :  { %v4128_v13 = vpop.eup %4127  ;;  %v3182_v33 = vadd.f32 1.0, %v4126_v3 }
 0xa81   :  { %v4130_v35 = vpop.eup %4129  ;;  %4139 = vrcp.f32 %v3184_v59  ;;  %v3185_v8 = vadd.f32 1.0, %v4128_v13 }
 0xa82   :  { %4141 = vrcp.f32 %v3182_v33  ;;  %v3183_v53 = vadd.f32 1.0, %v4130_v35 }
 0xa83   :  { %v4132_v34 = vpop.eup %4131  ;;  %4143 = vrcp.f32 %v3185_v8 }
 0xa84   :  { %v4134_v44 = vpop.eup %4133  ;;  %3276 = vst [vmem:[#allocation2 + $0xd0] sm:$0xff] %v4132_v34  ;;  %4145 = vrcp.f32 %v3183_v53 }
 0xa85   :  { %v4136_v61 = vpop.eup %4135  ;;  %3274 = vst [vmem:[#allocation2 + $0xc0] sm:$0xff] %v4134_v44 }
 0xa86   :  { %v4138_v37 = vpop.eup %4137  ;;  %3277 = vst [vmem:[#allocation2 + $0xd8] sm:$0xff] %v4136_v61 }
 0xa87   :  { %3275 = vst [vmem:[#allocation2 + $0xc8] sm:$0xff] %v4138_v37 }
 0xa8b   :  { %v4140_v9 = vpop.eup %4139 }
 0xa8c   :  { %v4142_v48 = vpop.eup %4141  ;;  %3280 = vst [vmem:[#allocation2 + $0xf0] sm:$0xff] %v4140_v9 }
 0xa8d   :  { %v4144_v17 = vpop.eup %4143  ;;  %3278 = vst [vmem:[#allocation2 + $0xe0] sm:$0xff] %v4142_v48 }
 0xa8e   :  { %v4146_v5 = vpop.eup %4145  ;;  %3281 = vst [vmem:[#allocation2 + $0xf8] sm:$0xff] %v4144_v17 }
 0xa8f   :  { %3279 = vst [vmem:[#allocation2 + $0xe8] sm:$0xff] %v4146_v5 }
 0xa90   :  { %4263 = shalt.err (!%p4260_p8)
}
 0xa91   :  { %s4264_s16 = scalar_lea.hbm %s5640_s11, 4096 }
 0xa92   :  { %p4265_p9 = scmp.ne.s32.totalorder %s5640_s11, %s4264_s16  ;;  %p4268_p10 = scmp.lt.u32.totalorder %s4264_s16, %s5640_s11 }
 0xa94   :  { %p4270_p11 = pnand %p4268_p10, %p4265_p9 }
 0xa96   :  { %4273 = shalt.err (!%p4270_p11)
}
 0xa97   :  { %3341 = dma.vmem_to_hbm [thread:$0]  %s3336_s14, 4096, %s5640_s11, [#allocation3], %s4285_s22, %s4285_s22, %s4286_s23  }
 0xa98   :  { %4274 = dma.done.wait [#allocation3], 4096  }
 0xa99   :  { %4275 = vsyncadd [#allocation3], 4294963200 }
 0xa9a   :  { %4276 = dma.done.wait [#allocation5], 4224  }
 0xa9b   :  { %4277 = vsyncadd [#allocation5], 4294963072 }
 0xa9c   :  { %4278 = dma.done.wait [#allocation8], 2176  }
 0xa9d   :  { %4279 = vsyncadd [#allocation8], 4294965120 }
 0xa9e   :  { %3401 = vsyncpa [#allocation3], 1 }
 0xa9f   :  { %3402 = vsyncpa [#allocation5], 1 }
 0xaa0   :  { %3403 = vsyncpa [#allocation8], 1 }

</bundles_post_ra>
